<compile_context>
chip_gen: v6e
topology: v6e:2x2x1
jax: 0.10.0
libtpu: 0.0.40
codegen_flags: <defaults>
</compile_context>

<pallas_src>
import jax
import jax.numpy as jnp
from jax.experimental import pallas as pl
from jax.experimental.pallas import tpu as pltpu


def _round_up(v, m):
    return (v + m - 1) // m * m


def gat_kernel(x_ref, xT_ref, r_ref, rT_ref, wij_ref, wijT_ref, wr_ref, wrT_ref,
               dst_c_ref, src_c_ref, rel_c_ref, dst_r_ref, src_r_ref, rel_r_ref,
               out_ref,
               an_col_ref, an_row_ref, ar_col_ref, ar_row_ref, ml_ref):
    p = pl.program_id(0)          # 0: segment max, 1: segment sum-exp, 2: aggregate
    e = pl.program_id(1)          # edge tile
    n_et = pl.num_programs(1)

    NP, HP = out_ref.shape
    TE = dst_c_ref.shape[0]
    RP = ar_col_ref.shape[0]
    f32 = jnp.float32
    NEG = jnp.float32(-1e30)

    @pl.when((p == 0) & (e == 0))
    def _init():
        # Fused a_i/a_j projection (single [HP,2] weight) in both layouts,
        # relation projection, per-node softmax state, output accumulator.
        an_col_ref[...] = jnp.dot(x_ref[...], wij_ref[...], preferred_element_type=f32)
        an_row_ref[...] = jnp.dot(wijT_ref[...], xT_ref[...], preferred_element_type=f32)
        ar_col_ref[...] = jnp.dot(r_ref[...], wr_ref[...], preferred_element_type=f32)
        ar_row_ref[...] = jnp.dot(wrT_ref[...], rT_ref[...], preferred_element_type=f32)
        ml_ref[0:1, :] = jnp.full((1, NP), NEG, f32)     # running segment max
        ml_ref[1:2, :] = jnp.zeros((1, NP), f32)          # running sum of exp
        out_ref[...] = jnp.zeros_like(out_ref)

    # ---- helpers (traced inline; padded edges have index -1 -> all-zero rows) ----
    def edge_score_col():
        # per-edge raw leaky-relu score as a column [TE, 1]; gathers on the MXU.
        lane_n = jax.lax.broadcasted_iota(jnp.int32, (TE, NP), 1)
        lane_r = jax.lax.broadcasted_iota(jnp.int32, (TE, RP), 1)
        dmask = dst_c_ref[...] == lane_n                          # [TE, NP]
        D = dmask.astype(f32)
        S = (src_c_ref[...] == lane_n).astype(f32)
        Rh = (rel_c_ref[...] == lane_r).astype(f32)
        raw = (jnp.dot(D, an_col_ref[:, 0:1], preferred_element_type=f32)
               + jnp.dot(S, an_col_ref[:, 1:2], preferred_element_type=f32)
               + jnp.dot(Rh, ar_col_ref[...], preferred_element_type=f32))
        return jnp.where(raw > 0, raw, 0.01 * raw), dmask

    def node_major_onehots():
        sub_n = jax.lax.broadcasted_iota(jnp.int32, (NP, TE), 0)
        sub_r = jax.lax.broadcasted_iota(jnp.int32, (RP, TE), 0)
        Dt = (sub_n == dst_r_ref[...]).astype(f32)                # [NP, TE]
        St = (sub_n == src_r_ref[...]).astype(f32)                # [NP, TE]
        Rt = (sub_r == rel_r_ref[...]).astype(f32)                # [RP, TE]
        return Dt, St, Rt

    def edge_score_row(Dt, St, Rt):
        # same score, row layout [1, TE]; gathers on the MXU.
        raw = (jnp.dot(an_row_ref[0:1, :], Dt, preferred_element_type=f32)
               + jnp.dot(an_row_ref[1:2, :], St, preferred_element_type=f32)
               + jnp.dot(ar_row_ref[...], Rt, preferred_element_type=f32))
        return jnp.where(raw > 0, raw, 0.01 * raw)

    @pl.when(p == 0)
    def _pass_max():
        score, dmask = edge_score_col()                           # [TE,1], [TE,NP]
        masked = jnp.where(dmask, score, NEG)                      # [TE, NP]
        tmax = jnp.max(masked, axis=0, keepdims=True)              # [1, NP]
        ml_ref[0:1, :] = jnp.maximum(ml_ref[0:1, :], tmax)

    @pl.when(p == 1)
    def _pass_sumexp():
        Dt, St, Rt = node_major_onehots()
        score = edge_score_row(Dt, St, Rt)                         # [1, TE]
        m_e = jnp.dot(ml_ref[0:1, :], Dt, preferred_element_type=f32)   # max[dst_e]
        exps = jnp.exp(score - m_e)                                # [1, TE]
        lane_n = jax.lax.broadcasted_iota(jnp.int32, (TE, NP), 1)
        D = (dst_c_ref[...] == lane_n).astype(f32)                 # [TE, NP]
        ml_ref[1:2, :] = ml_ref[1:2, :] + jnp.dot(exps, D, preferred_element_type=f32)

    @pl.when(p == 2)
    def _pass_aggregate():
        Dt, St, Rt = node_major_onehots()
        score = edge_score_row(Dt, St, Rt)                         # [1, TE]
        ml_e = jnp.dot(ml_ref[...], Dt, preferred_element_type=f32)     # [2, TE]
        m_e = ml_e[0:1, :]
        l_e = ml_e[1:2, :]
        alpha = jnp.exp(score - m_e) * pl.reciprocal(l_e + 1e-16, approx=True)  # [1,TE]
        lane_n = jax.lax.broadcasted_iota(jnp.int32, (TE, NP), 1)
        S = (src_c_ref[...] == lane_n).astype(f32)                 # [TE, NP]
        xsrc = jnp.dot(S, x_ref[...], preferred_element_type=f32)  # x[src_e]  [TE, HP]
        out_ref[...] = out_ref[...] + jnp.dot(Dt * alpha, xsrc, preferred_element_type=f32)

    @pl.when((p == 2) & (e == n_et - 1))
    def _finish():
        # F.relu(F.relu(.)) == F.relu(.)
        out_ref[...] = jnp.maximum(out_ref[...], 0.0)


def gat_forward(x, r, edge_index, rel, wi, wj, wr, *, edge_tile=128):
    """x: [N,H] f32, r: [R,RH] f32, edge_index: [2,E] int32 (row0=src j, row1=dst i),
    rel: [E] int32, wi/wj: [H,1], wr: [RH,1].  Returns [N,H] f32."""
    N, H = x.shape
    R, RH = r.shape
    E = edge_index.shape[1]
    f32 = jnp.float32

    NP = _round_up(N, 128)
    HP = _round_up(H, 128)
    RP = _round_up(R, 128)
    RHP = _round_up(RH, 128)
    TE = edge_tile
    EP = _round_up(max(E, 1), TE)
    n_et = EP // TE

    # Zero-padded, lane-dense operands (padding never contaminates real outputs).
    x_p = jnp.zeros((NP, HP), f32).at[:N, :H].set(x)
    r_p = jnp.zeros((RP, RHP), f32).at[:R, :RH].set(r)
    wij = jnp.zeros((HP, 2), f32).at[:H, 0].set(wi[:, 0]).at[:H, 1].set(wj[:, 0])
    wr_p = jnp.zeros((RHP, 1), f32).at[:RH, :].set(wr)
    xT, rT, wijT, wrT = x_p.T, r_p.T, wij.T, wr_p.T           # layout glue only

    src = edge_index[0].astype(jnp.int32)
    dst = edge_index[1].astype(jnp.int32)
    rel = rel.astype(jnp.int32)
    pad = EP - E
    dst_p = jnp.pad(dst, (0, pad), constant_values=-1)        # -1 -> matches nothing
    src_p = jnp.pad(src, (0, pad), constant_values=-1)
    rel_p = jnp.pad(rel, (0, pad), constant_values=-1)
    dst_c, src_c, rel_c = (a.reshape(EP, 1) for a in (dst_p, src_p, rel_p))
    dst_r, src_r, rel_r = (a.reshape(1, EP) for a in (dst_p, src_p, rel_p))

    def full(shape):
        return pl.BlockSpec(shape, lambda p, e: (0, 0))

    col_idx = pl.BlockSpec((TE, 1), lambda p, e: (e, 0))
    row_idx = pl.BlockSpec((1, TE), lambda p, e: (0, e))

    out_p = pl.pallas_call(
        gat_kernel,
        out_shape=jax.ShapeDtypeStruct((NP, HP), f32),
        grid=(3, n_et),
        in_specs=[
            full((NP, HP)), full((HP, NP)), full((RP, RHP)), full((RHP, RP)),
            full((HP, 2)), full((2, HP)), full((RHP, 1)), full((1, RHP)),
            col_idx, col_idx, col_idx, row_idx, row_idx, row_idx,
        ],
        out_specs=pl.BlockSpec((NP, HP), lambda p, e: (0, 0)),
        scratch_shapes=[
            pltpu.VMEM((NP, 2), f32),    # a_i/a_j per node (column layout)
            pltpu.VMEM((2, NP), f32),    # a_i/a_j per node (row layout)
            pltpu.VMEM((RP, 1), f32),    # a_r per relation (column layout)
            pltpu.VMEM((1, RP), f32),    # a_r per relation (row layout)
            pltpu.VMEM((2, NP), f32),    # row 0: segment max, row 1: segment sum-exp
        ],
        compiler_params=pltpu.CompilerParams(
            dimension_semantics=("arbitrary", "arbitrary"),
            vmem_limit_bytes=48 * 1024 * 1024,
        ),
    )(x_p, xT, r_p, rT, wij, wijT, wr_p, wrT,
      dst_c, src_c, rel_c, dst_r, src_r, rel_r)

    return out_p[:N, :H]


def gat_ref(x, r, edge_index, rel, wi, wj, wr):
    """Pure-JAX reference of the PyTorch forward semantics."""
    src, dst = edge_index[0], edge_index[1]
    N = x.shape[0]
    e_i = (x @ wi)[:, 0][dst]
    e_j = (x @ wj)[:, 0][src]
    e_r = (r @ wr)[:, 0][rel]
    e = e_i + e_j + e_r
    s = jnp.where(e > 0, e, 0.01 * e)
    seg_max = jax.ops.segment_max(s, dst, num_segments=N)
    exps = jnp.exp(s - seg_max[dst])
    seg_sum = jax.ops.segment_sum(exps, dst, num_segments=N)
    alpha = exps / (seg_sum[dst] + 1e-16)
    out = jax.ops.segment_sum(alpha[:, None] * x[src], dst, num_segments=N)
    return jnp.maximum(out, 0.0)


if __name__ == "__main__":
    N, H, RH, R, E = 32, 32, 16, 5, 300   # multiple edge tiles (TE=128 -> 3 tiles)

    key = jax.random.PRNGKey(0)
    kx, kr, kwi, kwj, kwr, ke1, ke2, krel = jax.random.split(key, 8)

    x = jax.random.normal(kx, (N, H), dtype=jnp.float32)
    r = jax.random.normal(kr, (R, RH), dtype=jnp.float32)

    # nn.Linear(hidden, 1, bias=False) -> weight [1, hidden]; stored transposed [hidden, 1].
    bound_h = 1.0 / (H ** 0.5)
    bound_r = 1.0 / (RH ** 0.5)
    wi = jax.random.uniform(kwi, (H, 1), minval=-bound_h, maxval=bound_h, dtype=jnp.float32)
    wj = jax.random.uniform(kwj, (H, 1), minval=-bound_h, maxval=bound_h, dtype=jnp.float32)
    wr = jax.random.uniform(kwr, (RH, 1), minval=-bound_r, maxval=bound_r, dtype=jnp.float32)

    edge_index = jnp.stack([
        jax.random.randint(ke1, (E,), 0, N, dtype=jnp.int32),   # j (source)
        jax.random.randint(ke2, (E,), 0, N, dtype=jnp.int32),   # i (destination)
    ], axis=0)
    rel = jax.random.randint(krel, (E,), 0, R, dtype=jnp.int32)

    out = gat_forward(x, r, edge_index, rel, wi, wj, wr)
    out = jax.block_until_ready(out)

    ref = gat_ref(x, r, edge_index, rel, wi, wj, wr)
    assert out.shape == (N, H)
    # Tolerance covers the EUP approximate reciprocal used for the softmax division.
    assert jnp.allclose(out, ref, rtol=2e-3, atol=2e-3), "mismatch vs pure-JAX reference"

    print("KERNEL_OK")
</pallas_src>

<mosaic_0001>
module attributes {stable_mosaic.version = 11 : i64} {
  func.func @gat_kernel(%arg0: i32, %arg1: i32, %arg2: memref<128x128xf32, #tpu.memory_space<vmem>>, %arg3: memref<128x128xf32, #tpu.memory_space<vmem>>, %arg4: memref<128x128xf32, #tpu.memory_space<vmem>>, %arg5: memref<128x128xf32, #tpu.memory_space<vmem>>, %arg6: memref<128x2xf32, #tpu.memory_space<vmem>>, %arg7: memref<2x128xf32, #tpu.memory_space<vmem>>, %arg8: memref<128x1xf32, #tpu.memory_space<vmem>>, %arg9: memref<1x128xf32, #tpu.memory_space<vmem>>, %arg10: memref<128x1xi32, #tpu.memory_space<vmem>>, %arg11: memref<128x1xi32, #tpu.memory_space<vmem>>, %arg12: memref<128x1xi32, #tpu.memory_space<vmem>>, %arg13: memref<1x128xi32, #tpu.memory_space<vmem>>, %arg14: memref<1x128xi32, #tpu.memory_space<vmem>>, %arg15: memref<1x128xi32, #tpu.memory_space<vmem>>, %arg16: memref<128x128xf32, #tpu.memory_space<vmem>>, %arg17: memref<128x2xf32, #tpu.memory_space<vmem>>, %arg18: memref<2x128xf32, #tpu.memory_space<vmem>>, %arg19: memref<128x1xf32, #tpu.memory_space<vmem>>, %arg20: memref<1x128xf32, #tpu.memory_space<vmem>>, %arg21: memref<2x128xf32, #tpu.memory_space<vmem>>) attributes {dimension_semantics = [#tpu.dimension_semantics<arbitrary>, #tpu.dimension_semantics<arbitrary>], iteration_bounds = array<i64: 3, 3>, scalar_prefetch = 0 : i64, scratch_operands = 5 : i64, tpu.core_type = #tpu.core_type<tc>, window_params = [{pipeline_mode = #tpu.pipeline_mode<synchronous>, transform_indices = @transform_0, window_bounds = array<i64: 128, 128>}, {pipeline_mode = #tpu.pipeline_mode<synchronous>, transform_indices = @transform_1, window_bounds = array<i64: 128, 128>}, {pipeline_mode = #tpu.pipeline_mode<synchronous>, transform_indices = @transform_2, window_bounds = array<i64: 128, 128>}, {pipeline_mode = #tpu.pipeline_mode<synchronous>, transform_indices = @transform_3, window_bounds = array<i64: 128, 128>}, {pipeline_mode = #tpu.pipeline_mode<synchronous>, transform_indices = @transform_4, window_bounds = array<i64: 128, 2>}, {pipeline_mode = #tpu.pipeline_mode<synchronous>, transform_indices = @transform_5, window_bounds = array<i64: 2, 128>}, {pipeline_mode = #tpu.pipeline_mode<synchronous>, transform_indices = @transform_6, window_bounds = array<i64: 128, 1>}, {pipeline_mode = #tpu.pipeline_mode<synchronous>, transform_indices = @transform_7, window_bounds = array<i64: 1, 128>}, {transform_indices = @transform_8, window_bounds = array<i64: 128, 1>}, {transform_indices = @transform_9, window_bounds = array<i64: 128, 1>}, {transform_indices = @transform_10, window_bounds = array<i64: 128, 1>}, {transform_indices = @transform_11, window_bounds = array<i64: 1, 128>}, {transform_indices = @transform_12, window_bounds = array<i64: 1, 128>}, {transform_indices = @transform_13, window_bounds = array<i64: 1, 128>}, {pipeline_mode = #tpu.pipeline_mode<synchronous>, transform_indices = @transform_14, window_bounds = array<i64: 128, 128>}]} {
    %c0_i32 = arith.constant 0 : i32
    %0 = arith.cmpi eq, %arg0, %c0_i32 : i32
    %c0_i32_0 = arith.constant 0 : i32
    %1 = arith.cmpi eq, %arg1, %c0_i32_0 : i32
    %2 = arith.andi %0, %1 : i1
    %3 = arith.extui %2 : i1 to i32
    %cst = arith.constant -1.000000e+30 : f32
    %c0_i32_1 = arith.constant 0 : i32
    %4 = arith.cmpi ne, %3, %c0_i32_1 : i32
    scf.if %4 {
      %c0 = arith.constant 0 : index
      %c0_10 = arith.constant 0 : index
      %19 = vector.load %arg2[%c0, %c0_10] : memref<128x128xf32, #tpu.memory_space<vmem>>, vector<128x128xf32>
      %c0_11 = arith.constant 0 : index
      %c0_12 = arith.constant 0 : index
      %20 = vector.load %arg6[%c0_11, %c0_12] : memref<128x2xf32, #tpu.memory_space<vmem>>, vector<128x2xf32>
      %cst_13 = arith.constant dense<0.000000e+00> : vector<128x2xf32>
      %21 = tpu.matmul %19, %20, %cst_13 {dimension_numbers = #tpu.dot_dimension_numbers<[1], [0], [0], [1], [0, 0, 1, 1], [], []>} : vector<128x128xf32>, vector<128x2xf32>, vector<128x2xf32> -> vector<128x2xf32>
      %c0_14 = arith.constant 0 : index
      %c0_15 = arith.constant 0 : index
      %22 = vector.load %arg17[%c0_14, %c0_15] : memref<128x2xf32, #tpu.memory_space<vmem>>, vector<128x2xf32>
      tpu.vector_store %arg17[%c0_14, %c0_15], %21 {strides = array<i32>} : memref<128x2xf32, #tpu.memory_space<vmem>>, vector<128x2xf32>,
      %c0_16 = arith.constant 0 : index
      %c0_17 = arith.constant 0 : index
      %23 = vector.load %arg7[%c0_16, %c0_17] : memref<2x128xf32, #tpu.memory_space<vmem>>, vector<2x128xf32>
      %c0_18 = arith.constant 0 : index
      %c0_19 = arith.constant 0 : index
      %24 = vector.load %arg3[%c0_18, %c0_19] : memref<128x128xf32, #tpu.memory_space<vmem>>, vector<128x128xf32>
      %cst_20 = arith.constant dense<0.000000e+00> : vector<2x128xf32>
      %25 = tpu.matmul %23, %24, %cst_20 {dimension_numbers = #tpu.dot_dimension_numbers<[1], [0], [0], [1], [0, 0, 1, 1], [], []>} : vector<2x128xf32>, vector<128x128xf32>, vector<2x128xf32> -> vector<2x128xf32>
      %c0_21 = arith.constant 0 : index
      %c0_22 = arith.constant 0 : index
      %26 = vector.load %arg18[%c0_21, %c0_22] : memref<2x128xf32, #tpu.memory_space<vmem>>, vector<2x128xf32>
      tpu.vector_store %arg18[%c0_21, %c0_22], %25 {strides = array<i32>} : memref<2x128xf32, #tpu.memory_space<vmem>>, vector<2x128xf32>,
      %c0_23 = arith.constant 0 : index
      %c0_24 = arith.constant 0 : index
      %27 = vector.load %arg4[%c0_23, %c0_24] : memref<128x128xf32, #tpu.memory_space<vmem>>, vector<128x128xf32>
      %c0_25 = arith.constant 0 : index
      %c0_26 = arith.constant 0 : index
      %28 = vector.load %arg8[%c0_25, %c0_26] : memref<128x1xf32, #tpu.memory_space<vmem>>, vector<128x1xf32>
      %cst_27 = arith.constant dense<0.000000e+00> : vector<128x1xf32>
      %29 = tpu.matmul %27, %28, %cst_27 {dimension_numbers = #tpu.dot_dimension_numbers<[1], [0], [0], [1], [0, 0, 1, 1], [], []>} : vector<128x128xf32>, vector<128x1xf32>, vector<128x1xf32> -> vector<128x1xf32>
      %c0_28 = arith.constant 0 : index
      %c0_29 = arith.constant 0 : index
      %30 = vector.load %arg19[%c0_28, %c0_29] : memref<128x1xf32, #tpu.memory_space<vmem>>, vector<128x1xf32>
      tpu.vector_store %arg19[%c0_28, %c0_29], %29 {strides = array<i32>} : memref<128x1xf32, #tpu.memory_space<vmem>>, vector<128x1xf32>,
      %c0_30 = arith.constant 0 : index
      %c0_31 = arith.constant 0 : index
      %31 = vector.load %arg9[%c0_30, %c0_31] : memref<1x128xf32, #tpu.memory_space<vmem>>, vector<1x128xf32>
      %c0_32 = arith.constant 0 : index
      %c0_33 = arith.constant 0 : index
      %32 = vector.load %arg5[%c0_32, %c0_33] : memref<128x128xf32, #tpu.memory_space<vmem>>, vector<128x128xf32>
      %cst_34 = arith.constant dense<0.000000e+00> : vector<1x128xf32>
      %33 = tpu.matmul %31, %32, %cst_34 {dimension_numbers = #tpu.dot_dimension_numbers<[1], [0], [0], [1], [0, 0, 1, 1], [], []>} : vector<1x128xf32>, vector<128x128xf32>, vector<1x128xf32> -> vector<1x128xf32>
      %c0_35 = arith.constant 0 : index
      %c0_36 = arith.constant 0 : index
      %34 = vector.load %arg20[%c0_35, %c0_36] : memref<1x128xf32, #tpu.memory_space<vmem>>, vector<1x128xf32>
      tpu.vector_store %arg20[%c0_35, %c0_36], %33 {strides = array<i32>} : memref<1x128xf32, #tpu.memory_space<vmem>>, vector<1x128xf32>,
      %35 = vector.broadcast %cst : f32 to vector<1x128xf32>
      %c0_37 = arith.constant 0 : index
      %c0_38 = arith.constant 0 : index
      %36 = vector.load %arg21[%c0_37, %c0_38] : memref<2x128xf32, #tpu.memory_space<vmem>>, vector<1x128xf32>
      tpu.vector_store %arg21[%c0_37, %c0_38], %35 {strides = array<i32>} : memref<2x128xf32, #tpu.memory_space<vmem>>, vector<1x128xf32>,
      %cst_39 = arith.constant 0.000000e+00 : f32
      %37 = vector.broadcast %cst_39 : f32 to vector<1x128xf32>
      %c1 = arith.constant 1 : index
      %c0_40 = arith.constant 0 : index
      %38 = vector.load %arg21[%c1, %c0_40] : memref<2x128xf32, #tpu.memory_space<vmem>>, vector<1x128xf32>
      tpu.vector_store %arg21[%c1, %c0_40], %37 {strides = array<i32>} : memref<2x128xf32, #tpu.memory_space<vmem>>, vector<1x128xf32>,
      %cst_41 = arith.constant 0.000000e+00 : f32
      %39 = vector.broadcast %cst_41 : f32 to vector<128x128xf32>
      %c0_42 = arith.constant 0 : index
      %c0_43 = arith.constant 0 : index
      %40 = vector.load %arg16[%c0_42, %c0_43] : memref<128x128xf32, #tpu.memory_space<vmem>>, vector<128x128xf32>
      tpu.vector_store %arg16[%c0_42, %c0_43], %39 {strides = array<i32>} : memref<128x128xf32, #tpu.memory_space<vmem>>, vector<128x128xf32>,
    } else {
    }
    %c0_i32_2 = arith.constant 0 : i32
    %5 = arith.cmpi eq, %arg0, %c0_i32_2 : i32
    %6 = arith.extui %5 : i1 to i32
    %cst_3 = arith.constant -1.000000e+30 : f32
    %c0_i32_4 = arith.constant 0 : i32
    %7 = arith.cmpi ne, %6, %c0_i32_4 : i32
    scf.if %7 {
      %19 = tpu.iota {dimensions = array<i32: 1>} : vector<128x128xi32>
      %20 = tpu.iota {dimensions = array<i32: 1>} : vector<128x128xi32>
      %c0 = arith.constant 0 : index
      %c0_10 = arith.constant 0 : index
      %21 = vector.load %arg10[%c0, %c0_10] : memref<128x1xi32, #tpu.memory_space<vmem>>, vector<128x1xi32>
      %22 = vector.broadcast %21 : vector<128x1xi32> to vector<128x128xi32>
      %23 = arith.cmpi eq, %22, %19 : vector<128x128xi32>
      %24 = arith.extui %23 : vector<128x128xi1> to vector<128x128xi32>
      %25 = arith.sitofp %24 : vector<128x128xi32> to vector<128x128xf32>
      %c0_11 = arith.constant 0 : index
      %c0_12 = arith.constant 0 : index
      %26 = vector.load %arg11[%c0_11, %c0_12] : memref<128x1xi32, #tpu.memory_space<vmem>>, vector<128x1xi32>
      %27 = vector.broadcast %26 : vector<128x1xi32> to vector<128x128xi32>
      %28 = arith.cmpi eq, %27, %19 : vector<128x128xi32>
      %29 = arith.extui %28 : vector<128x128xi1> to vector<128x128xi32>
      %30 = arith.sitofp %29 : vector<128x128xi32> to vector<128x128xf32>
      %c0_13 = arith.constant 0 : index
      %c0_14 = arith.constant 0 : index
      %31 = vector.load %arg12[%c0_13, %c0_14] : memref<128x1xi32, #tpu.memory_space<vmem>>, vector<128x1xi32>
      %32 = vector.broadcast %31 : vector<128x1xi32> to vector<128x128xi32>
      %33 = arith.cmpi eq, %32, %20 : vector<128x128xi32>
      %34 = arith.extui %33 : vector<128x128xi1> to vector<128x128xi32>
      %35 = arith.sitofp %34 : vector<128x128xi32> to vector<128x128xf32>
      %c0_15 = arith.constant 0 : index
      %c0_16 = arith.constant 0 : index
      %36 = vector.load %arg17[%c0_15, %c0_16] : memref<128x2xf32, #tpu.memory_space<vmem>>, vector<128x1xf32>
      %cst_17 = arith.constant dense<0.000000e+00> : vector<128x1xf32>
      %37 = tpu.matmul %25, %36, %cst_17 {dimension_numbers = #tpu.dot_dimension_numbers<[1], [0], [0], [1], [0, 0, 1, 1], [], []>} : vector<128x128xf32>, vector<128x1xf32>, vector<128x1xf32> -> vector<128x1xf32>
      %c0_18 = arith.constant 0 : index
      %c1 = arith.constant 1 : index
      %38 = vector.load %arg17[%c0_18, %c1] : memref<128x2xf32, #tpu.memory_space<vmem>>, vector<128x1xf32>
      %cst_19 = arith.constant dense<0.000000e+00> : vector<128x1xf32>
      %39 = tpu.matmul %30, %38, %cst_19 {dimension_numbers = #tpu.dot_dimension_numbers<[1], [0], [0], [1], [0, 0, 1, 1], [], []>} : vector<128x128xf32>, vector<128x1xf32>, vector<128x1xf32> -> vector<128x1xf32>
      %40 = arith.addf %37, %39 : vector<128x1xf32>
      %c0_20 = arith.constant 0 : index
      %c0_21 = arith.constant 0 : index
      %41 = vector.load %arg19[%c0_20, %c0_21] : memref<128x1xf32, #tpu.memory_space<vmem>>, vector<128x1xf32>
      %cst_22 = arith.constant dense<0.000000e+00> : vector<128x1xf32>
      %42 = tpu.matmul %35, %41, %cst_22 {dimension_numbers = #tpu.dot_dimension_numbers<[1], [0], [0], [1], [0, 0, 1, 1], [], []>} : vector<128x128xf32>, vector<128x1xf32>, vector<128x1xf32> -> vector<128x1xf32>
      %43 = arith.addf %40, %42 : vector<128x1xf32>
      %cst_23 = arith.constant 0.000000e+00 : f32
      %44 = vector.broadcast %cst_23 : f32 to vector<128x1xf32>
      %45 = arith.cmpf ogt, %43, %44 : vector<128x1xf32>
      %cst_24 = arith.constant 0.00999999977 : f32
      %46 = vector.broadcast %cst_24 : f32 to vector<128x1xf32>
      %47 = arith.mulf %46, %43 : vector<128x1xf32>
      %48 = arith.select %45, %43, %47 : vector<128x1xi1>, vector<128x1xf32>
      %49 = vector.shape_cast %48 : vector<128x1xf32> to vector<128x1xf32>
      %50 = vector.broadcast %49 : vector<128x1xf32> to vector<128x128xf32>
      %51 = vector.broadcast %cst_3 : f32 to vector<128x128xf32>
      %52 = arith.select %23, %50, %51 : vector<128x128xi1>, vector<128x128xf32>
      %cst_25 = arith.constant dense<0xFF800000> : vector<128xf32>
      %53 = vector.multi_reduction <maximumf>, %52, %cst_25 [0] : vector<128x128xf32> to vector<128xf32>
      %54 = vector.shape_cast %53 : vector<128xf32> to vector<1x128xf32>
      %c0_26 = arith.constant 0 : index
      %c0_27 = arith.constant 0 : index
      %55 = vector.load %arg21[%c0_26, %c0_27] : memref<2x128xf32, #tpu.memory_space<vmem>>, vector<1x128xf32>
      %56 = arith.maximumf %55, %54 : vector<1x128xf32>
      %c0_28 = arith.constant 0 : index
      %c0_29 = arith.constant 0 : index
      %57 = vector.load %arg21[%c0_28, %c0_29] : memref<2x128xf32, #tpu.memory_space<vmem>>, vector<1x128xf32>
      tpu.vector_store %arg21[%c0_28, %c0_29], %56 {strides = array<i32>} : memref<2x128xf32, #tpu.memory_space<vmem>>, vector<1x128xf32>,
    } else {
    }
    %c1_i32 = arith.constant 1 : i32
    %8 = arith.cmpi eq, %arg0, %c1_i32 : i32
    %9 = arith.extui %8 : i1 to i32
    %c0_i32_5 = arith.constant 0 : i32
    %10 = arith.cmpi ne, %9, %c0_i32_5 : i32
    scf.if %10 {
      %19 = tpu.iota {dimensions = array<i32: 0>} : vector<128x128xi32>
      %20 = tpu.iota {dimensions = array<i32: 0>} : vector<128x128xi32>
      %c0 = arith.constant 0 : index
      %c0_10 = arith.constant 0 : index
      %21 = vector.load %arg13[%c0, %c0_10] : memref<1x128xi32, #tpu.memory_space<vmem>>, vector<1x128xi32>
      %22 = vector.broadcast %21 : vector<1x128xi32> to vector<128x128xi32>
      %23 = arith.cmpi eq, %19, %22 : vector<128x128xi32>
      %24 = arith.extui %23 : vector<128x128xi1> to vector<128x128xi32>
      %25 = arith.sitofp %24 : vector<128x128xi32> to vector<128x128xf32>
      %c0_11 = arith.constant 0 : index
      %c0_12 = arith.constant 0 : index
      %26 = vector.load %arg14[%c0_11, %c0_12] : memref<1x128xi32, #tpu.memory_space<vmem>>, vector<1x128xi32>
      %27 = vector.broadcast %26 : vector<1x128xi32> to vector<128x128xi32>
      %28 = arith.cmpi eq, %19, %27 : vector<128x128xi32>
      %29 = arith.extui %28 : vector<128x128xi1> to vector<128x128xi32>
      %30 = arith.sitofp %29 : vector<128x128xi32> to vector<128x128xf32>
      %c0_13 = arith.constant 0 : index
      %c0_14 = arith.constant 0 : index
      %31 = vector.load %arg15[%c0_13, %c0_14] : memref<1x128xi32, #tpu.memory_space<vmem>>, vector<1x128xi32>
      %32 = vector.broadcast %31 : vector<1x128xi32> to vector<128x128xi32>
      %33 = arith.cmpi eq, %20, %32 : vector<128x128xi32>
      %34 = arith.extui %33 : vector<128x128xi1> to vector<128x128xi32>
      %35 = arith.sitofp %34 : vector<128x128xi32> to vector<128x128xf32>
      %c0_15 = arith.constant 0 : index
      %c0_16 = arith.constant 0 : index
      %36 = vector.load %arg18[%c0_15, %c0_16] : memref<2x128xf32, #tpu.memory_space<vmem>>, vector<1x128xf32>
      %cst_17 = arith.constant dense<0.000000e+00> : vector<1x128xf32>
      %37 = tpu.matmul %36, %25, %cst_17 {dimension_numbers = #tpu.dot_dimension_numbers<[1], [0], [0], [1], [0, 0, 1, 1], [], []>} : vector<1x128xf32>, vector<128x128xf32>, vector<1x128xf32> -> vector<1x128xf32>
      %c1 = arith.constant 1 : index
      %c0_18 = arith.constant 0 : index
      %38 = vector.load %arg18[%c1, %c0_18] : memref<2x128xf32, #tpu.memory_space<vmem>>, vector<1x128xf32>
      %cst_19 = arith.constant dense<0.000000e+00> : vector<1x128xf32>
      %39 = tpu.matmul %38, %30, %cst_19 {dimension_numbers = #tpu.dot_dimension_numbers<[1], [0], [0], [1], [0, 0, 1, 1], [], []>} : vector<1x128xf32>, vector<128x128xf32>, vector<1x128xf32> -> vector<1x128xf32>
      %40 = arith.addf %37, %39 : vector<1x128xf32>
      %c0_20 = arith.constant 0 : index
      %c0_21 = arith.constant 0 : index
      %41 = vector.load %arg20[%c0_20, %c0_21] : memref<1x128xf32, #tpu.memory_space<vmem>>, vector<1x128xf32>
      %cst_22 = arith.constant dense<0.000000e+00> : vector<1x128xf32>
      %42 = tpu.matmul %41, %35, %cst_22 {dimension_numbers = #tpu.dot_dimension_numbers<[1], [0], [0], [1], [0, 0, 1, 1], [], []>} : vector<1x128xf32>, vector<128x128xf32>, vector<1x128xf32> -> vector<1x128xf32>
      %43 = arith.addf %40, %42 : vector<1x128xf32>
      %cst_23 = arith.constant 0.000000e+00 : f32
      %44 = vector.broadcast %cst_23 : f32 to vector<1x128xf32>
      %45 = arith.cmpf ogt, %43, %44 : vector<1x128xf32>
      %cst_24 = arith.constant 0.00999999977 : f32
      %46 = vector.broadcast %cst_24 : f32 to vector<1x128xf32>
      %47 = arith.mulf %46, %43 : vector<1x128xf32>
      %48 = arith.select %45, %43, %47 : vector<1x128xi1>, vector<1x128xf32>
      %c0_25 = arith.constant 0 : index
      %c0_26 = arith.constant 0 : index
      %49 = vector.load %arg21[%c0_25, %c0_26] : memref<2x128xf32, #tpu.memory_space<vmem>>, vector<1x128xf32>
      %cst_27 = arith.constant dense<0.000000e+00> : vector<1x128xf32>
      %50 = tpu.matmul %49, %25, %cst_27 {dimension_numbers = #tpu.dot_dimension_numbers<[1], [0], [0], [1], [0, 0, 1, 1], [], []>} : vector<1x128xf32>, vector<128x128xf32>, vector<1x128xf32> -> vector<1x128xf32>
      %51 = arith.subf %48, %50 : vector<1x128xf32>
      %52 = math.exp %51 : vector<1x128xf32>
      %53 = tpu.iota {dimensions = array<i32: 1>} : vector<128x128xi32>
      %c0_28 = arith.constant 0 : index
      %c0_29 = arith.constant 0 : index
      %54 = vector.load %arg10[%c0_28, %c0_29] : memref<128x1xi32, #tpu.memory_space<vmem>>, vector<128x1xi32>
      %55 = vector.broadcast %54 : vector<128x1xi32> to vector<128x128xi32>
      %56 = arith.cmpi eq, %55, %53 : vector<128x128xi32>
      %57 = arith.extui %56 : vector<128x128xi1> to vector<128x128xi32>
      %58 = arith.sitofp %57 : vector<128x128xi32> to vector<128x128xf32>
      %c1_30 = arith.constant 1 : index
      %c0_31 = arith.constant 0 : index
      %59 = vector.load %arg21[%c1_30, %c0_31] : memref<2x128xf32, #tpu.memory_space<vmem>>, vector<1x128xf32>
      %cst_32 = arith.constant dense<0.000000e+00> : vector<1x128xf32>
      %60 = tpu.matmul %52, %58, %cst_32 {dimension_numbers = #tpu.dot_dimension_numbers<[1], [0], [0], [1], [0, 0, 1, 1], [], []>} : vector<1x128xf32>, vector<128x128xf32>, vector<1x128xf32> -> vector<1x128xf32>
      %61 = arith.addf %59, %60 : vector<1x128xf32>
      %c1_33 = arith.constant 1 : index
      %c0_34 = arith.constant 0 : index
      %62 = vector.load %arg21[%c1_33, %c0_34] : memref<2x128xf32, #tpu.memory_space<vmem>>, vector<1x128xf32>
      tpu.vector_store %arg21[%c1_33, %c0_34], %61 {strides = array<i32>} : memref<2x128xf32, #tpu.memory_space<vmem>>, vector<1x128xf32>,
    } else {
    }
    %c2_i32 = arith.constant 2 : i32
    %11 = arith.cmpi eq, %arg0, %c2_i32 : i32
    %12 = arith.extui %11 : i1 to i32
    %c0_i32_6 = arith.constant 0 : i32
    %13 = arith.cmpi ne, %12, %c0_i32_6 : i32
    scf.if %13 {
      %19 = tpu.iota {dimensions = array<i32: 0>} : vector<128x128xi32>
      %20 = tpu.iota {dimensions = array<i32: 0>} : vector<128x128xi32>
      %c0 = arith.constant 0 : index
      %c0_10 = arith.constant 0 : index
      %21 = vector.load %arg13[%c0, %c0_10] : memref<1x128xi32, #tpu.memory_space<vmem>>, vector<1x128xi32>
      %22 = vector.broadcast %21 : vector<1x128xi32> to vector<128x128xi32>
      %23 = arith.cmpi eq, %19, %22 : vector<128x128xi32>
      %24 = arith.extui %23 : vector<128x128xi1> to vector<128x128xi32>
      %25 = arith.sitofp %24 : vector<128x128xi32> to vector<128x128xf32>
      %c0_11 = arith.constant 0 : index
      %c0_12 = arith.constant 0 : index
      %26 = vector.load %arg14[%c0_11, %c0_12] : memref<1x128xi32, #tpu.memory_space<vmem>>, vector<1x128xi32>
      %27 = vector.broadcast %26 : vector<1x128xi32> to vector<128x128xi32>
      %28 = arith.cmpi eq, %19, %27 : vector<128x128xi32>
      %29 = arith.extui %28 : vector<128x128xi1> to vector<128x128xi32>
      %30 = arith.sitofp %29 : vector<128x128xi32> to vector<128x128xf32>
      %c0_13 = arith.constant 0 : index
      %c0_14 = arith.constant 0 : index
      %31 = vector.load %arg15[%c0_13, %c0_14] : memref<1x128xi32, #tpu.memory_space<vmem>>, vector<1x128xi32>
      %32 = vector.broadcast %31 : vector<1x128xi32> to vector<128x128xi32>
      %33 = arith.cmpi eq, %20, %32 : vector<128x128xi32>
      %34 = arith.extui %33 : vector<128x128xi1> to vector<128x128xi32>
      %35 = arith.sitofp %34 : vector<128x128xi32> to vector<128x128xf32>
      %c0_15 = arith.constant 0 : index
      %c0_16 = arith.constant 0 : index
      %36 = vector.load %arg18[%c0_15, %c0_16] : memref<2x128xf32, #tpu.memory_space<vmem>>, vector<1x128xf32>
      %cst_17 = arith.constant dense<0.000000e+00> : vector<1x128xf32>
      %37 = tpu.matmul %36, %25, %cst_17 {dimension_numbers = #tpu.dot_dimension_numbers<[1], [0], [0], [1], [0, 0, 1, 1], [], []>} : vector<1x128xf32>, vector<128x128xf32>, vector<1x128xf32> -> vector<1x128xf32>
      %c1 = arith.constant 1 : index
      %c0_18 = arith.constant 0 : index
      %38 = vector.load %arg18[%c1, %c0_18] : memref<2x128xf32, #tpu.memory_space<vmem>>, vector<1x128xf32>
      %cst_19 = arith.constant dense<0.000000e+00> : vector<1x128xf32>
      %39 = tpu.matmul %38, %30, %cst_19 {dimension_numbers = #tpu.dot_dimension_numbers<[1], [0], [0], [1], [0, 0, 1, 1], [], []>} : vector<1x128xf32>, vector<128x128xf32>, vector<1x128xf32> -> vector<1x128xf32>
      %40 = arith.addf %37, %39 : vector<1x128xf32>
      %c0_20 = arith.constant 0 : index
      %c0_21 = arith.constant 0 : index
      %41 = vector.load %arg20[%c0_20, %c0_21] : memref<1x128xf32, #tpu.memory_space<vmem>>, vector<1x128xf32>
      %cst_22 = arith.constant dense<0.000000e+00> : vector<1x128xf32>
      %42 = tpu.matmul %41, %35, %cst_22 {dimension_numbers = #tpu.dot_dimension_numbers<[1], [0], [0], [1], [0, 0, 1, 1], [], []>} : vector<1x128xf32>, vector<128x128xf32>, vector<1x128xf32> -> vector<1x128xf32>
      %43 = arith.addf %40, %42 : vector<1x128xf32>
      %cst_23 = arith.constant 0.000000e+00 : f32
      %44 = vector.broadcast %cst_23 : f32 to vector<1x128xf32>
      %45 = arith.cmpf ogt, %43, %44 : vector<1x128xf32>
      %cst_24 = arith.constant 0.00999999977 : f32
      %46 = vector.broadcast %cst_24 : f32 to vector<1x128xf32>
      %47 = arith.mulf %46, %43 : vector<1x128xf32>
      %48 = arith.select %45, %43, %47 : vector<1x128xi1>, vector<1x128xf32>
      %c0_25 = arith.constant 0 : index
      %c0_26 = arith.constant 0 : index
      %49 = vector.load %arg21[%c0_25, %c0_26] : memref<2x128xf32, #tpu.memory_space<vmem>>, vector<2x128xf32>
      %cst_27 = arith.constant dense<0.000000e+00> : vector<2x128xf32>
      %50 = tpu.matmul %49, %25, %cst_27 {dimension_numbers = #tpu.dot_dimension_numbers<[1], [0], [0], [1], [0, 0, 1, 1], [], []>} : vector<2x128xf32>, vector<128x128xf32>, vector<2x128xf32> -> vector<2x128xf32>
      %51 = vector.extract_strided_slice %50 {offsets = [0, 0], sizes = [1, 128], strides = [1, 1]} : vector<2x128xf32> to vector<1x128xf32>
      %52 = vector.extract_strided_slice %50 {offsets = [1, 0], sizes = [1, 128], strides = [1, 1]} : vector<2x128xf32> to vector<1x128xf32>
      %53 = arith.subf %48, %51 : vector<1x128xf32>
      %54 = math.exp %53 : vector<1x128xf32>
      %cst_28 = arith.constant 1.000000e-16 : f32
      %55 = vector.broadcast %cst_28 : f32 to vector<1x128xf32>
      %56 = arith.addf %52, %55 : vector<1x128xf32>
      %57 = tpu.reciprocal %56 {approx = true} : vector<1x128xf32> -> vector<1x128xf32>
      %58 = arith.mulf %54, %57 : vector<1x128xf32>
      %59 = tpu.iota {dimensions = array<i32: 1>} : vector<128x128xi32>
      %c0_29 = arith.constant 0 : index
      %c0_30 = arith.constant 0 : index
      %60 = vector.load %arg11[%c0_29, %c0_30] : memref<128x1xi32, #tpu.memory_space<vmem>>, vector<128x1xi32>
      %61 = vector.broadcast %60 : vector<128x1xi32> to vector<128x128xi32>
      %62 = arith.cmpi eq, %61, %59 : vector<128x128xi32>
      %63 = arith.extui %62 : vector<128x128xi1> to vector<128x128xi32>
      %64 = arith.sitofp %63 : vector<128x128xi32> to vector<128x128xf32>
      %c0_31 = arith.constant 0 : index
      %c0_32 = arith.constant 0 : index
      %65 = vector.load %arg2[%c0_31, %c0_32] : memref<128x128xf32, #tpu.memory_space<vmem>>, vector<128x128xf32>
      %cst_33 = arith.constant dense<0.000000e+00> : vector<128x128xf32>
      %66 = tpu.matmul %64, %65, %cst_33 {dimension_numbers = #tpu.dot_dimension_numbers<[1], [0], [0], [1], [0, 0, 1, 1], [], []>} : vector<128x128xf32>, vector<128x128xf32>, vector<128x128xf32> -> vector<128x128xf32>
      %c0_34 = arith.constant 0 : index
      %c0_35 = arith.constant 0 : index
      %67 = vector.load %arg16[%c0_34, %c0_35] : memref<128x128xf32, #tpu.memory_space<vmem>>, vector<128x128xf32>
      %68 = vector.broadcast %58 : vector<1x128xf32> to vector<128x128xf32>
      %69 = arith.mulf %25, %68 : vector<128x128xf32>
      %cst_36 = arith.constant dense<0.000000e+00> : vector<128x128xf32>
      %70 = tpu.matmul %69, %66, %cst_36 {dimension_numbers = #tpu.dot_dimension_numbers<[1], [0], [0], [1], [0, 0, 1, 1], [], []>} : vector<128x128xf32>, vector<128x128xf32>, vector<128x128xf32> -> vector<128x128xf32>
      %71 = arith.addf %67, %70 : vector<128x128xf32>
      %c0_37 = arith.constant 0 : index
      %c0_38 = arith.constant 0 : index
      %72 = vector.load %arg16[%c0_37, %c0_38] : memref<128x128xf32, #tpu.memory_space<vmem>>, vector<128x128xf32>
      tpu.vector_store %arg16[%c0_37, %c0_38], %71 {strides = array<i32>} : memref<128x128xf32, #tpu.memory_space<vmem>>, vector<128x128xf32>,
    } else {
    }
    %c2_i32_7 = arith.constant 2 : i32
    %14 = arith.cmpi eq, %arg0, %c2_i32_7 : i32
    %c2_i32_8 = arith.constant 2 : i32
    %15 = arith.cmpi eq, %arg1, %c2_i32_8 : i32
    %16 = arith.andi %14, %15 : i1
    %17 = arith.extui %16 : i1 to i32
    %c0_i32_9 = arith.constant 0 : i32
    %18 = arith.cmpi ne, %17, %c0_i32_9 : i32
    scf.if %18 {
      %c0 = arith.constant 0 : index
      %c0_10 = arith.constant 0 : index
      %19 = vector.load %arg16[%c0, %c0_10] : memref<128x128xf32, #tpu.memory_space<vmem>>, vector<128x128xf32>
      %cst_11 = arith.constant 0.000000e+00 : f32
      %20 = vector.broadcast %cst_11 : f32 to vector<128x128xf32>
      %21 = arith.maximumf %19, %20 : vector<128x128xf32>
      %c0_12 = arith.constant 0 : index
      %c0_13 = arith.constant 0 : index
      %22 = vector.load %arg16[%c0_12, %c0_13] : memref<128x128xf32, #tpu.memory_space<vmem>>, vector<128x128xf32>
      tpu.vector_store %arg16[%c0_12, %c0_13], %21 {strides = array<i32>} : memref<128x128xf32, #tpu.memory_space<vmem>>, vector<128x128xf32>,
    } else {
    }
    return
  }
  func.func @transform_0(%arg0: i32, %arg1: i32) -> (i32, i32) {
    %c0_i32 = arith.constant 0 : i32
    %c0_i32_0 = arith.constant 0 : i32
    %c0_i32_1 = arith.constant 0 : i32
    return %c0_i32, %c0_i32_0 : i32, i32
  }
  func.func @transform_1(%arg0: i32, %arg1: i32) -> (i32, i32) {
    %c0_i32 = arith.constant 0 : i32
    %c0_i32_0 = arith.constant 0 : i32
    %c0_i32_1 = arith.constant 0 : i32
    return %c0_i32, %c0_i32_0 : i32, i32
  }
  func.func @transform_2(%arg0: i32, %arg1: i32) -> (i32, i32) {
    %c0_i32 = arith.constant 0 : i32
    %c0_i32_0 = arith.constant 0 : i32
    %c0_i32_1 = arith.constant 0 : i32
    return %c0_i32, %c0_i32_0 : i32, i32
  }
  func.func @transform_3(%arg0: i32, %arg1: i32) -> (i32, i32) {
    %c0_i32 = arith.constant 0 : i32
    %c0_i32_0 = arith.constant 0 : i32
    %c0_i32_1 = arith.constant 0 : i32
    return %c0_i32, %c0_i32_0 : i32, i32
  }
  func.func @transform_4(%arg0: i32, %arg1: i32) -> (i32, i32) {
    %c0_i32 = arith.constant 0 : i32
    %c0_i32_0 = arith.constant 0 : i32
    %c0_i32_1 = arith.constant 0 : i32
    return %c0_i32, %c0_i32_0 : i32, i32
  }
  func.func @transform_5(%arg0: i32, %arg1: i32) -> (i32, i32) {
    %c0_i32 = arith.constant 0 : i32
    %c0_i32_0 = arith.constant 0 : i32
    %c0_i32_1 = arith.constant 0 : i32
    return %c0_i32, %c0_i32_0 : i32, i32
  }
  func.func @transform_6(%arg0: i32, %arg1: i32) -> (i32, i32) {
    %c0_i32 = arith.constant 0 : i32
    %c0_i32_0 = arith.constant 0 : i32
    %c0_i32_1 = arith.constant 0 : i32
    return %c0_i32, %c0_i32_0 : i32, i32
  }
  func.func @transform_7(%arg0: i32, %arg1: i32) -> (i32, i32) {
    %c0_i32 = arith.constant 0 : i32
    %c0_i32_0 = arith.constant 0 : i32
    %c0_i32_1 = arith.constant 0 : i32
    return %c0_i32, %c0_i32_0 : i32, i32
  }
  func.func @transform_8(%arg0: i32, %arg1: i32) -> (i32, i32) {
    %c0_i32 = arith.constant 0 : i32
    %c0_i32_0 = arith.constant 0 : i32
    return %arg1, %c0_i32 : i32, i32
  }
  func.func @transform_9(%arg0: i32, %arg1: i32) -> (i32, i32) {
    %c0_i32 = arith.constant 0 : i32
    %c0_i32_0 = arith.constant 0 : i32
    return %arg1, %c0_i32 : i32, i32
  }
  func.func @transform_10(%arg0: i32, %arg1: i32) -> (i32, i32) {
    %c0_i32 = arith.constant 0 : i32
    %c0_i32_0 = arith.constant 0 : i32
    return %arg1, %c0_i32 : i32, i32
  }
  func.func @transform_11(%arg0: i32, %arg1: i32) -> (i32, i32) {
    %c0_i32 = arith.constant 0 : i32
    %c0_i32_0 = arith.constant 0 : i32
    return %c0_i32, %arg1 : i32, i32
  }
  func.func @transform_12(%arg0: i32, %arg1: i32) -> (i32, i32) {
    %c0_i32 = arith.constant 0 : i32
    %c0_i32_0 = arith.constant 0 : i32
    return %c0_i32, %arg1 : i32, i32
  }
  func.func @transform_13(%arg0: i32, %arg1: i32) -> (i32, i32) {
    %c0_i32 = arith.constant 0 : i32
    %c0_i32_0 = arith.constant 0 : i32
    return %c0_i32, %arg1 : i32, i32
  }
  func.func @transform_14(%arg0: i32, %arg1: i32) -> (i32, i32) {
    %c0_i32 = arith.constant 0 : i32
    %c0_i32_0 = arith.constant 0 : i32
    %c0_i32_1 = arith.constant 0 : i32
    return %c0_i32, %c0_i32_0 : i32, i32
  }
}

</mosaic_0001>

<bundles_post_ra>
// kernel: tpu_custom_call.1
= control target key start
LH: loop header
LB: loop body
LE: loop exit
PB: predicated region body
PF: predicated region fallthrough
CT: control target
= control target key end

     0   :  { %s7707_s0 = inlined_call_operand.vmem [shape: f32[128,128], index: 0, kind: input, shape index: {}]   ;;  %s7708_s1 = inlined_call_operand.vmem [shape: f32[128,128], index: 1, kind: input, shape index: {}]   ;;  %s7709_s2 = inlined_call_operand.vmem [shape: f32[128,128], index: 2, kind: input, shape index: {}]   ;;  %s7710_s3 = inlined_call_operand.vmem [shape: f32[128,128], index: 3, kind: input, shape index: {}]   ;;  %s7711_s4 = inlined_call_operand.vmem [shape: f32[128,2], index: 4, kind: input, shape index: {}]   ;;  %s7712_s5 = inlined_call_operand.vmem [shape: f32[2,128], index: 5, kind: input, shape index: {}]   ;;  %s7713_s6 = inlined_call_operand.vmem [shape: f32[128,1], index: 6, kind: input, shape index: {}]   ;;  %s7714_s7 = inlined_call_operand.vmem [shape: f32[1,128], index: 7, kind: input, shape index: {}]   ;;  %s7715_s8 = inlined_call_operand.vmem [shape: s32[384,1], index: 8, kind: input, shape index: {}]   ;;  %s7716_s9 = inlined_call_operand.vmem [shape: s32[384,1], index: 9, kind: input, shape index: {}]   ;;  %s7717_s10 = inlined_call_operand.vmem [shape: s32[384,1], index: 10, kind: input, shape index: {}]   ;;  %s7718_s11 = inlined_call_operand.vmem [shape: s32[1,384], index: 11, kind: input, shape index: {}]   ;;  %s7719_s12 = inlined_call_operand.vmem [shape: s32[1,384], index: 12, kind: input, shape index: {}]   ;;  %s7720_s13 = inlined_call_operand.vmem [shape: s32[1,384], index: 13, kind: input, shape index: {}]   ;;  %s7721_s14 = inlined_call_operand.hbm [shape: f32[128,128], index: 14, kind: output, shape index: {}]  }
   0x1   :  { %7747 = sst [smem:[#allocation16_spill]] %s7718_s11 }
   0x2   :  { %7748 = sst [smem:[#allocation17_spill]] %s7721_s14 }
   0x3   :  { %19 = vsyncpa [#allocation8], 0  ;;  %s5847_s29 = smov 0   ;;  %s5849_s30 = smov 0  }
   0x4   :  { %s5851_s15 = smov 0   ;;  %s5853_s16 = smov 0  }
   0x5   :  { %s5855_s17 = smov 0  }
   0x6 LB: > { %7749 = sst [smem:[#allocation10_spill]] %s5741_s30  ;;  %s34_s19 = sadd.s32 1, %s5745_s15  ;;  %s5753_s17 = sphi %s5855_s17, %s25_s17   ;;  %s5749_s16 = sphi %s5853_s16, %s7789_s16   ;;  %s5745_s15 = sphi %s5851_s15, %s7788_s15   ;;  %s5741_s30 = sphi %s5849_s30, %s7787_s30   ;;  %s5737_s29 = sphi %s5847_s29, %s7786_s29  }
   0x7   : > { %7750 = sst [smem:[#allocation11_spill]] %s5745_s15  ;;  %p35_p0 = scmp.ge.s32.totalorder %s34_s19, 3 }
   0x8   : > { %7751 = sst [smem:[#allocation12_spill]] %s5749_s16  ;;  %s37_s20 = sadd.s32 1, %s5749_s16 }
   0x9   : > { %7752 = sst [smem:[#allocation13_spill]] %s5753_s17  ;;  %p3988_p1 = scmp.ge.s32.totalorder %s5753_s17, 1 }
   0xa   : > { %p467_p2 = scmp.lt.s32.totalorder %s5753_s17, 10  ;;  %s7791_s19 = smov (%p35_p0, %s34_s19), 0 }
   0xb   : > { %7753 = sst [smem:[#allocation14_spill]] %s7791_s19  ;;  %s7793_s20 = smov (!%p35_p0, %s37_s20), %s5749_s16 }
   0xc   : > { %p468_p3 = pnand %p3988_p1, %p467_p2  ;;  %p39_p4 = scmp.ge.s32.totalorder %s7793_s20, 3 }
   0xd   : > { %s3989_s21 = sshll.u32 (!%p468_p3), %s5737_s29, 4  ;;  %p545_p5 = scmp.lt.s32.totalorder (!%p468_p3), %s5737_s29, 2 }
   0xe   : > { %s7795_s20 = smov (%p39_p4, %s7793_s20), 0  ;;  %471 = sbr.rel (%p468_p3) target bundleno = 2108 (0x83c), region = 76 }
   0xf   : > { %7754 = sst [smem:[#allocation15_spill]] %s7795_s20  ;;  %p528_p6 = scmp.lt.s32.totalorder (!%p468_p3), %s3989_s21, 47 }
  0x10   : > { %p554_p7 = scmp.eq.s32.totalorder (!%p468_p3), %s5741_s30, 0  ;;  %s7755_s11 = sld [smem:[#allocation16_spill]] (!%p468_p3) }
  0x11   : > { %p555_p8 = scmp.eq.s32.totalorder (!%p468_p3), %s5737_s29, 0 }
  0x13   : > { %s546_s22 = scalar_select %p545_p5, %s5737_s29, 2 }
  0x14   : > { %s7797_s21 = smov (!%p528_p6, %s3989_s21), 47  ;;  %p556_p9 = pnand %p555_p8, %p554_p7 }
  0x15   : > { %s5894_s28 = scalar_lea.vmem %s7719_s12, %s546_s22  ;;  %s3990_s18 = sshll.u32 %s7797_s21, 3 }
  0x16   : > { %s5889_s25 = scalar_lea.vmem %s7755_s11, %s546_s22  ;;  %s5899_s16 = scalar_lea.vmem %s7720_s13, %s546_s22 }
  0x17   : > { %s5904_s17 = scalar_lea.vmem %s7715_s8, %s3990_s18  ;;  %s5909_s24 = scalar_lea.vmem %s7716_s9, %s3990_s18 }
  0x18   : > { %s5914_s27 = scalar_lea.vmem %s7717_s10, %s3990_s18  ;;  %559 = sbr.rel (%p556_p9) target bundleno = 318 (0x13e), region = 80 }
  0x1d   : > { %v591_v0 = vld [vmem:[%s7711_s4 + $0x78] sm:$0xff]  ;;  %v590_v1 = vld [vmem:[%s7711_s4 + $0x70] sm:$0xff]  ;;  %v5755_v2 = vmov 0.0   ;;  %v589_v3 = vld [vmem:[%s7711_s4 + $0x68] sm:$0xff]  ;;  %vm5756_vm0 = vmmov 0   ;;  %vm737_vm1 = vcmask 15360  }
  0x1e   : > { %4803 = vmatprep.subr.mxu0 %v591_v0  ;;  %4859 = vmatprep.subr.mxu1 %v5755_v2  ;;  %1125 = vst [vmem:[#allocation6 + $0x1] sm:$0x1] %v5755_v2  ;;  %1126 = vst [vmem:[#allocation7] sm:$0xff] %v5755_v2  ;;  %v588_v4 = vld [vmem:[%s7711_s4 + $0x60] sm:$0xff]  ;;  %v770_v5 = vld [vmem:[%s7708_s1 + $0x78] sm:$0xff]  ;;  %vm1019_vm2 = vcmask 7168  }
  0x1f   : > { %1127 = vst [vmem:[#allocation7 + $0x8] sm:$0xff] %v5755_v2  ;;  %1128 = vst [vmem:[#allocation7 + $0x10] sm:$0xff] %v5755_v2  ;;  %4804 = vmatpush3.msra.mxu0 %v591_v0  ;;  %4891 = vmatprep.mubr.msk.f32.mxu1 %vm5756_vm0, %v5755_v2  ;;  %v560_v6 = vld [vmem:[%s7707_s0] sm:$0xff]  ;;  %v587_v7 = vld [vmem:[%s7711_s4 + $0x58] sm:$0xff] }
  0x20   : > { %1129 = vst [vmem:[#allocation7 + $0x18] sm:$0xff] %v5755_v2  ;;  %1130 = vst [vmem:[#allocation7 + $0x20] sm:$0xff] %v5755_v2  ;;  %4805 = vmatprep.subr.mxu0 %v590_v1  ;;  %4860 = vmatpush3.msra.mxu1 %v770_v5  ;;  %v769_v8 = vld [vmem:[%s7708_s1 + $0x70] sm:$0xff]  ;;  %v768_v10 = vld [vmem:[%s7708_s1 + $0x68] sm:$0xff] }
  0x21   : > { %1131 = vst [vmem:[#allocation7 + $0x28] sm:$0xff] %v5755_v2  ;;  %1132 = vst [vmem:[#allocation7 + $0x30] sm:$0xff] %v5755_v2  ;;  %4806 = vmatpush3.msra.mxu0 %v590_v1  ;;  %4861 = vmatprep.subr.mxu1 %v5755_v2  ;;  %v586_v9 = vld [vmem:[%s7711_s4 + $0x50] sm:$0xff]  ;;  %v585_v11 = vld [vmem:[%s7711_s4 + $0x48] sm:$0xff] }
  0x22   : > { %1133 = vst [vmem:[#allocation7 + $0x38] sm:$0xff] %v5755_v2  ;;  %1134 = vst [vmem:[#allocation7 + $0x40] sm:$0xff] %v5755_v2  ;;  %4807 = vmatprep.subr.mxu0 %v589_v3  ;;  %4835 = vmatprep.mubr.f32.mxu0 %v560_v6  ;;  %v767_v12 = vld [vmem:[%s7708_s1 + $0x60] sm:$0xff]  ;;  %v766_v14 = vld [vmem:[%s7708_s1 + $0x58] sm:$0xff] }
  0x23   : > { %1135 = vst [vmem:[#allocation7 + $0x48] sm:$0xff] %v5755_v2  ;;  %1136 = vst [vmem:[#allocation7 + $0x50] sm:$0xff] %v5755_v2  ;;  %4808 = vmatpush3.msra.mxu0 %v589_v3  ;;  %4862 = vmatpush3.msra.mxu1 %v769_v8  ;;  %v584_v13 = vld [vmem:[%s7711_s4 + $0x40] sm:$0xff]  ;;  %v583_v15 = vld [vmem:[%s7711_s4 + $0x38] sm:$0xff] }
  0x24   : > { %1137 = vst [vmem:[#allocation7 + $0x58] sm:$0xff] %v5755_v2  ;;  %1138 = vst [vmem:[#allocation7 + $0x60] sm:$0xff] %v5755_v2  ;;  %4809 = vmatprep.subr.mxu0 %v588_v4  ;;  %4863 = vmatprep.subr.mxu1 %v5755_v2  ;;  %v765_v16 = vld [vmem:[%s7708_s1 + $0x50] sm:$0xff]  ;;  %v764_v18 = vld [vmem:[%s7708_s1 + $0x48] sm:$0xff] }
  0x25   : > { %1139 = vst [vmem:[#allocation7 + $0x68] sm:$0xff] %v5755_v2  ;;  %1140 = vst [vmem:[#allocation7 + $0x70] sm:$0xff] %v5755_v2  ;;  %4810 = vmatpush3.msra.mxu0 %v588_v4  ;;  %4864 = vmatpush3.msra.mxu1 %v768_v10  ;;  %v582_v17 = vld [vmem:[%s7711_s4 + $0x30] sm:$0xff]  ;;  %v581_v19 = vld [vmem:[%s7711_s4 + $0x28] sm:$0xff] }
  0x26   : > { %1141 = vst [vmem:[#allocation7 + $0x78] sm:$0xff] %v5755_v2  ;;  %4811 = vmatprep.subr.mxu0 %v587_v7  ;;  %4865 = vmatprep.subr.mxu1 %v5755_v2  ;;  %v763_v20 = vld [vmem:[%s7708_s1 + $0x40] sm:$0xff]  ;;  %v762_v22 = vld [vmem:[%s7708_s1 + $0x38] sm:$0xff]  ;;  %v761_v24 = vld [vmem:[%s7708_s1 + $0x30] sm:$0xff] }
  0x27   : > { %4812 = vmatpush3.msra.mxu0 %v587_v7  ;;  %4866 = vmatpush3.msra.mxu1 %v767_v12  ;;  %v580_v21 = vld [vmem:[%s7711_s4 + $0x20] sm:$0xff]  ;;  %v579_v23 = vld [vmem:[%s7711_s4 + $0x18] sm:$0xff]  ;;  %v578_v25 = vld [vmem:[%s7711_s4 + $0x10] sm:$0xff] }
  0x28   : > { %4813 = vmatprep.subr.mxu0 %v586_v9  ;;  %4867 = vmatprep.subr.mxu1 %v5755_v2  ;;  %v760_v26 = vld [vmem:[%s7708_s1 + $0x28] sm:$0xff]  ;;  %v759_v28 = vld [vmem:[%s7708_s1 + $0x20] sm:$0xff]  ;;  %v758_v30 = vld [vmem:[%s7708_s1 + $0x18] sm:$0xff] }
  0x29   : > { %4814 = vmatpush3.msra.mxu0 %v586_v9  ;;  %4868 = vmatpush3.msra.mxu1 %v766_v14  ;;  %v577_v27 = vld [vmem:[%s7711_s4 + $0x8] sm:$0xff]  ;;  %v576_v29 = vld [vmem:[%s7711_s4] sm:$0xff]  ;;  %v873_v32 = vld [vmem:[%s7713_s6 + $0x78] sm:$0xff] }
  0x2a   : > { %4815 = vmatprep.subr.mxu0 %v585_v11  ;;  %4869 = vmatprep.subr.mxu1 %v5755_v2  ;;  %v561_v31 = vld [vmem:[%s7707_s0 + $0x8] sm:$0xff]  ;;  %v562_v33 = vld [vmem:[%s7707_s0 + $0x10] sm:$0xff]  ;;  %v563_v36 = vld [vmem:[%s7707_s0 + $0x18] sm:$0xff] }
  0x2b   : > { %4816 = vmatpush3.msra.mxu0 %v585_v11  ;;  %4870 = vmatpush3.msra.mxu1 %v765_v16  ;;  %v872_v34 = vld [vmem:[%s7713_s6 + $0x70] sm:$0xff]  ;;  %v871_v37 = vld [vmem:[%s7713_s6 + $0x68] sm:$0xff]  ;;  %v564_v38 = vld [vmem:[%s7707_s0 + $0x20] sm:$0xff] }
  0x2c   : > { %4817 = vmatprep.subr.mxu0 %v584_v13  ;;  %4871 = vmatprep.subr.mxu1 %v5755_v2  ;;  %v757_v35 = vld [vmem:[%s7708_s1 + $0x10] sm:$0xff]  ;;  %v870_v39 = vld [vmem:[%s7713_s6 + $0x60] sm:$0xff]  ;;  %v756_v40 = vld [vmem:[%s7708_s1 + $0x8] sm:$0xff] }
  0x2d   : > { %4818 = vmatpush3.msra.mxu0 %v584_v13  ;;  %4872 = vmatpush3.msra.mxu1 %v764_v18  ;;  %v565_v41 = vld [vmem:[%s7707_s0 + $0x28] sm:$0xff]  ;;  %v869_v42 = vld [vmem:[%s7713_s6 + $0x58] sm:$0xff]  ;;  %v566_v43 = vld [vmem:[%s7707_s0 + $0x30] sm:$0xff] }
  0x2e   : > { %4819 = vmatprep.subr.mxu0 %v583_v15  ;;  %4873 = vmatprep.subr.mxu1 %v5755_v2  ;;  %v868_v44 = vld [vmem:[%s7713_s6 + $0x50] sm:$0xff]  ;;  %v755_v45 = vld [vmem:[%s7708_s1] sm:$0xff]  ;;  %v567_v46 = vld [vmem:[%s7707_s0 + $0x38] sm:$0xff] }
  0x2f   : > { %4820 = vmatpush3.msra.mxu0 %v583_v15  ;;  %4874 = vmatpush3.msra.mxu1 %v763_v20  ;;  %v867_v47 = vld [vmem:[%s7713_s6 + $0x48] sm:$0xff]  ;;  %v568_v48 = vld [vmem:[%s7707_s0 + $0x40] sm:$0xff]  ;;  %v1052_v51 = vld [vmem:[%s7710_s3 + $0x78] sm:$0xff] }
  0x30   : > { %4821 = vmatprep.subr.mxu0 %v582_v17  ;;  %4875 = vmatprep.subr.mxu1 %v5755_v2  ;;  %v866_v49 = vld [vmem:[%s7713_s6 + $0x40] sm:$0xff]  ;;  %v569_v52 = vld [vmem:[%s7707_s0 + $0x48] sm:$0xff]  ;;  %v865_v53 = vld [vmem:[%s7713_s6 + $0x38] sm:$0xff] }
  0x31   : > { %4822 = vmatpush3.msra.mxu0 %v582_v17  ;;  %4876 = vmatpush3.msra.mxu1 %v762_v22  ;;  %v754_v50 = vld [vmem:[%s7712_s5] sm:$0x3]  ;;  %v570_v54 = vld [vmem:[%s7707_s0 + $0x50] sm:$0xff]  ;;  %v571_v57 = vld [vmem:[%s7707_s0 + $0x58] sm:$0xff] }
  0x32   : > { %4823 = vmatprep.subr.mxu0 %v581_v19  ;;  %4877 = vmatprep.subr.mxu1 %v5755_v2  ;;  %v864_v55 = vld [vmem:[%s7713_s6 + $0x30] sm:$0xff]  ;;  %v863_v58 = vld [vmem:[%s7713_s6 + $0x28] sm:$0xff]  ;;  %v572_v59 = vld [vmem:[%s7707_s0 + $0x60] sm:$0xff] }
  0x33   : > { %4824 = vmatpush3.msra.mxu0 %v581_v19  ;;  %4878 = vmatpush3.msra.mxu1 %v761_v24  ;;  %v1051_v56 = vld [vmem:[%s7710_s3 + $0x70] sm:$0xff]  ;;  %v862_v60 = vld [vmem:[%s7713_s6 + $0x20] sm:$0xff]  ;;  %v1050_v61 = vld [vmem:[%s7710_s3 + $0x68] sm:$0xff] }
  0x34   : > { %4825 = vmatprep.subr.mxu0 %v580_v21  ;;  %4879 = vmatprep.subr.mxu1 %v5755_v2  ;;  %v573_v62 = vld [vmem:[%s7707_s0 + $0x68] sm:$0xff]  ;;  %v861_v63 = vld [vmem:[%s7713_s6 + $0x18] sm:$0xff]  ;;  %v574_v0 = vld [vmem:[%s7707_s0 + $0x70] sm:$0xff] }
  0x35   : > { %4826 = vmatpush3.msra.mxu0 %v580_v21  ;;  %4880 = vmatpush3.msra.mxu1 %v760_v26  ;;  %v860_v1 = vld [vmem:[%s7713_s6 + $0x10] sm:$0xff]  ;;  %v1049_v3 = vld [vmem:[%s7710_s3 + $0x60] sm:$0xff]  ;;  %v575_v4 = vld [vmem:[%s7707_s0 + $0x78] sm:$0xff] }
  0x36   : > { %4827 = vmatprep.subr.mxu0 %v579_v23  ;;  %4881 = vmatprep.subr.mxu1 %v5755_v2  ;;  %v859_v5 = vld [vmem:[%s7713_s6 + $0x8] sm:$0xff]  ;;  %v842_v6 = vld [vmem:[%s7709_s2] sm:$0xff]  ;;  %v1048_v8 = vld [vmem:[%s7710_s3 + $0x58] sm:$0xff] }
  0x37   : > { %4828 = vmatpush3.msra.mxu0 %v579_v23  ;;  %4882 = vmatpush3.msra.mxu1 %v759_v28  ;;  %v858_v7 = vld [vmem:[%s7713_s6] sm:$0xff]  ;;  %v843_v9 = vld [vmem:[%s7709_s2 + $0x8] sm:$0xff]  ;;  %v844_v10 = vld [vmem:[%s7709_s2 + $0x10] sm:$0xff] }
  0x38   : > { %4829 = vmatprep.subr.mxu0 %v578_v25  ;;  %4883 = vmatprep.subr.mxu1 %v5755_v2  ;;  %v1047_v11 = vld [vmem:[%s7710_s3 + $0x50] sm:$0xff]  ;;  %v1046_v12 = vld [vmem:[%s7710_s3 + $0x48] sm:$0xff]  ;;  %v845_v13 = vld [vmem:[%s7709_s2 + $0x18] sm:$0xff] }
  0x39   : > { %4830 = vmatpush3.msra.mxu0 %v578_v25  ;;  %4884 = vmatpush3.msra.mxu1 %v758_v30  ;;  %v846_v14 = vld [vmem:[%s7709_s2 + $0x20] sm:$0xff]  ;;  %v1044_v16 = vld [vmem:[%s7710_s3 + $0x38] sm:$0xff]  ;;  %v847_v17 = vld [vmem:[%s7709_s2 + $0x28] sm:$0xff] }
  0x3a   : > { %4831 = vmatprep.subr.mxu0 %v577_v27  ;;  %4885 = vmatprep.subr.mxu1 %v5755_v2  ;;  %v1045_v15 = vld [vmem:[%s7710_s3 + $0x40] sm:$0xff]  ;;  %v848_v18 = vld [vmem:[%s7709_s2 + $0x30] sm:$0xff]  ;;  %v1042_v20 = vld [vmem:[%s7710_s3 + $0x28] sm:$0xff] }
  0x3b   : > { %4832 = vmatpush3.msra.mxu0 %v577_v27  ;;  %4886 = vmatpush3.msra.mxu1 %v757_v35  ;;  %v1043_v19 = vld [vmem:[%s7710_s3 + $0x30] sm:$0xff]  ;;  %v849_v21 = vld [vmem:[%s7709_s2 + $0x38] sm:$0xff]  ;;  %v850_v22 = vld [vmem:[%s7709_s2 + $0x40] sm:$0xff] }
  0x3c   : > { %4833 = vmatprep.subr.mxu0 %v576_v29  ;;  %4887 = vmatprep.subr.mxu1 %v5755_v2  ;;  %v1041_v23 = vld [vmem:[%s7710_s3 + $0x20] sm:$0xff]  ;;  %v1040_v24 = vld [vmem:[%s7710_s3 + $0x18] sm:$0xff]  ;;  %v851_v25 = vld [vmem:[%s7709_s2 + $0x48] sm:$0xff] }
  0x3d   : > { %4834 = vmatpush3.msra.mxu0 %v576_v29  ;;  %4888 = vmatpush3.msra.mxu1 %v756_v40  ;;  %v852_v26 = vld [vmem:[%s7709_s2 + $0x50] sm:$0xff]  ;;  %v1038_v28 = vld [vmem:[%s7710_s3 + $0x8] sm:$0xff]  ;;  %v853_v29 = vld [vmem:[%s7709_s2 + $0x58] sm:$0xff] }
  0x3e   : > { %4836 = vmatmul.mubr.f32.vlgmr.msra.gmra.mxu0 %v561_v31  ;;  %4894 = vmatprep.subr.mxu0 %v873_v32  ;;  %v1039_v27 = vld [vmem:[%s7710_s3 + $0x10] sm:$0xff]  ;;  %v854_v30 = vld [vmem:[%s7709_s2 + $0x60] sm:$0xff]  ;;  %v857_v35 = vld [vmem:[%s7709_s2 + $0x78] sm:$0xff] }
  0x3f   : > { %4895 = vmatpush3.msra.mxu0 %v873_v32  ;;  %4838 = vmatprep.mubr.f32.mxu0 %v562_v33  ;;  %v1037_v31 = vld [vmem:[%s7710_s3] sm:$0xff]  ;;  %v855_v33 = vld [vmem:[%s7709_s2 + $0x68] sm:$0xff] }
  0x40   : > { %4896 = vmatprep.subr.mxu0 %v872_v34  ;;  %4889 = vmatprep.subr.mxu1 %v5755_v2  ;;  %v1036_v32 = vld [vmem:[%s7714_s7] sm:$0x1] }
  0x41   : > { %4897 = vmatpush3.msra.mxu0 %v872_v34  ;;  %4890 = vmatpush3.msra.mxu1 %v755_v45  ;;  %v856_v34 = vld [vmem:[%s7709_s2 + $0x70] sm:$0xff] }
  0x42   : > { %4839 = vmatmul.mubr.f32.gmra.mxu0 %v563_v36  ;;  %4898 = vmatprep.subr.mxu0 %v871_v37  ;;  %v5757_v36 = vmov -1e+30  }
  0x43   : > { %4899 = vmatpush3.msra.mxu0 %v871_v37  ;;  %4841 = vmatprep.mubr.f32.mxu0 %v564_v38  ;;  %1124 = vst [vmem:[#allocation6] sm:$0x1] %v5757_v36 }
  0x44   : > { %4900 = vmatprep.subr.mxu0 %v870_v39  ;;  %4950 = vmatprep.subr.mxu1 %v5755_v2 }
  0x45   : > { %4901 = vmatpush3.msra.mxu0 %v870_v39  ;;  %4892 = vmatmul.mubr.f32.vlgmr.msra.gmra.mxu1 %v754_v50 }
  0x46   : > { %4842 = vmatmul.mubr.f32.gmra.mxu0 %v565_v41  ;;  %4902 = vmatprep.subr.mxu0 %v869_v42 }
  0x47   : > { %4903 = vmatpush3.msra.mxu0 %v869_v42  ;;  %4844 = vmatprep.mubr.f32.mxu0 %v566_v43 }
  0x48   : > { %4904 = vmatprep.subr.mxu0 %v868_v44  ;;  %4951 = vmatpush3.msra.mxu1 %v1052_v51 }
  0x49   : > { %4905 = vmatpush3.msra.mxu0 %v868_v44  ;;  %4952 = vmatprep.subr.mxu1 %v5755_v2 }
  0x4a   : > { %4845 = vmatmul.mubr.f32.gmra.mxu0 %v567_v46  ;;  %4906 = vmatprep.subr.mxu0 %v867_v47 }
  0x4b   : > { %4907 = vmatpush3.msra.mxu0 %v867_v47  ;;  %4847 = vmatprep.mubr.f32.mxu0 %v568_v48 }
  0x4c   : > { %4908 = vmatprep.subr.mxu0 %v866_v49  ;;  %4953 = vmatpush3.msra.mxu1 %v1051_v56 }
  0x4d   : > { %4909 = vmatpush3.msra.mxu0 %v866_v49  ;;  %4954 = vmatprep.subr.mxu1 %v5755_v2 }
  0x4e   : > { %4848 = vmatmul.mubr.f32.gmra.mxu0 %v569_v52  ;;  %4910 = vmatprep.subr.mxu0 %v865_v53 }
  0x4f   : > { %4911 = vmatpush3.msra.mxu0 %v865_v53  ;;  %4850 = vmatprep.mubr.f32.mxu0 %v570_v54 }
  0x50   : > { %4912 = vmatprep.subr.mxu0 %v864_v55  ;;  %4955 = vmatpush3.msra.mxu1 %v1050_v61 }
  0x51   : > { %4913 = vmatpush3.msra.mxu0 %v864_v55  ;;  %4956 = vmatprep.subr.mxu1 %v5755_v2 }
  0x52   : > { %4851 = vmatmul.mubr.f32.gmra.mxu0 %v571_v57  ;;  %4914 = vmatprep.subr.mxu0 %v863_v58 }
  0x53   : > { %4915 = vmatpush3.msra.mxu0 %v863_v58  ;;  %4853 = vmatprep.mubr.f32.mxu0 %v572_v59 }
  0x54   : > { %4916 = vmatprep.subr.mxu0 %v862_v60  ;;  %4957 = vmatpush3.msra.mxu1 %v1049_v3 }
  0x55   : > { %4917 = vmatpush3.msra.mxu0 %v862_v60  ;;  %4958 = vmatprep.subr.mxu1 %v5755_v2 }
  0x56   : > { %4854 = vmatmul.mubr.f32.gmra.mxu0 %v573_v62  ;;  %4918 = vmatprep.subr.mxu0 %v861_v63 }
  0x57   : > { %4919 = vmatpush3.msra.mxu0 %v861_v63  ;;  %4856 = vmatprep.mubr.f32.mxu0 %v574_v0 }
  0x58   : > { %4920 = vmatprep.subr.mxu0 %v860_v1  ;;  %4959 = vmatpush3.msra.mxu1 %v1048_v8 }
  0x59   : > { %4921 = vmatpush3.msra.mxu0 %v860_v1  ;;  %4960 = vmatprep.subr.mxu1 %v5755_v2 }
  0x5a   : > { %4857 = vmatmul.mubr.f32.gmra.mxu0 %v575_v4  ;;  %4922 = vmatprep.subr.mxu0 %v859_v5 }
  0x5b   : > { %4923 = vmatpush3.msra.mxu0 %v859_v5  ;;  %4926 = vmatprep.mubr.f32.mxu0 %v842_v6 }
  0x5c   : > { %4924 = vmatprep.subr.mxu0 %v858_v7  ;;  %4961 = vmatpush3.msra.mxu1 %v1047_v11 }
  0x5d   : > { %4925 = vmatpush3.msra.mxu0 %v858_v7  ;;  %4962 = vmatprep.subr.mxu1 %v5755_v2 }
  0x5e   : > { %4927 = vmatmul.mubr.f32.vlgmr.msra.gmra.mxu0 %v843_v9  ;;  %4982 = vmatprep.mubr.msk.f32.mxu1 %vm5756_vm0, %v5755_v2 }
  0x5f   : > { %4929 = vmatprep.mubr.f32.mxu0 %v844_v10  ;;  %4963 = vmatpush3.msra.mxu1 %v1046_v12 }
  0x60   : > { %4964 = vmatprep.subr.mxu1 %v5755_v2 }
  0x61   : > { %4965 = vmatpush3.msra.mxu1 %v1045_v15 }
  0x62   : > { %4930 = vmatmul.mubr.f32.gmra.mxu0 %v845_v13  ;;  %4966 = vmatprep.subr.mxu1 %v5755_v2 }
  0x63   : > { %4932 = vmatprep.mubr.f32.mxu0 %v846_v14  ;;  %4967 = vmatpush3.msra.mxu1 %v1044_v16 }
  0x64   : > { %4968 = vmatprep.subr.mxu1 %v5755_v2 }
  0x65   : > { %4969 = vmatpush3.msra.mxu1 %v1043_v19 }
  0x66   : > { %4933 = vmatmul.mubr.f32.gmra.mxu0 %v847_v17  ;;  %4970 = vmatprep.subr.mxu1 %v5755_v2 }
  0x67   : > { %4935 = vmatprep.mubr.f32.mxu0 %v848_v18  ;;  %4971 = vmatpush3.msra.mxu1 %v1042_v20 }
  0x68   : > { %4972 = vmatprep.subr.mxu1 %v5755_v2 }
  0x69   : > { %4973 = vmatpush3.msra.mxu1 %v1041_v23 }
  0x6a   : > { %4936 = vmatmul.mubr.f32.gmra.mxu0 %v849_v21  ;;  %4974 = vmatprep.subr.mxu1 %v5755_v2 }
  0x6b   : > { %4938 = vmatprep.mubr.f32.mxu0 %v850_v22  ;;  %4975 = vmatpush3.msra.mxu1 %v1040_v24 }
  0x6c   : > { %4976 = vmatprep.subr.mxu1 %v5755_v2 }
  0x6d   : > { %4977 = vmatpush3.msra.mxu1 %v1039_v27 }
  0x6e   : > { %4939 = vmatmul.mubr.f32.gmra.mxu0 %v851_v25  ;;  %4978 = vmatprep.subr.mxu1 %v5755_v2 }
  0x6f   : > { %4941 = vmatprep.mubr.f32.mxu0 %v852_v26  ;;  %4979 = vmatpush3.msra.mxu1 %v1038_v28 }
  0x70   : > { %4980 = vmatprep.subr.mxu1 %v5755_v2 }
  0x71   : > { %4981 = vmatpush3.msra.mxu1 %v1037_v31 }
  0x72   : > { %4942 = vmatmul.mubr.f32.gmra.mxu0 %v853_v29  ;;  %4983 = vmatmul.mubr.f32.vlgmr.msra.gmra.mxu1 %v1036_v32 }
  0x73   : > { %4944 = vmatprep.mubr.f32.mxu0 %v854_v30 }
  0x76   : > { %4945 = vmatmul.mubr.f32.gmra.mxu0 %v855_v33 }
  0x77   : > { %4947 = vmatprep.mubr.f32.mxu0 %v856_v34 }
  0x7a   : > { %4948 = vmatmul.mubr.f32.gmra.mxu0 %v857_v35 }
  0xfe   : > { %v4837_v2 = vpop.f32.mrf.mxu0 }
  0xff   : > { %739 = vst.msk [vmem:[#allocation2 + $0x8] sm:$0xff] %vm737_vm1, %v4837_v2 }
 0x100   : > { %v658_v37 = vpop.f32.mrf.mxu0 }
 0x101   : > { %738 = vst.msk [vmem:[#allocation2] sm:$0xff] %vm737_vm1, %v658_v37 }
 0x102   : > { %v4840_v38 = vpop.f32.mrf.mxu0 }
 0x103   : > { %741 = vst.msk [vmem:[#allocation2 + $0x18] sm:$0xff] %vm737_vm1, %v4840_v38 }
 0x104   : > { %v668_v39 = vpop.f32.mrf.mxu0 }
 0x105   : > { %740 = vst.msk [vmem:[#allocation2 + $0x10] sm:$0xff] %vm737_vm1, %v668_v39  ;;  %v837_v44 = vpop.f32.mrf.mxu1 }
 0x106   : > { %v4843_v40 = vpop.f32.mrf.mxu0  ;;  %841 = vst [vmem:[#allocation3] sm:$0x3] %v837_v44 }
 0x107   : > { %743 = vst.msk [vmem:[#allocation2 + $0x28] sm:$0xff] %vm737_vm1, %v4843_v40  ;;  %v4893_v46 = vpop.f32.mrf.mxu1 }
 0x108   : > { %v678_v41 = vpop.f32.mrf.mxu0 }
 0x109   : > { %742 = vst.msk [vmem:[#allocation2 + $0x20] sm:$0xff] %vm737_vm1, %v678_v41 }
 0x10a   : > { %v4846_v42 = vpop.f32.mrf.mxu0 }
 0x10b   : > { %745 = vst.msk [vmem:[#allocation2 + $0x38] sm:$0xff] %vm737_vm1, %v4846_v42 }
 0x10c   : > { %v688_v43 = vpop.f32.mrf.mxu0 }
 0x10d   : > { %744 = vst.msk [vmem:[#allocation2 + $0x30] sm:$0xff] %vm737_vm1, %v688_v43 }
 0x10e   : > { %v4849_v45 = vpop.f32.mrf.mxu0 }
 0x10f   : > { %747 = vst.msk [vmem:[#allocation2 + $0x48] sm:$0xff] %vm737_vm1, %v4849_v45 }
 0x110   : > { %v698_v47 = vpop.f32.mrf.mxu0 }
 0x111   : > { %746 = vst.msk [vmem:[#allocation2 + $0x40] sm:$0xff] %vm737_vm1, %v698_v47 }
 0x112   : > { %v4852_v48 = vpop.f32.mrf.mxu0 }
 0x113   : > { %749 = vst.msk [vmem:[#allocation2 + $0x58] sm:$0xff] %vm737_vm1, %v4852_v48 }
 0x114   : > { %v708_v49 = vpop.f32.mrf.mxu0 }
 0x115   : > { %748 = vst.msk [vmem:[#allocation2 + $0x50] sm:$0xff] %vm737_vm1, %v708_v49 }
 0x116   : > { %v4855_v50 = vpop.f32.mrf.mxu0 }
 0x117   : > { %751 = vst.msk [vmem:[#allocation2 + $0x68] sm:$0xff] %vm737_vm1, %v4855_v50 }
 0x118   : > { %v718_v51 = vpop.f32.mrf.mxu0 }
 0x119   : > { %750 = vst.msk [vmem:[#allocation2 + $0x60] sm:$0xff] %vm737_vm1, %v718_v51 }
 0x11a   : > { %v4858_v52 = vpop.f32.mrf.mxu0 }
 0x11b   : > { %753 = vst.msk [vmem:[#allocation2 + $0x78] sm:$0xff] %vm737_vm1, %v4858_v52 }
 0x11c   : > { %v728_v53 = vpop.f32.mrf.mxu0 }
 0x11d   : > { %752 = vst.msk [vmem:[#allocation2 + $0x70] sm:$0xff] %vm737_vm1, %v728_v53 }
 0x11e   : > { %v4928_v54 = vpop.f32.mrf.mxu0 }
 0x11f   : > { %1021 = vst.msk [vmem:[#allocation4 + $0x8] sm:$0xff] %vm1019_vm2, %v4928_v54 }
 0x120   : > { %v940_v55 = vpop.f32.mrf.mxu0 }
 0x121   : > { %1020 = vst.msk [vmem:[#allocation4] sm:$0xff] %vm1019_vm2, %v940_v55 }
 0x122   : > { %v4931_v56 = vpop.f32.mrf.mxu0 }
 0x123   : > { %1023 = vst.msk [vmem:[#allocation4 + $0x18] sm:$0xff] %vm1019_vm2, %v4931_v56 }
 0x124   : > { %v950_v57 = vpop.f32.mrf.mxu0 }
 0x125   : > { %1022 = vst.msk [vmem:[#allocation4 + $0x10] sm:$0xff] %vm1019_vm2, %v950_v57 }
 0x126   : > { %v4934_v58 = vpop.f32.mrf.mxu0 }
 0x127   : > { %1025 = vst.msk [vmem:[#allocation4 + $0x28] sm:$0xff] %vm1019_vm2, %v4934_v58 }
 0x128   : > { %v960_v59 = vpop.f32.mrf.mxu0 }
 0x129   : > { %1024 = vst.msk [vmem:[#allocation4 + $0x20] sm:$0xff] %vm1019_vm2, %v960_v59 }
 0x12a   : > { %v4937_v60 = vpop.f32.mrf.mxu0 }
 0x12b   : > { %1027 = vst.msk [vmem:[#allocation4 + $0x38] sm:$0xff] %vm1019_vm2, %v4937_v60 }
 0x12c   : > { %v970_v61 = vpop.f32.mrf.mxu0 }
 0x12d   : > { %1026 = vst.msk [vmem:[#allocation4 + $0x30] sm:$0xff] %vm1019_vm2, %v970_v61 }
 0x12e   : > { %v4940_v62 = vpop.f32.mrf.mxu0 }
 0x12f   : > { %1029 = vst.msk [vmem:[#allocation4 + $0x48] sm:$0xff] %vm1019_vm2, %v4940_v62 }
 0x130   : > { %v980_v63 = vpop.f32.mrf.mxu0 }
 0x131   : > { %1028 = vst.msk [vmem:[#allocation4 + $0x40] sm:$0xff] %vm1019_vm2, %v980_v63 }
 0x132   : > { %v4943_v0 = vpop.f32.mrf.mxu0  ;;  %v1119_v3 = vpop.f32.mrf.mxu1 }
 0x133   : > { %1031 = vst.msk [vmem:[#allocation4 + $0x58] sm:$0xff] %vm1019_vm2, %v4943_v0  ;;  %1123 = vst [vmem:[#allocation5] sm:$0x1] %v1119_v3 }
 0x134   : > { %v990_v1 = vpop.f32.mrf.mxu0  ;;  %v4984_v5 = vpop.f32.mrf.mxu1 }
 0x135   : > { %1030 = vst.msk [vmem:[#allocation4 + $0x50] sm:$0xff] %vm1019_vm2, %v990_v1 }
 0x136   : > { %v4946_v4 = vpop.f32.mrf.mxu0 }
 0x137   : > { %1033 = vst.msk [vmem:[#allocation4 + $0x68] sm:$0xff] %vm1019_vm2, %v4946_v4 }
 0x138   : > { %v1000_v6 = vpop.f32.mrf.mxu0 }
 0x139   : > { %1032 = vst.msk [vmem:[#allocation4 + $0x60] sm:$0xff] %vm1019_vm2, %v1000_v6 }
 0x13a   : > { %v4949_v7 = vpop.f32.mrf.mxu0 }
 0x13b   : > { %1035 = vst.msk [vmem:[#allocation4 + $0x78] sm:$0xff] %vm1019_vm2, %v4949_v7 }
 0x13c   : > { %v1010_v8 = vpop.f32.mrf.mxu0 }
 0x13d   : > { %1034 = vst.msk [vmem:[#allocation4 + $0x70] sm:$0xff] %vm1019_vm2, %v1010_v8 }
 0x13e PF: > { %s7756_s23 = sld [smem:[#allocation10_spill]] }
 0x144   : > { %p3995_p10 = scmp.ne.s32.totalorder %s7756_s23, 0 }
 0x145   : > { %s5758_s26 = smov (!%p3995_p10), 127  }
 0x146   : > { %1144 = sbr.rel (%p3995_p10) target bundleno = 944 (0x3b0), region = 84 }
 0x14b   : > { %v1498_v9 = vld [vmem:[#allocation2 + $0x78] sm:$0xff]  ;;  %v1496_v10 = vld [vmem:[#allocation2 + $0x68] sm:$0xff]  ;;  %v1497_v11 = vld [vmem:[#allocation2 + $0x70] sm:$0xff]  ;;  %v5759_v13 = vmov 0  }
 0x14c   : > { %1545 = vrot.lane.b32.xlu0 %v1498_v9, %s5758_s26  ;;  %1541 = vrot.lane.b32.xlu1 %v1496_v10, %s5758_s26  ;;  %v1495_v12 = vld [vmem:[#allocation2 + $0x60] sm:$0xff]  ;;  %v1494_v14 = vld [vmem:[#allocation2 + $0x58] sm:$0xff]  ;;  %v1493_v15 = vld [vmem:[#allocation2 + $0x50] sm:$0xff] }
 0x14d   : > { %5675 = vset.pattern.permute.xlu1 %v5759_v13  ;;  %5676 = vset.pattern.permute.xlu0 %v5759_v13  ;;  %v1492_v16 = vld [vmem:[#allocation2 + $0x48] sm:$0xff]  ;;  %v1491_v17 = vld [vmem:[#allocation2 + $0x40] sm:$0xff]  ;;  %v1490_v18 = vld [vmem:[#allocation2 + $0x38] sm:$0xff] }
 0x14e   : > { %5041 = vmatprep.subr.mxu1 %v1498_v9  ;;  %v1489_v19 = vld [vmem:[#allocation2 + $0x30] sm:$0xff]  ;;  %v1488_v20 = vld [vmem:[#allocation2 + $0x28] sm:$0xff]  ;;  %v1487_v21 = vld [vmem:[#allocation2 + $0x20] sm:$0xff] }
 0x14f   : > { %5042 = vmatpush3.msra.mxu1 %v1498_v9  ;;  %v1486_v22 = vld [vmem:[#allocation2 + $0x18] sm:$0xff]  ;;  %v1259_v23 = vld [vmem:[%s5909_s24] sm:$0xff]  ;;  %v1260_v24 = vld [vmem:[%s5909_s24 + $0x8] sm:$0xff] }
 0x150   : > { %1543 = vrot.lane.b32.xlu0 %v1497_v11, %s5758_s26  ;;  %1539 = vrot.lane.b32.xlu1 %v1495_v12, %s5758_s26  ;;  %v1485_v25 = vld [vmem:[#allocation2 + $0x10] sm:$0xff]  ;;  %v1484_v26 = vld [vmem:[#allocation2 + $0x8] sm:$0xff]  ;;  %v1147_v27 = vld [vmem:[%s5904_s17] sm:$0xff] }
 0x151   : > { %5043 = vmatprep.subr.mxu1 %v1497_v11  ;;  %v1261_v28 = vld [vmem:[%s5909_s24 + $0x10] sm:$0xff]  ;;  %v1148_v29 = vld [vmem:[%s5904_s17 + $0x8] sm:$0xff]  ;;  %v1262_v30 = vld [vmem:[%s5909_s24 + $0x18] sm:$0xff] }
 0x152   : > { %5044 = vmatpush3.msra.mxu1 %v1497_v11  ;;  %v1483_v31 = vld [vmem:[#allocation2] sm:$0xff]  ;;  %v1149_v32 = vld [vmem:[%s5904_s17 + $0x10] sm:$0xff]  ;;  %v1150_v34 = vld [vmem:[%s5904_s17 + $0x18] sm:$0xff] }
 0x153   : > { %5045 = vmatprep.subr.mxu1 %v1496_v10  ;;  %v1263_v33 = vld [vmem:[%s5909_s24 + $0x20] sm:$0xff]  ;;  %v1264_v35 = vld [vmem:[%s5909_s24 + $0x28] sm:$0xff]  ;;  %v1265_v2 = vld [vmem:[%s5909_s24 + $0x30] sm:$0xff] }
 0x154   : > { %1537 = vrot.lane.b32.xlu0 %v1494_v14, %s5758_s26  ;;  %1535 = vrot.lane.b32.xlu1 %v1493_v15, %s5758_s26  ;;  %v1151_v36 = vld [vmem:[%s5904_s17 + $0x20] sm:$0xff]  ;;  %v1152_v37 = vld [vmem:[%s5904_s17 + $0x28] sm:$0xff] }
 0x155   : > { %5046 = vmatpush3.msra.mxu1 %v1496_v10  ;;  %v1266_v38 = vld [vmem:[%s5909_s24 + $0x38] sm:$0xff]  ;;  %v1153_v39 = vld [vmem:[%s5904_s17 + $0x30] sm:$0xff]  ;;  %v1267_v40 = vld [vmem:[%s5909_s24 + $0x40] sm:$0xff] }
 0x156   : > { %5047 = vmatprep.subr.mxu1 %v1495_v12  ;;  %v1154_v41 = vld [vmem:[%s5904_s17 + $0x38] sm:$0xff]  ;;  %v1268_v42 = vld [vmem:[%s5909_s24 + $0x48] sm:$0xff]  ;;  %v1155_v44 = vld [vmem:[%s5904_s17 + $0x40] sm:$0xff] }
 0x157   : > { %5048 = vmatpush3.msra.mxu1 %v1495_v12  ;;  %v6331_v43 = vld [vmem:[#allocation4 + $0x78] sm:$0xff]  ;;  %v1269_v45 = vld [vmem:[%s5909_s24 + $0x50] sm:$0xff]  ;;  %v1156_v46 = vld [vmem:[%s5904_s17 + $0x48] sm:$0xff] }
 0x158   : > { %1533 = vrot.lane.b32.xlu0 %v1492_v16, %s5758_s26  ;;  %1531 = vrot.lane.b32.xlu1 %v1491_v17, %s5758_s26  ;;  %v1270_v47 = vld [vmem:[%s5909_s24 + $0x58] sm:$0xff]  ;;  %v1157_v48 = vld [vmem:[%s5904_s17 + $0x50] sm:$0xff] }
 0x159   : > { %5049 = vmatprep.subr.mxu1 %v1494_v14  ;;  %v1271_v49 = vld [vmem:[%s5909_s24 + $0x60] sm:$0xff]  ;;  %v1158_v50 = vld [vmem:[%s5904_s17 + $0x58] sm:$0xff]  ;;  %v1272_v51 = vld [vmem:[%s5909_s24 + $0x68] sm:$0xff] }
 0x15a   : > { %5050 = vmatpush3.msra.mxu1 %v1494_v14  ;;  %v1159_v52 = vld [vmem:[%s5904_s17 + $0x60] sm:$0xff]  ;;  %v1273_v53 = vld [vmem:[%s5909_s24 + $0x70] sm:$0xff]  ;;  %v1160_v54 = vld [vmem:[%s5904_s17 + $0x68] sm:$0xff] }
 0x15b   : > { %5051 = vmatprep.subr.mxu1 %v1493_v15  ;;  %v1274_v55 = vld [vmem:[%s5909_s24 + $0x78] sm:$0xff]  ;;  %v1161_v56 = vld [vmem:[%s5904_s17 + $0x70] sm:$0xff]  ;;  %v1371_v57 = vld [vmem:[%s5914_s27] sm:$0xff] }
 0x15c   : > { %1529 = vrot.lane.b32.xlu0 %v1490_v18, %s5758_s26  ;;  %1527 = vrot.lane.b32.xlu1 %v1489_v19, %s5758_s26  ;;  %v1162_v58 = vld [vmem:[%s5904_s17 + $0x78] sm:$0xff]  ;;  %v1372_v59 = vld [vmem:[%s5914_s27 + $0x8] sm:$0xff] }
 0x15d   : > { %5052 = vmatpush3.msra.mxu1 %v1493_v15  ;;  %v1373_v60 = vld [vmem:[%s5914_s27 + $0x10] sm:$0xff]  ;;  %v1379_v61 = vld [vmem:[%s5914_s27 + $0x40] sm:$0xff]  ;;  %v1374_v62 = vld [vmem:[%s5914_s27 + $0x18] sm:$0xff] }
 0x15e   : > { %5053 = vmatprep.subr.mxu1 %v1492_v16  ;;  %v1380_v63 = vld [vmem:[%s5914_s27 + $0x48] sm:$0xff]  ;;  %v1375_v0 = vld [vmem:[%s5914_s27 + $0x20] sm:$0xff]  ;;  %v1381_v1 = vld [vmem:[%s5914_s27 + $0x50] sm:$0xff] }
 0x15f   : > { %5054 = vmatpush3.msra.mxu1 %v1492_v16  ;;  %v1376_v3 = vld [vmem:[%s5914_s27 + $0x28] sm:$0xff]  ;;  %v1382_v4 = vld [vmem:[%s5914_s27 + $0x58] sm:$0xff]  ;;  %v1377_v5 = vld [vmem:[%s5914_s27 + $0x30] sm:$0xff] }
 0x160   : > { %1525 = vrot.lane.b32.xlu0 %v1488_v20, %s5758_s26  ;;  %1523 = vrot.lane.b32.xlu1 %v1487_v21, %s5758_s26  ;;  %v1383_v7 = vld [vmem:[%s5914_s27 + $0x60] sm:$0xff]  ;;  %v1378_v9 = vld [vmem:[%s5914_s27 + $0x38] sm:$0xff] }
 0x161   : > { %5055 = vmatprep.subr.mxu1 %v1491_v17  ;;  %v1384_v11 = vld [vmem:[%s5914_s27 + $0x68] sm:$0xff]  ;;  %v1385_v13 = vld [vmem:[%s5914_s27 + $0x70] sm:$0xff]  ;;  %v1386_v15 = vld [vmem:[%s5914_s27 + $0x78] sm:$0xff] }
 0x162   : > { %5056 = vmatpush3.msra.mxu1 %v1491_v17 }
 0x163   : > { %5057 = vmatprep.subr.mxu1 %v1490_v18 }
 0x164   : > { %1521 = vrot.lane.b32.xlu0 %v1486_v22, %s5758_s26  ;;  %1276 = vperm.xlu1 %5675, %v1259_v23  }
 0x165   : > { %5058 = vmatpush3.msra.mxu1 %v1490_v18 }
 0x166   : > { %5059 = vmatprep.subr.mxu1 %v1489_v19 }
 0x167   : > { %5060 = vmatpush3.msra.mxu1 %v1489_v19 }
 0x168   : > { %1279 = vperm.xlu0 %5676, %v1260_v24   ;;  %1519 = vrot.lane.b32.xlu1 %v1485_v25, %s5758_s26  ;;  %v1145_v24 = vlaneseq }
 0x169   : > { %5061 = vmatprep.subr.mxu1 %v1488_v20 }
 0x16a   : > { %5062 = vmatpush3.msra.mxu1 %v1488_v20 }
 0x16b   : > { %5063 = vmatprep.subr.mxu1 %v1487_v21 }
 0x16c   : > { %1517 = vrot.lane.b32.xlu1 %v1484_v26, %s5758_s26  ;;  %1164 = vperm.xlu0 %5676, %v1147_v27   ;;  %v5760_v27 = vmov 1.0  }
 0x16d   : > { %5064 = vmatpush3.msra.mxu1 %v1487_v21 }
 0x16e   : > { %5065 = vmatprep.subr.mxu1 %v1486_v22 }
 0x16f   : > { %5066 = vmatpush3.msra.mxu1 %v1486_v22 }
 0x170   : > { %1282 = vperm.xlu1 %5675, %v1261_v28   ;;  %1167 = vperm.xlu0 %5676, %v1148_v29  }
 0x171   : > { %5067 = vmatprep.subr.mxu1 %v1485_v25 }
 0x172   : > { %5068 = vmatpush3.msra.mxu1 %v1485_v25  ;;  %v6364_v25 = vand.u32 127, %v1145_v24 }
 0x173   : > { %5069 = vmatprep.subr.mxu1 %v1484_v26 }
 0x174   : > { %1285 = vperm.xlu1 %5675, %v1262_v30   ;;  %1515 = vrot.lane.b32.xlu0 %v1483_v31, %s5758_s26 }
 0x175   : > { %5070 = vmatpush3.msra.mxu1 %v1484_v26 }
 0x176   : > { %5071 = vmatprep.subr.mxu1 %v1483_v31 }
 0x177   : > { %5072 = vmatpush3.msra.mxu1 %v1483_v31 }
 0x178   : > { %1170 = vperm.xlu1 %5675, %v1149_v32   ;;  %1288 = vperm.xlu0 %5676, %v1263_v33  }
 0x179   : > { %5580 = vmatprep.subr.mxu1 %v6331_v43 }
 0x17c   : > { %1173 = vperm.xlu1 %5675, %v1150_v34   ;;  %1291 = vperm.xlu0 %5676, %v1264_v35   ;;  %v1867_v34 = vld [vmem:[#allocation4 + $0x70] sm:$0xff] }
 0x180   : > { %1176 = vperm.xlu1 %5675, %v1151_v36   ;;  %1294 = vperm.xlu0 %5676, %v1265_v2   ;;  %v1866_v2 = vld [vmem:[#allocation4 + $0x68] sm:$0xff] }
 0x184   : > { %1179 = vperm.xlu1 %5675, %v1152_v37   ;;  %1297 = vperm.xlu0 %5676, %v1266_v38  }
 0x188   : > { %1182 = vperm.xlu1 %5675, %v1153_v39   ;;  %1300 = vperm.xlu0 %5676, %v1267_v40   ;;  %v1865_v39 = vld [vmem:[#allocation4 + $0x60] sm:$0xff] }
 0x18c   : > { %1185 = vperm.xlu1 %5675, %v1154_v41   ;;  %1303 = vperm.xlu0 %5676, %v1268_v42   ;;  %v1864_v42 = vld [vmem:[#allocation4 + $0x58] sm:$0xff] }
 0x190   : > { %1188 = vperm.xlu1 %5675, %v1155_v44   ;;  %1306 = vperm.xlu0 %5676, %v1269_v45  }
 0x194   : > { %1191 = vperm.xlu1 %5675, %v1156_v46   ;;  %1309 = vperm.xlu0 %5676, %v1270_v47   ;;  %v1862_v46 = vld [vmem:[#allocation4 + $0x48] sm:$0xff] }
 0x198   : > { %1194 = vperm.xlu1 %5675, %v1157_v48   ;;  %1312 = vperm.xlu0 %5676, %v1271_v49   ;;  %v1861_v49 = vld [vmem:[#allocation4 + $0x40] sm:$0xff] }
 0x19c   : > { %1197 = vperm.xlu1 %5675, %v1158_v50   ;;  %1315 = vperm.xlu0 %5676, %v1272_v51   ;;  %v1860_v50 = vld [vmem:[#allocation4 + $0x38] sm:$0xff] }
 0x1a0   : > { %1200 = vperm.xlu1 %5675, %v1159_v52   ;;  %1318 = vperm.xlu0 %5676, %v1273_v53   ;;  %v1859_v53 = vld [vmem:[#allocation4 + $0x30] sm:$0xff] }
 0x1a4   : > { %1203 = vperm.xlu1 %5675, %v1160_v54   ;;  %1321 = vperm.xlu0 %5676, %v1274_v55  }
 0x1a8   : > { %1206 = vperm.xlu1 %5675, %v1161_v56   ;;  %1388 = vperm.xlu0 %5676, %v1371_v57   ;;  %v1858_v56 = vld [vmem:[#allocation4 + $0x28] sm:$0xff]  ;;  %v1857_v57 = vld [vmem:[#allocation4 + $0x20] sm:$0xff] }
 0x1ac   : > { %1209 = vperm.xlu1 %5675, %v1162_v58   ;;  %1391 = vperm.xlu0 %5676, %v1372_v59  }
 0x1b0   : > { %1394 = vperm.xlu1 %5675, %v1373_v60   ;;  %1412 = vperm.xlu0 %5676, %v1379_v61   ;;  %v1856_v60 = vld [vmem:[#allocation4 + $0x18] sm:$0xff] }
 0x1b4   : > { %1397 = vperm.xlu1 %5675, %v1374_v62   ;;  %1415 = vperm.xlu0 %5676, %v1380_v63   ;;  %v1855_v63 = vld [vmem:[#allocation4 + $0x10] sm:$0xff] }
 0x1b8   : > { %1400 = vperm.xlu1 %5675, %v1375_v0   ;;  %1418 = vperm.xlu0 %5676, %v1381_v1   ;;  %v1854_v0 = vld [vmem:[#allocation4 + $0x8] sm:$0xff] }
 0x1bc   : > { %1403 = vperm.xlu1 %5675, %v1376_v3   ;;  %1421 = vperm.xlu0 %5676, %v1382_v4   ;;  %v1853_v4 = vld [vmem:[#allocation4] sm:$0xff] }
 0x1be   : > { %v1546_v6 = vpop.permute.xlu0 %1545  ;;  %v1542_v8 = vpop.permute.xlu1 %1541 }
 0x1bf   : > { %4985 = vmatprep.subr.mxu0 %v1546_v6 }
 0x1c0   : > { %4986 = vmatpush3.msra.mxu0 %v1546_v6  ;;  %1406 = vperm.xlu1 %5675, %v1377_v5  }
 0x1c1   : > { %1424 = vperm.xlu0 %5676, %v1383_v7  }
 0x1c2   : > { %v1544_v10 = vpop.permute.xlu0 %1543  ;;  %v1540_v12 = vpop.permute.xlu1 %1539 }
 0x1c3   : > { %4987 = vmatprep.subr.mxu0 %v1544_v10 }
 0x1c4   : > { %4988 = vmatpush3.msra.mxu0 %v1544_v10  ;;  %1409 = vperm.xlu1 %5675, %v1378_v9  }
 0x1c5   : > { %1427 = vperm.xlu0 %5676, %v1384_v11   ;;  %4989 = vmatprep.subr.mxu0 %v1542_v8 }
 0x1c6   : > { %4990 = vmatpush3.msra.mxu0 %v1542_v8  ;;  %v1538_v14 = vpop.permute.xlu0 %1537  ;;  %v1536_v16 = vpop.permute.xlu1 %1535 }
 0x1c7   : > { %4991 = vmatprep.subr.mxu0 %v1540_v12 }
 0x1c8   : > { %4992 = vmatpush3.msra.mxu0 %v1540_v12  ;;  %1430 = vperm.xlu1 %5675, %v1385_v13  }
 0x1c9   : > { %1433 = vperm.xlu0 %5676, %v1386_v15   ;;  %4993 = vmatprep.subr.mxu0 %v1538_v14 }
 0x1ca   : > { %4994 = vmatpush3.msra.mxu0 %v1538_v14  ;;  %v1534_v17 = vpop.permute.xlu0 %1533  ;;  %v1532_v18 = vpop.permute.xlu1 %1531 }
 0x1cb   : > { %4995 = vmatprep.subr.mxu0 %v1536_v16 }
 0x1cc   : > { %4996 = vmatpush3.msra.mxu0 %v1536_v16 }
 0x1cd   : > { %4997 = vmatprep.subr.mxu0 %v1534_v17 }
 0x1ce   : > { %4998 = vmatpush3.msra.mxu0 %v1534_v17  ;;  %v1530_v19 = vpop.permute.xlu0 %1529  ;;  %v1528_v20 = vpop.permute.xlu1 %1527 }
 0x1cf   : > { %4999 = vmatprep.subr.mxu0 %v1532_v18 }
 0x1d0   : > { %5000 = vmatpush3.msra.mxu0 %v1532_v18 }
 0x1d1   : > { %5001 = vmatprep.subr.mxu0 %v1530_v19 }
 0x1d2   : > { %5002 = vmatpush3.msra.mxu0 %v1530_v19  ;;  %v1526_v21 = vpop.permute.xlu0 %1525  ;;  %v1524_v22 = vpop.permute.xlu1 %1523 }
 0x1d3   : > { %5003 = vmatprep.subr.mxu0 %v1528_v20 }
 0x1d4   : > { %5004 = vmatpush3.msra.mxu0 %v1528_v20 }
 0x1d5   : > { %5005 = vmatprep.subr.mxu0 %v1526_v21 }
 0x1d6   : > { %5006 = vmatpush3.msra.mxu0 %v1526_v21  ;;  %v1522_v23 = vpop.permute.xlu0 %1521 }
 0x1d7   : > { %5007 = vmatprep.subr.mxu0 %v1524_v22 }
 0x1d8   : > { %5008 = vmatpush3.msra.mxu0 %v1524_v22 }
 0x1d9   : > { %5009 = vmatprep.subr.mxu0 %v1522_v23 }
 0x1da   : > { %5010 = vmatpush3.msra.mxu0 %v1522_v23 }
 0x1df   : > { %v1277_v26 = vpop.permute.xlu1 %1276 }
 0x1e0   : > { %vm1323_vm3 = vcmp.eq.s32.totalorder %v1277_v26, %v6364_v25 }
 0x1e1   : > { %5017 = vmatprep.mubr.msk.f32.mxu0 %vm1323_vm3, %v5760_v27 }
 0x1e3   : > { %v1280_v28 = vpop.permute.xlu0 %1279  ;;  %v1520_v29 = vpop.permute.xlu1 %1519 }
 0x1e4   : > { %5011 = vmatprep.subr.mxu0 %v1520_v29  ;;  %vm1324_vm6 = vcmp.eq.s32.totalorder %v1280_v28, %v6364_v25 }
 0x1e5   : > { %5012 = vmatpush3.msra.mxu0 %v1520_v29 }
 0x1e7   : > { %v1518_v30 = vpop.permute.xlu1 %1517  ;;  %v6368_v31 = vpop.permute.xlu0 %1164 }
 0x1e8   : > { %vm1211_vm4 = vcmp.eq.s32.totalorder %v6368_v31, %v6364_v25  ;;  %5013 = vmatprep.subr.mxu0 %v1518_v30 }
 0x1e9   : > { %5073 = vmatprep.mubr.msk.f32.mxu1 %vm1211_vm4, %v5760_v27  ;;  %5014 = vmatpush3.msra.mxu0 %v1518_v30 }
 0x1eb   : > { %v1283_v32 = vpop.permute.xlu1 %1282  ;;  %v6376_v33 = vpop.permute.xlu0 %1167 }
 0x1ec   : > { %vm1212_vm5 = vcmp.eq.s32.totalorder %v6376_v33, %v6364_v25  ;;  %vm1325_vm7 = vcmp.eq.s32.totalorder %v1283_v32, %v6364_v25 }
 0x1ed   : > { %5074 = vmatmul.mubr.msk.f32.vlgmr.msra.gmra.mxu1 %vm1212_vm5, %v5760_v27 }
 0x1ee   : > { %5596 = vmatpush3.msra.mxu1 %v6331_v43 }
 0x1ef   : > { %v1286_v35 = vpop.permute.xlu1 %1285  ;;  %v1516_v36 = vpop.permute.xlu0 %1515  ;;  %5581 = vmatprep.subr.mxu1 %v1867_v34 }
 0x1f0   : > { %5015 = vmatprep.subr.mxu0 %v1516_v36  ;;  %5597 = vmatpush3.msra.mxu1 %v1867_v34  ;;  %vm1326_vm9 = vcmp.eq.s32.totalorder %v1286_v35, %v6364_v25 }
 0x1f1   : > { %5016 = vmatpush3.msra.mxu0 %v1516_v36  ;;  %5582 = vmatprep.subr.mxu1 %v1866_v2 }
 0x1f2   : > { %5018 = vmatmul.mubr.msk.f32.vlgmr.msra.gmra.mxu0 %vm1324_vm6, %v5760_v27  ;;  %5097 = vmatprep.subr.mxu0 %v6331_v43 }
 0x1f3   : > { %v6389_v37 = vpop.permute.xlu1 %1170  ;;  %v1289_v38 = vpop.permute.xlu0 %1288  ;;  %5020 = vmatprep.mubr.msk.f32.mxu0 %vm1325_vm7, %v5760_v27  ;;  %5098 = vmatpush3.msra.mxu0 %v6331_v43  ;;  %v1863_v43 = vld [vmem:[#allocation4 + $0x50] sm:$0xff] }
 0x1f4   : > { %vm1213_vm8 = vcmp.eq.s32.totalorder %v6389_v37, %v6364_v25  ;;  %5099 = vmatprep.subr.mxu0 %v1867_v34  ;;  %5598 = vmatpush3.msra.mxu1 %v1866_v2  ;;  %vm1327_vm10 = vcmp.eq.s32.totalorder %v1289_v38, %v6364_v25 }
 0x1f5   : > { %5076 = vmatprep.mubr.msk.f32.mxu1 %vm1213_vm8, %v5760_v27  ;;  %5100 = vmatpush3.msra.mxu0 %v1867_v34 }
 0x1f6   : > { %5021 = vmatmul.mubr.msk.f32.gmra.mxu0 %vm1326_vm9, %v5760_v27  ;;  %5101 = vmatprep.subr.mxu0 %v1866_v2 }
 0x1f7   : > { %v6402_v40 = vpop.permute.xlu1 %1173  ;;  %v1292_v41 = vpop.permute.xlu0 %1291  ;;  %5023 = vmatprep.mubr.msk.f32.mxu0 %vm1327_vm10, %v5760_v27  ;;  %5102 = vmatpush3.msra.mxu0 %v1866_v2 }
 0x1f8   : > { %vm1214_vm11 = vcmp.eq.s32.totalorder %v6402_v40, %v6364_v25  ;;  %vm1328_vm12 = vcmp.eq.s32.totalorder %v1292_v41, %v6364_v25  ;;  %5103 = vmatprep.subr.mxu0 %v1865_v39  ;;  %5583 = vmatprep.subr.mxu1 %v1865_v39 }
 0x1f9   : > { %5077 = vmatmul.mubr.msk.f32.gmra.mxu1 %vm1214_vm11, %v5760_v27  ;;  %5104 = vmatpush3.msra.mxu0 %v1865_v39 }
 0x1fa   : > { %5024 = vmatmul.mubr.msk.f32.gmra.mxu0 %vm1328_vm12, %v5760_v27  ;;  %5105 = vmatprep.subr.mxu0 %v1864_v42 }
 0x1fb   : > { %v6413_v44 = vpop.permute.xlu1 %1176  ;;  %v1295_v45 = vpop.permute.xlu0 %1294  ;;  %5106 = vmatpush3.msra.mxu0 %v1864_v42  ;;  %5599 = vmatpush3.msra.mxu1 %v1865_v39 }
 0x1fc   : > { %vm1215_vm13 = vcmp.eq.s32.totalorder %v6413_v44, %v6364_v25  ;;  %vm1329_vm14 = vcmp.eq.s32.totalorder %v1295_v45, %v6364_v25  ;;  %5107 = vmatprep.subr.mxu0 %v1863_v43  ;;  %5584 = vmatprep.subr.mxu1 %v1864_v42 }
 0x1fd   : > { %5026 = vmatprep.mubr.msk.f32.mxu0 %vm1329_vm14, %v5760_v27  ;;  %5079 = vmatprep.mubr.msk.f32.mxu1 %vm1215_vm13, %v5760_v27 }
 0x1fe   : > { %5108 = vmatpush3.msra.mxu0 %v1863_v43  ;;  %5600 = vmatpush3.msra.mxu1 %v1864_v42 }
 0x1ff   : > { %v6423_v47 = vpop.permute.xlu1 %1179  ;;  %v1298_v48 = vpop.permute.xlu0 %1297  ;;  %5109 = vmatprep.subr.mxu0 %v1862_v46  ;;  %5585 = vmatprep.subr.mxu1 %v1863_v43 }
 0x200   : > { %vm1216_vm15 = vcmp.eq.s32.totalorder %v6423_v47, %v6364_v25  ;;  %vm1330_vm0 = vcmp.eq.s32.totalorder %v1298_v48, %v6364_v25  ;;  %5110 = vmatpush3.msra.mxu0 %v1862_v46  ;;  %5601 = vmatpush3.msra.mxu1 %v1863_v43 }
 0x201   : > { %5027 = vmatmul.mubr.msk.f32.gmra.mxu0 %vm1330_vm0, %v5760_v27  ;;  %5080 = vmatmul.mubr.msk.f32.gmra.mxu1 %vm1216_vm15, %v5760_v27 }
 0x202   : > { %5111 = vmatprep.subr.mxu0 %v1861_v49  ;;  %5586 = vmatprep.subr.mxu1 %v1862_v46 }
 0x203   : > { %v6433_v51 = vpop.permute.xlu1 %1182  ;;  %v1301_v52 = vpop.permute.xlu0 %1300  ;;  %5112 = vmatpush3.msra.mxu0 %v1861_v49  ;;  %5602 = vmatpush3.msra.mxu1 %v1862_v46 }
 0x204   : > { %vm7731_vm1 = vcmp.eq.s32.totalorder %v6433_v51, %v6364_v25  ;;  %vm1331_vm2 = vcmp.eq.s32.totalorder %v1301_v52, %v6364_v25  ;;  %5113 = vmatprep.subr.mxu0 %v1860_v50  ;;  %5587 = vmatprep.subr.mxu1 %v1861_v49 }
 0x205   : > { %5029 = vmatprep.mubr.msk.f32.mxu0 %vm1331_vm2, %v5760_v27  ;;  %5082 = vmatprep.mubr.msk.f32.mxu1 %vm7731_vm1, %v5760_v27 }
 0x206   : > { %5114 = vmatpush3.msra.mxu0 %v1860_v50  ;;  %5603 = vmatpush3.msra.mxu1 %v1861_v49 }
 0x207   : > { %v6443_v54 = vpop.permute.xlu1 %1185  ;;  %v1304_v55 = vpop.permute.xlu0 %1303  ;;  %5115 = vmatprep.subr.mxu0 %v1859_v53  ;;  %5588 = vmatprep.subr.mxu1 %v1860_v50 }
 0x208   : > { %vm1218_vm3 = vcmp.eq.s32.totalorder %v6443_v54, %v6364_v25  ;;  %vm1332_vm6 = vcmp.eq.s32.totalorder %v1304_v55, %v6364_v25  ;;  %5116 = vmatpush3.msra.mxu0 %v1859_v53  ;;  %5604 = vmatpush3.msra.mxu1 %v1860_v50 }
 0x209   : > { %5030 = vmatmul.mubr.msk.f32.gmra.mxu0 %vm1332_vm6, %v5760_v27  ;;  %5083 = vmatmul.mubr.msk.f32.gmra.mxu1 %vm1218_vm3, %v5760_v27 }
 0x20a   : > { %5117 = vmatprep.subr.mxu0 %v1858_v56  ;;  %5589 = vmatprep.subr.mxu1 %v1859_v53 }
 0x20b   : > { %v6453_v58 = vpop.permute.xlu1 %1188  ;;  %v1307_v59 = vpop.permute.xlu0 %1306  ;;  %5118 = vmatpush3.msra.mxu0 %v1858_v56  ;;  %5605 = vmatpush3.msra.mxu1 %v1859_v53 }
 0x20c   : > { %vm1219_vm7 = vcmp.eq.s32.totalorder %v6453_v58, %v6364_v25  ;;  %vm1333_vm9 = vcmp.eq.s32.totalorder %v1307_v59, %v6364_v25  ;;  %5119 = vmatprep.subr.mxu0 %v1857_v57  ;;  %5590 = vmatprep.subr.mxu1 %v1858_v56 }
 0x20d   : > { %5032 = vmatprep.mubr.msk.f32.mxu0 %vm1333_vm9, %v5760_v27  ;;  %5085 = vmatprep.mubr.msk.f32.mxu1 %vm1219_vm7, %v5760_v27 }
 0x20e   : > { %5120 = vmatpush3.msra.mxu0 %v1857_v57  ;;  %5606 = vmatpush3.msra.mxu1 %v1858_v56 }
 0x20f   : > { %v6463_v61 = vpop.permute.xlu1 %1191  ;;  %v1310_v62 = vpop.permute.xlu0 %1309  ;;  %5121 = vmatprep.subr.mxu0 %v1856_v60  ;;  %5591 = vmatprep.subr.mxu1 %v1857_v57 }
 0x210   : > { %vm1220_vm10 = vcmp.eq.s32.totalorder %v6463_v61, %v6364_v25  ;;  %vm1334_vm12 = vcmp.eq.s32.totalorder %v1310_v62, %v6364_v25  ;;  %5122 = vmatpush3.msra.mxu0 %v1856_v60  ;;  %5607 = vmatpush3.msra.mxu1 %v1857_v57 }
 0x211   : > { %5033 = vmatmul.mubr.msk.f32.gmra.mxu0 %vm1334_vm12, %v5760_v27  ;;  %5086 = vmatmul.mubr.msk.f32.gmra.mxu1 %vm1220_vm10, %v5760_v27 }
 0x212   : > { %5123 = vmatprep.subr.mxu0 %v1855_v63  ;;  %5592 = vmatprep.subr.mxu1 %v1856_v60 }
 0x213   : > { %v6473_v1 = vpop.permute.xlu1 %1194  ;;  %v1313_v3 = vpop.permute.xlu0 %1312  ;;  %5124 = vmatpush3.msra.mxu0 %v1855_v63  ;;  %5608 = vmatpush3.msra.mxu1 %v1856_v60 }
 0x214   : > { %vm7730_vm14 = vcmp.eq.s32.totalorder %v6473_v1, %v6364_v25  ;;  %vm1335_vm0 = vcmp.eq.s32.totalorder %v1313_v3, %v6364_v25  ;;  %5125 = vmatprep.subr.mxu0 %v1854_v0  ;;  %5593 = vmatprep.subr.mxu1 %v1855_v63 }
 0x215   : > { %5035 = vmatprep.mubr.msk.f32.mxu0 %vm1335_vm0, %v5760_v27  ;;  %5088 = vmatprep.mubr.msk.f32.mxu1 %vm7730_vm14, %v5760_v27 }
 0x216   : > { %5126 = vmatpush3.msra.mxu0 %v1854_v0  ;;  %5609 = vmatpush3.msra.mxu1 %v1855_v63 }
 0x217   : > { %v6483_v5 = vpop.permute.xlu1 %1197  ;;  %v1316_v6 = vpop.permute.xlu0 %1315  ;;  %5127 = vmatprep.subr.mxu0 %v1853_v4  ;;  %5594 = vmatprep.subr.mxu1 %v1854_v0 }
 0x218   : > { %vm1222_vm2 = vcmp.eq.s32.totalorder %v6483_v5, %v6364_v25  ;;  %vm1336_vm6 = vcmp.eq.s32.totalorder %v1316_v6, %v6364_v25  ;;  %5128 = vmatpush3.msra.mxu0 %v1853_v4  ;;  %5610 = vmatpush3.msra.mxu1 %v1854_v0 }
 0x219   : > { %5036 = vmatmul.mubr.msk.f32.gmra.mxu0 %vm1336_vm6, %v5760_v27  ;;  %5089 = vmatmul.mubr.msk.f32.gmra.mxu1 %vm1222_vm2, %v5760_v27 }
 0x21a   : > { %5595 = vmatprep.subr.mxu1 %v1853_v4 }
 0x21b   : > { %v6493_v7 = vpop.permute.xlu1 %1200  ;;  %v1319_v8 = vpop.permute.xlu0 %1318  ;;  %5611 = vmatpush3.msra.mxu1 %v1853_v4 }
 0x21c   : > { %vm7727_vm9 = vcmp.eq.s32.totalorder %v6493_v7, %v6364_v25  ;;  %vm1337_vm12 = vcmp.eq.s32.totalorder %v1319_v8, %v6364_v25 }
 0x21d   : > { %5038 = vmatprep.mubr.msk.f32.mxu0 %vm1337_vm12, %v5760_v27  ;;  %5091 = vmatprep.mubr.msk.f32.mxu1 %vm7727_vm9, %v5760_v27 }
 0x21f   : > { %v6503_v9 = vpop.permute.xlu1 %1203  ;;  %v1322_v10 = vpop.permute.xlu0 %1321 }
 0x220   : > { %vm7728_vm0 = vcmp.eq.s32.totalorder %v6503_v9, %v6364_v25  ;;  %vm1338_vm6 = vcmp.eq.s32.totalorder %v1322_v10, %v6364_v25 }
 0x221   : > { %5039 = vmatmul.mubr.msk.f32.gmra.mxu0 %vm1338_vm6, %v5760_v27  ;;  %5092 = vmatmul.mubr.msk.f32.gmra.mxu1 %vm7728_vm0, %v5760_v27 }
 0x223   : > { %v6513_v11 = vpop.permute.xlu1 %1206  ;;  %v1389_v12 = vpop.permute.xlu0 %1388 }
 0x224   : > { %vm7729_vm12 = vcmp.eq.s32.totalorder %v6513_v11, %v6364_v25  ;;  %vm1435_vm9 = vcmp.eq.s32.totalorder %v1389_v12, %v6364_v25 }
 0x225   : > { %5094 = vmatprep.mubr.msk.f32.mxu1 %vm7729_vm12, %v5760_v27  ;;  %5129 = vmatprep.mubr.msk.f32.mxu0 %vm1435_vm9, %v5760_v27 }
 0x227   : > { %v6523_v13 = vpop.permute.xlu1 %1209  ;;  %v1392_v14 = vpop.permute.xlu0 %1391 }
 0x228   : > { %vm7732_vm6 = vcmp.eq.s32.totalorder %v6523_v13, %v6364_v25  ;;  %vm1436_vm0 = vcmp.eq.s32.totalorder %v1392_v14, %v6364_v25 }
 0x229   : > { %5095 = vmatmul.mubr.msk.f32.gmra.mxu1 %vm7732_vm6, %v5760_v27  ;;  %5130 = vmatmul.mubr.msk.f32.vlgmr.msra.gmra.mxu0 %vm1436_vm0, %v5760_v27 }
 0x22b   : > { %v1395_v15 = vpop.permute.xlu1 %1394  ;;  %v1413_v16 = vpop.permute.xlu0 %1412 }
 0x22c   : > { %vm1437_vm12 = vcmp.eq.s32.totalorder %v1395_v15, %v6364_v25  ;;  %vm1443_vm9 = vcmp.eq.s32.totalorder %v1413_v16, %v6364_v25 }
 0x22d   : > { %5132 = vmatprep.mubr.msk.f32.mxu0 %vm1437_vm12, %v5760_v27  ;;  %5141 = vmatprep.mubr.msk.f32.mxu1 %vm1443_vm9, %v5760_v27 }
 0x22f   : > { %v1398_v17 = vpop.permute.xlu1 %1397  ;;  %v1416_v18 = vpop.permute.xlu0 %1415 }
 0x230   : > { %vm1438_vm14 = vcmp.eq.s32.totalorder %v1398_v17, %v6364_v25  ;;  %vm1444_vm1 = vcmp.eq.s32.totalorder %v1416_v18, %v6364_v25 }
 0x231   : > { %5133 = vmatmul.mubr.msk.f32.gmra.mxu0 %vm1438_vm14, %v5760_v27  ;;  %5142 = vmatmul.mubr.msk.f32.vlgmr.msra.gmra.mxu1 %vm1444_vm1, %v5760_v27 }
 0x233   : > { %v1401_v19 = vpop.permute.xlu1 %1400  ;;  %v1419_v20 = vpop.permute.xlu0 %1418 }
 0x234   : > { %vm1439_vm0 = vcmp.eq.s32.totalorder %v1401_v19, %v6364_v25  ;;  %vm1445_vm6 = vcmp.eq.s32.totalorder %v1419_v20, %v6364_v25 }
 0x235   : > { %5135 = vmatprep.mubr.msk.f32.mxu0 %vm1439_vm0, %v5760_v27  ;;  %5144 = vmatprep.mubr.msk.f32.mxu1 %vm1445_vm6, %v5760_v27 }
 0x237   : > { %v1404_v21 = vpop.permute.xlu1 %1403  ;;  %v1422_v22 = vpop.permute.xlu0 %1421 }
 0x238   : > { %vm1440_vm12 = vcmp.eq.s32.totalorder %v1404_v21, %v6364_v25  ;;  %vm1446_vm9 = vcmp.eq.s32.totalorder %v1422_v22, %v6364_v25 }
 0x239   : > { %5136 = vmatmul.mubr.msk.f32.gmra.mxu0 %vm1440_vm12, %v5760_v27  ;;  %5145 = vmatmul.mubr.msk.f32.gmra.mxu1 %vm1446_vm9, %v5760_v27 }
 0x23b   : > { %v1407_v23 = vpop.permute.xlu1 %1406 }
 0x23c   : > { %vm1441_vm1 = vcmp.eq.s32.totalorder %v1407_v23, %v6364_v25  ;;  %v1425_v24 = vpop.permute.xlu0 %1424 }
 0x23d   : > { %vm1447_vm14 = vcmp.eq.s32.totalorder %v1425_v24, %v6364_v25  ;;  %5138 = vmatprep.mubr.msk.f32.mxu0 %vm1441_vm1, %v5760_v27 }
 0x23e   : > { %5147 = vmatprep.mubr.msk.f32.mxu1 %vm1447_vm14, %v5760_v27 }
 0x23f   : > { %v1410_v26 = vpop.permute.xlu1 %1409 }
 0x240   : > { %vm1442_vm6 = vcmp.eq.s32.totalorder %v1410_v26, %v6364_v25  ;;  %v1428_v28 = vpop.permute.xlu0 %1427 }
 0x241   : > { %vm1448_vm0 = vcmp.eq.s32.totalorder %v1428_v28, %v6364_v25  ;;  %5139 = vmatmul.mubr.msk.f32.gmra.mxu0 %vm1442_vm6, %v5760_v27 }
 0x242   : > { %5148 = vmatmul.mubr.msk.f32.gmra.mxu1 %vm1448_vm0, %v5760_v27 }
 0x243   : > { %v1431_v29 = vpop.permute.xlu1 %1430 }
 0x244   : > { %vm1449_vm12 = vcmp.eq.s32.totalorder %v1431_v29, %v6364_v25  ;;  %v1434_v30 = vpop.permute.xlu0 %1433 }
 0x245   : > { %vm1450_vm9 = vcmp.eq.s32.totalorder %v1434_v30, %v6364_v25  ;;  %5150 = vmatprep.mubr.msk.f32.mxu1 %vm1449_vm12, %v5760_v27 }
 0x246   : > { %5151 = vmatmul.mubr.msk.f32.gmra.mxu1 %vm1450_vm9, %v5760_v27 }
 0x2ad   : > { %v5075_v32 = vpop.f32.mrf.mxu1 }
 0x2af   : > { %v6561_v35 = vpop.f32.mrf.mxu1 }
 0x2b2   : > { %v5019_v34 = vpop.f32.mrf.mxu0 }
 0x2b4   : > { %v6565_v2 = vpop.f32.mrf.mxu0 }
 0x2b6   : > { %v6569_v39 = vpop.f32.mrf.mxu0 }
 0x2b8   : > { %v6573_v42 = vpop.f32.mrf.mxu0 }
 0x2b9   : > { %v6563_v36 = vpop.f32.mrf.mxu1 }
 0x2ba   : > { %v6579_v27 = vpop.f32.mrf.mxu0 }
 0x2bb   : > { %v6567_v38 = vpop.f32.mrf.mxu1 }
 0x2bc   : > { %v6583_v48 = vpop.f32.mrf.mxu0 }
 0x2c1   : > { %v6571_v41 = vpop.f32.mrf.mxu1  ;;  %v6585_v50 = vpop.f32.mrf.mxu0 }
 0x2c3   : > { %v6575_v43 = vpop.f32.mrf.mxu1  ;;  %v6587_v53 = vpop.f32.mrf.mxu0 }
 0x2c9   : > { %v6577_v45 = vpop.f32.mrf.mxu1  ;;  %v5031_v56 = vpop.f32.mrf.mxu0 }
 0x2cb   : > { %v6581_v46 = vpop.f32.mrf.mxu1  ;;  %v1669_v59 = vpop.f32.mrf.mxu0 }
 0x2d1   : > { %v5087_v49 = vpop.f32.mrf.mxu1  ;;  %v5034_v62 = vpop.f32.mrf.mxu0 }
 0x2d2   : > { %v1820_v8 = vadd.f32 %v5087_v49, %v5031_v56 }
 0x2d3   : > { %v1814_v52 = vpop.f32.mrf.mxu1  ;;  %v1679_v0 = vpop.f32.mrf.mxu0 }
 0x2d4   : > { %v1815_v14 = vadd.f32 %v1814_v52, %v1669_v59 }
 0x2d9   : > { %v5090_v55 = vpop.f32.mrf.mxu1  ;;  %v5037_v4 = vpop.f32.mrf.mxu0 }
 0x2da   : > { %v1830_v23 = vadd.f32 %v5090_v55, %v5034_v62 }
 0x2db   : > { %v1824_v57 = vpop.f32.mrf.mxu1  ;;  %v1689_v10 = vpop.f32.mrf.mxu0 }
 0x2dc   : > { %v1825_v29 = vadd.f32 %v1824_v57, %v1679_v0  ;;  %v1775_v57 = vadd.f32 %v6561_v35, %v6565_v2 }
 0x2e1   : > { %v5093_v60 = vpop.f32.mrf.mxu1  ;;  %v6593_v15 = vpop.f32.mrf.mxu0 }
 0x2e3   : > { %v1834_v63 = vpop.f32.mrf.mxu1  ;;  %v6595_v20 = vpop.f32.mrf.mxu0 }
 0x2e4   : > { %v1835_v0 = vadd.f32 %v1834_v63, %v1689_v10 }
 0x2e9   : > { %v6589_v3 = vpop.f32.mrf.mxu1  ;;  %v5131_v24 = vpop.f32.mrf.mxu0 }
 0x2eb   : > { %v6591_v6 = vpop.f32.mrf.mxu1  ;;  %v1935_v52 = vpop.f32.mrf.mxu0 }
 0x2f1   : > { %v5143_v12 = vpop.f32.mrf.mxu1 }
 0x2f2   : > { %v2023_v16 = vadd.f32 %v5143_v12, %v1820_v8  ;;  %v5134_v8 = vpop.f32.mrf.mxu0 }
 0x2f3   : > { %v1975_v17 = vpop.f32.mrf.mxu1 }
 0x2f4   : > { %v2055_v18 = vmul.f32 0.01, %v2023_v16  ;;  %v2022_v19 = vadd.f32 %v1975_v17, %v1815_v14  ;;  %vm2039_vm1 = vcmp.gt.f32.partialorder %v2023_v16, 0.0  ;;  %v1945_v62 = vpop.f32.mrf.mxu0 }
 0x2f6   : > { %v2054_v21 = vmul.f32 0.01, %v2022_v19  ;;  %v2071_v22 = vsel %vm2039_vm1, %v2023_v16, %v2055_v18  ;;  %vm2038_vm14 = vcmp.gt.f32.partialorder %v2022_v19, 0.0  ;;  %v1780_v16 = vadd.f32 %v5075_v32, %v5019_v34 }
 0x2f7   : > { %2125 = vperm.xlu0 %5676, %v2071_v22   ;;  %v1840_v18 = vadd.f32 %v5093_v60, %v5037_v4  ;;  %v1790_v22 = vadd.f32 %v6563_v36, %v6569_v39  ;;  %v1785_v32 = vadd.f32 %v6567_v38, %v6573_v42  ;;  %v1800_v36 = vadd.f32 %v6571_v41, %v6579_v27 }
 0x2f8   : > { %v2070_v26 = vsel %vm2038_vm14, %v2022_v19, %v2054_v21  ;;  %v2015_v55 = vadd.f32 %v5131_v24, %v1780_v16  ;;  %v1795_v38 = vadd.f32 %v6575_v43, %v6583_v48 }
 0x2f9   : > { %v5146_v28 = vpop.f32.mrf.mxu1  ;;  %2120 = vperm.xlu1 %5675, %v2070_v26   ;;  %v2017_v60 = vadd.f32 %v5134_v8, %v1790_v22  ;;  %v2016_v39 = vadd.f32 %v1945_v62, %v1785_v32  ;;  %v1845_v62 = vadd.f32 %v6591_v6, %v6595_v20 }
 0x2fa   : > { %v2025_v30 = vadd.f32 %v5146_v28, %v1830_v23  ;;  %v5137_v23 = vpop.f32.mrf.mxu0  ;;  %v2014_v28 = vadd.f32 %v1935_v52, %v1775_v57  ;;  %v2047_v34 = vmul.f32 0.01, %v2015_v55  ;;  %vm2031_vm1 = vcmp.gt.f32.partialorder %v2015_v55, 0.0 }
 0x2fb   : > { %v1985_v49 = vpop.f32.mrf.mxu1  ;;  %v2049_v42 = vmul.f32 0.01, %v2017_v60 }
 0x2fc   : > { %v2057_v56 = vmul.f32 0.01, %v2025_v30  ;;  %v2024_v59 = vadd.f32 %v1985_v49, %v1825_v29  ;;  %vm2041_vm6 = vcmp.gt.f32.partialorder %v2025_v30, 0.0  ;;  %v1955_v35 = vpop.f32.mrf.mxu0  ;;  %v2046_v2 = vmul.f32 0.01, %v2014_v28 }
 0x2fd   : > { %vm2030_vm14 = vcmp.gt.f32.partialorder %v2014_v28, 0.0  ;;  %v2019_v49 = vadd.f32 %v5137_v23, %v1800_v36  ;;  %v2063_v52 = vsel %vm2031_vm1, %v2015_v55, %v2047_v34  ;;  %v2018_v8 = vadd.f32 %v1955_v35, %v1795_v38 }
 0x2fe   : > { %v2056_v12 = vmul.f32 0.01, %v2024_v59  ;;  %v2073_v14 = vsel %vm2041_vm6, %v2025_v30, %v2057_v56  ;;  %vm2040_vm0 = vcmp.gt.f32.partialorder %v2024_v59, 0.0  ;;  %vm2033_vm6 = vcmp.gt.f32.partialorder %v2017_v60, 0.0 }
 0x2ff   : > { %2135 = vperm.xlu0 %5676, %v2073_v14   ;;  %v1810_v56 = vadd.f32 %v6577_v45, %v6585_v50  ;;  %v2062_v41 = vsel %vm2030_vm14, %v2014_v28, %v2046_v2  ;;  %v1805_v14 = vadd.f32 %v6581_v46, %v6587_v53  ;;  %v2051_v16 = vmul.f32 0.01, %v2019_v49 }
 0x300   : > { %v2072_v17 = vsel %vm2040_vm0, %v2024_v59, %v2056_v12  ;;  %v2048_v59 = vmul.f32 0.01, %v2016_v39  ;;  %vm2032_vm0 = vcmp.gt.f32.partialorder %v2016_v39, 0.0  ;;  %v2065_v48 = vsel %vm2033_vm6, %v2017_v60, %v2049_v42 }
 0x301   : > { %2130 = vperm.xlu1 %5675, %v2072_v17   ;;  %v5140_v10 = vpop.f32.mrf.mxu0  ;;  %v1850_v17 = vadd.f32 %v6589_v3, %v6593_v15 }
 0x302   : > { %v5149_v19 = vpop.f32.mrf.mxu1  ;;  %v2021_v43 = vadd.f32 %v5140_v10, %v1810_v56  ;;  %v2064_v50 = vsel %vm2032_vm0, %v2016_v39, %v2048_v59 }
 0x303   : > { %v2027_v21 = vadd.f32 %v5149_v19, %v1840_v18  ;;  %v1965_v27 = vpop.f32.mrf.mxu0  ;;  %v2050_v18 = vmul.f32 0.01, %v2018_v8 }
 0x304   : > { %v1995_v26 = vpop.f32.mrf.mxu1  ;;  %v2020_v45 = vadd.f32 %v1965_v27, %v1805_v14  ;;  %v2053_v19 = vmul.f32 0.01, %v2021_v43  ;;  %vm2037_vm1 = vcmp.gt.f32.partialorder %v2021_v43, 0.0 }
 0x305   : > { %v2059_v29 = vmul.f32 0.01, %v2027_v21  ;;  %v2026_v30 = vadd.f32 %v1995_v26, %v1835_v0  ;;  %vm2043_vm12 = vcmp.gt.f32.partialorder %v2027_v21, 0.0 }
 0x306   : > { %v5152_v12 = vpop.f32.mrf.mxu1  ;;  %v2052_v53 = vmul.f32 0.01, %v2020_v45  ;;  %vm2036_vm14 = vcmp.gt.f32.partialorder %v2020_v45, 0.0  ;;  %v2069_v15 = vsel %vm2037_vm1, %v2021_v43, %v2053_v19 }
 0x307   : > { %v2058_v4 = vmul.f32 0.01, %v2026_v30  ;;  %v2075_v24 = vsel %vm2043_vm12, %v2027_v21, %v2059_v29  ;;  %vm2042_vm9 = vcmp.gt.f32.partialorder %v2026_v30, 0.0  ;;  %vm2035_vm12 = vcmp.gt.f32.partialorder %v2019_v49, 0.0 }
 0x308   : > { %2145 = vperm.xlu0 %5676, %v2075_v24   ;;  %v2005_v55 = vpop.f32.mrf.mxu1  ;;  %v2029_v57 = vadd.f32 %v5152_v12, %v1850_v17  ;;  %v2067_v46 = vsel %vm2035_vm12, %v2019_v49, %v2051_v16  ;;  %v2068_v23 = vsel %vm2036_vm14, %v2020_v45, %v2052_v53  ;;  %v2195_v53 = vld [vmem:[#allocation6] sm:$0x1] }
 0x309   : > { %v2074_v63 = vsel %vm2042_vm9, %v2026_v30, %v2058_v4  ;;  %vm2034_vm9 = vcmp.gt.f32.partialorder %v2018_v8, 0.0  ;;  %v2028_v0 = vadd.f32 %v2005_v55, %v1845_v62 }
 0x30a   : > { %2140 = vperm.xlu1 %5675, %v2074_v63   ;;  %v2066_v21 = vsel %vm2034_vm9, %v2018_v8, %v2050_v18  ;;  %v2061_v3 = vmul.f32 0.01, %v2029_v57  ;;  %vm2045_vm6 = vcmp.gt.f32.partialorder %v2029_v57, 0.0 }
 0x30b   : > { %v2060_v22 = vmul.f32 0.01, %v2028_v0  ;;  %vm2044_vm0 = vcmp.gt.f32.partialorder %v2028_v0, 0.0 }
 0x30c   : > { %2085 = vperm.xlu0 %5676, %v2063_v52   ;;  %v2077_v26 = vsel %vm2045_vm6, %v2029_v57, %v2061_v3 }
 0x30d   : > { %v2076_v6 = vsel %vm2044_vm0, %v2028_v0, %v2060_v22 }
 0x30e   : > { %2080 = vperm.xlu1 %5675, %v2062_v41  }
 0x310   : > { %2095 = vperm.xlu0 %5676, %v2065_v48  }
 0x312   : > { %2090 = vperm.xlu1 %5675, %v2064_v50  }
 0x314   : > { %2105 = vperm.xlu0 %5676, %v2067_v46  }
 0x316   : > { %2100 = vperm.xlu1 %5675, %v2066_v21  }
 0x318   : > { %2115 = vperm.xlu0 %5676, %v2069_v15  }
 0x31a   : > { %2110 = vperm.xlu1 %5675, %v2068_v23  }
 0x31c   : > { %2155 = vperm.xlu0 %5676, %v2077_v26  }
 0x31e   : > { %2150 = vperm.xlu1 %5675, %v2076_v6  }
 0x372   : > { %v2126_v20 = vpop.permute.xlu0 %2125 }
 0x373   : > { %v2167_v44 = vsel %vm1220_vm10, %v2126_v20, -1e+30 }
 0x374   : > { %v2121_v28 = vpop.permute.xlu1 %2120 }
 0x375   : > { %v2166_v47 = vsel %vm1219_vm7, %v2121_v28, -1e+30 }
 0x37a   : > { %v2136_v29 = vpop.permute.xlu0 %2135 }
 0x37b   : > { %v2169_v58 = vsel %vm1222_vm2, %v2136_v29, -1e+30 }
 0x37c   : > { %v2131_v30 = vpop.permute.xlu1 %2130 }
 0x383   : > { %v2146_v32 = vpop.permute.xlu0 %2145 }
 0x385   : > { %v2141_v34 = vpop.permute.xlu1 %2140 }
 0x387   : > { %v2086_v60 = vpop.permute.xlu0 %2085 }
 0x388   : > { %v2159_v63 = vsel %vm1212_vm5, %v2086_v60, -1e+30  ;;  %vm7758_vm5 = vcmp.eq.s32.totalorder %v6473_v1, %v6364_v25 }
 0x389   : > { %v2081_v4 = vpop.permute.xlu1 %2080  ;;  %v2168_v14 = vsel %vm7758_vm5, %v2131_v30, -1e+30 }
 0x38a   : > { %v2158_v10 = vsel %vm1211_vm4, %v2081_v4, -1e+30  ;;  %vm7757_vm4 = vcmp.eq.s32.totalorder %v6433_v51, %v6364_v25 }
 0x38b   : > { %v2096_v24 = vpop.permute.xlu0 %2095 }
 0x38c   : > { %v2161_v33 = vsel %vm1214_vm11, %v2096_v24, -1e+30  ;;  %vm7759_vm11 = vcmp.eq.s32.totalorder %v6493_v7, %v6364_v25 }
 0x38d   : > { %v2091_v35 = vpop.permute.xlu1 %2090  ;;  %v2170_v5 = vsel %vm7759_vm11, %v2141_v34, -1e+30 }
 0x38e   : > { %v2160_v40 = vsel %vm1213_vm8, %v2091_v35, -1e+30  ;;  %vm7761_vm8 = vcmp.eq.s32.totalorder %v6503_v9, %v6364_v25 }
 0x38f   : > { %v2106_v36 = vpop.permute.xlu0 %2105  ;;  %v2171_v48 = vsel %vm7761_vm8, %v2146_v32, -1e+30 }
 0x390   : > { %v2163_v2 = vsel %vm1216_vm15, %v2106_v36, -1e+30  ;;  %vm7762_vm15 = vcmp.eq.s32.totalorder %v6513_v11, %v6364_v25 }
 0x391   : > { %v2101_v39 = vpop.permute.xlu1 %2100  ;;  %v2175_v42 = vmax.f32 %v2159_v63, %v2163_v2 }
 0x392   : > { %v2162_v38 = vsel %vm1215_vm13, %v2101_v39, -1e+30  ;;  %vm7760_vm13 = vcmp.eq.s32.totalorder %v6523_v13, %v6364_v25 }
 0x393   : > { %v2174_v49 = vmax.f32 %v2158_v10, %v2162_v38  ;;  %v2116_v52 = vpop.permute.xlu0 %2115  ;;  %v2179_v41 = vmax.f32 %v2175_v42, %v2167_v44 }
 0x394   : > { %v2165_v31 = vsel %vm1218_vm3, %v2116_v52, -1e+30 }
 0x395   : > { %v2178_v56 = vmax.f32 %v2174_v49, %v2166_v47  ;;  %v2177_v59 = vmax.f32 %v2161_v33, %v2165_v31  ;;  %v2111_v8 = vpop.permute.xlu1 %2110  ;;  %v2183_v17 = vmax.f32 %v2179_v41, %v2171_v48 }
 0x396   : > { %v2164_v54 = vsel %vm7757_vm4, %v2111_v8, -1e+30 }
 0x397   : > { %v2176_v27 = vmax.f32 %v2160_v40, %v2164_v54  ;;  %v2181_v12 = vmax.f32 %v2177_v59, %v2169_v58  ;;  %v2156_v61 = vpop.permute.xlu0 %2155  ;;  %v2182_v16 = vmax.f32 %v2178_v56, %v2170_v5 }
 0x398   : > { %v2173_v37 = vsel %vm7760_vm13, %v2156_v61, -1e+30 }
 0x399   : > { %v2180_v43 = vmax.f32 %v2176_v27, %v2168_v14  ;;  %v2151_v51 = vpop.permute.xlu1 %2150  ;;  %v2185_v18 = vmax.f32 %v2181_v12, %v2173_v37  ;;  %v2186_v7 = vmax.f32 %v2182_v16, %v2183_v17 }
 0x39a   : > { %v2172_v1 = vsel %vm7762_vm15, %v2151_v51, -1e+30 }
 0x39b   : > { %v2184_v45 = vmax.f32 %v2180_v43, %v2172_v1 }
 0x39d   : > { %v2187_v50 = vmax.f32 %v2184_v45, %v2185_v18 }
 0x39f   : > { %v2188_v55 = vmax.f32 %v2186_v7, %v2187_v50 }
 0x3a1   : > { %v2189_v62 = vrot.slane %v2188_v55, 4 }
 0x3a3   : > { %v2190_v13 = vmax.f32 %v2188_v55, %v2189_v62 }
 0x3a5   : > { %v2191_v19 = vrot.slane %v2190_v13, 2 }
 0x3a7   : > { %v2192_v57 = vmax.f32 %v2190_v13, %v2191_v19 }
 0x3a9   : > { %v2193_v46 = vrot.slane %v2192_v57, 1 }
 0x3ab   : > { %v2194_v0 = vmax.f32 %v2192_v57, %v2193_v46 }
 0x3ad   : > { %v2196_v21 = vmax.f32 %v2195_v53, %v2194_v0 }
 0x3af   : > { %2197 = vst [vmem:[#allocation6] sm:$0x1] %v2196_v21 }
 0x3b0 PF: > { %s7763_s27 = sld [smem:[#allocation10_spill]] }
 0x3b6   : > { %p4092_p11 = scmp.ne.s32.totalorder %s7763_s27, 1 }
 0x3b8   : > { %2201 = sbr.rel (%p4092_p11) target bundleno = 1439 (0x59f), region = 88 }
 0x3bd   : > { %v2202_v25 = vlaneseq  ;;  %v5761_v9 = vmov 0.0   ;;  %vm7733_vm3 = vmmov 0   ;;  %v2686_v3 = vld [vmem:[%s5904_s17 + $0x78] sm:$0xff]  ;;  %v6675_v15 = vld [vmem:[%s5894_s28] ss:$0 sm:$0xff]  ;;  %v5763_v23 = vmov 0  }
 0x3be   : > { %5153 = vmatprep.subr.mxu0 %v5761_v9  ;;  %5188 = vmatprep.subr.mxu1 %v5761_v9  ;;  %v6678_v22 = vld [vmem:[%s5889_s25] ss:$0 sm:$0xff]  ;;  %v2684_v26 = vld [vmem:[%s5904_s17 + $0x68] sm:$0xff]  ;;  %v5764_v30 = vmov 1.0   ;;  %v2379_v42 = vld [vmem:[#allocation3 + $0x1] sm:$0x1] }
 0x3bf   : > { %v6667_v11 = vshrl.u32 %v2202_v25, 7  ;;  %5185 = vmatprep.mubr.msk.f32.mxu0 %vm7733_vm3, %v5761_v9  ;;  %5220 = vmatprep.mubr.msk.f32.mxu1 %vm7733_vm3, %v5761_v9  ;;  %v6883_v38 = vld [vmem:[%s5899_s16] ss:$0 sm:$0xff]  ;;  %v2520_v52 = vld [vmem:[#allocation5] sm:$0x1]  ;;  %v2685_v47 = vld [vmem:[%s5904_s17 + $0x70] sm:$0xff] }
 0x3c0   : > { %5677 = vset.pattern.permute.xlu0 %v5763_v23  ;;  %5678 = vset.pattern.permute.xlu1 %v5763_v23  ;;  %v2378_v49 = vld [vmem:[#allocation3] sm:$0x1]  ;;  %v2595_v33 = vld [vmem:[#allocation6] sm:$0x1]  ;;  %v2682_v44 = vld [vmem:[%s5904_s17 + $0x58] sm:$0xff]  ;;  %v7069_v5 = vand.u32 127, %v2202_v25 }
 0x3c1   : > { %v6682_v6 = vadd.s32 120, %v6667_v11  ;;  %v6685_v20 = vadd.s32 112, %v6667_v11  ;;  %v6688_v28 = vadd.s32 104, %v6667_v11  ;;  %2733 = vperm.xlu0 %5677, %v2686_v3   ;;  %2727 = vperm.xlu1 %5678, %v2684_v26   ;;  %v6691_v29 = vadd.s32 96, %v6667_v11  ;;  %v2683_v31 = vld [vmem:[%s5904_s17 + $0x60] sm:$0xff]  ;;  %v2681_v56 = vld [vmem:[%s5904_s17 + $0x50] sm:$0xff] }
 0x3c2   : > { %v6713_v32 = vadd.s32 88, %v6667_v11  ;;  %v6727_v34 = vadd.s32 80, %v6667_v11  ;;  %v6741_v60 = vadd.s32 72, %v6667_v11  ;;  %v6755_v4 = vadd.s32 64, %v6667_v11  ;;  %v2680_v59 = vld [vmem:[%s5904_s17 + $0x48] sm:$0xff]  ;;  %v2679_v8 = vld [vmem:[%s5904_s17 + $0x40] sm:$0xff] }
 0x3c3   : > { %vm2292_vm7 = vcmp.eq.s32.totalorder %v6682_v6, %v6675_v15  ;;  %vm2239_vm10 = vcmp.eq.s32.totalorder %v6682_v6, %v6678_v22  ;;  %vm2291_vm2 = vcmp.eq.s32.totalorder %v6685_v20, %v6675_v15  ;;  %vm2238_vm12 = vcmp.eq.s32.totalorder %v6685_v20, %v6678_v22  ;;  %v2678_v58 = vld [vmem:[%s5904_s17 + $0x38] sm:$0xff]  ;;  %v2677_v40 = vld [vmem:[%s5904_s17 + $0x30] sm:$0xff]  ;;  %v2676_v54 = vld [vmem:[%s5904_s17 + $0x28] sm:$0xff] }
 0x3c4   : > { %5154 = vmatpush3.msk.msra.mxu0 %vm2292_vm7, %v5764_v30  ;;  %5189 = vmatpush3.msk.msra.mxu1 %vm2239_vm10, %v5764_v30  ;;  %vm2290_vm9 = vcmp.eq.s32.totalorder %v6688_v28, %v6675_v15  ;;  %vm2237_vm1 = vcmp.eq.s32.totalorder %v6688_v28, %v6678_v22  ;;  %vm2289_vm14 = vcmp.eq.s32.totalorder %v6691_v29, %v6675_v15  ;;  %v6769_v24 = vadd.s32 56, %v6667_v11  ;;  %v2675_v41 = vld [vmem:[%s5904_s17 + $0x20] sm:$0xff]  ;;  %v2674_v27 = vld [vmem:[%s5904_s17 + $0x18] sm:$0xff]  ;;  %v2673_v12 = vld [vmem:[%s5904_s17 + $0x10] sm:$0xff] }
 0x3c5   : > { %5155 = vmatprep.subr.mxu0 %v5761_v9  ;;  %5190 = vmatprep.subr.mxu1 %v5761_v9  ;;  %vm2236_vm6 = vcmp.eq.s32.totalorder %v6691_v29, %v6678_v22  ;;  %vm2288_vm0 = vcmp.eq.s32.totalorder %v6713_v32, %v6675_v15  ;;  %vm2235_vm4 = vcmp.eq.s32.totalorder %v6713_v32, %v6678_v22  ;;  %v6783_v35 = vadd.s32 48, %v6667_v11  ;;  %v2672_v61 = vld [vmem:[%s5904_s17 + $0x8] sm:$0xff]  ;;  %v2671_v14 = vld [vmem:[%s5904_s17] sm:$0xff] }
 0x3c6   : > { %5156 = vmatpush3.msk.msra.mxu0 %vm2291_vm2, %v5764_v30  ;;  %5191 = vmatpush3.msk.msra.mxu1 %vm2238_vm12, %v5764_v30  ;;  %vm2287_vm5 = vcmp.eq.s32.totalorder %v6727_v34, %v6675_v15  ;;  %vm2234_vm11 = vcmp.eq.s32.totalorder %v6727_v34, %v6678_v22  ;;  %vm2286_vm13 = vcmp.eq.s32.totalorder %v6741_v60, %v6675_v15  ;;  %v6797_v36 = vadd.s32 40, %v6667_v11 }
 0x3c7   : > { %5157 = vmatprep.subr.mxu0 %v5761_v9  ;;  %5192 = vmatprep.subr.mxu1 %v5761_v9  ;;  %vm2233_vm8 = vcmp.eq.s32.totalorder %v6741_v60, %v6678_v22  ;;  %vm2285_vm15 = vcmp.eq.s32.totalorder %v6755_v4, %v6675_v15  ;;  %vm2232_vm7 = vcmp.eq.s32.totalorder %v6755_v4, %v6678_v22  ;;  %v6811_v2 = vadd.s32 32, %v6667_v11 }
 0x3c8   : > { %5158 = vmatpush3.msk.msra.mxu0 %vm2290_vm9, %v5764_v30  ;;  %5193 = vmatpush3.msk.msra.mxu1 %vm2237_vm1, %v5764_v30  ;;  %vm2284_vm2 = vcmp.eq.s32.totalorder %v6769_v24, %v6675_v15  ;;  %vm2231_vm9 = vcmp.eq.s32.totalorder %v6769_v24, %v6678_v22  ;;  %v6825_v39 = vadd.s32 24, %v6667_v11  ;;  %v6839_v63 = vadd.s32 16, %v6667_v11 }
 0x3c9   : > { %5159 = vmatprep.subr.mxu0 %v5761_v9  ;;  %5194 = vmatprep.subr.mxu1 %v5761_v9  ;;  %v6853_v10 = vadd.s32 8, %v6667_v11 }
 0x3ca   : > { %5160 = vmatpush3.msk.msra.mxu0 %vm2289_vm14, %v5764_v30  ;;  %5195 = vmatpush3.msk.msra.mxu1 %vm2236_vm6, %v5764_v30  ;;  %vm2283_vm14 = vcmp.eq.s32.totalorder %v6783_v35, %v6675_v15  ;;  %vm7737_vm3 = vcmp.eq.s32.totalorder %v6825_v39, %v6678_v22 }
 0x3cb   : > { %5161 = vmatprep.subr.mxu0 %v5761_v9  ;;  %5196 = vmatprep.subr.mxu1 %v5761_v9 }
 0x3cc   : > { %5162 = vmatpush3.msk.msra.mxu0 %vm2288_vm0, %v5764_v30  ;;  %5197 = vmatpush3.msk.msra.mxu1 %vm2235_vm4, %v5764_v30  ;;  %vm2230_vm0 = vcmp.eq.s32.totalorder %v6783_v35, %v6678_v22 }
 0x3cd   : > { %5163 = vmatprep.subr.mxu0 %v5761_v9  ;;  %5198 = vmatprep.subr.mxu1 %v5761_v9 }
 0x3ce   : > { %5164 = vmatpush3.msk.msra.mxu0 %vm2287_vm5, %v5764_v30  ;;  %5199 = vmatpush3.msk.msra.mxu1 %vm2234_vm11, %v5764_v30  ;;  %vm2282_vm5 = vcmp.eq.s32.totalorder %v6797_v36, %v6675_v15 }
 0x3cf   : > { %5165 = vmatprep.subr.mxu0 %v5761_v9  ;;  %5200 = vmatprep.subr.mxu1 %v5761_v9 }
 0x3d0   : > { %5166 = vmatpush3.msk.msra.mxu0 %vm2286_vm13, %v5764_v30  ;;  %5201 = vmatpush3.msk.msra.mxu1 %vm2233_vm8, %v5764_v30  ;;  %vm7735_vm13 = vcmp.eq.s32.totalorder %v6797_v36, %v6678_v22 }
 0x3d1   : > { %5167 = vmatprep.subr.mxu0 %v5761_v9  ;;  %5202 = vmatprep.subr.mxu1 %v5761_v9 }
 0x3d2   : > { %5168 = vmatpush3.msk.msra.mxu0 %vm2285_vm15, %v5764_v30  ;;  %5203 = vmatpush3.msk.msra.mxu1 %vm2232_vm7, %v5764_v30  ;;  %vm2281_vm15 = vcmp.eq.s32.totalorder %v6811_v2, %v6675_v15 }
 0x3d3   : > { %5169 = vmatprep.subr.mxu0 %v5761_v9  ;;  %5204 = vmatprep.subr.mxu1 %v5761_v9 }
 0x3d4   : > { %5170 = vmatpush3.msk.msra.mxu0 %vm2284_vm2, %v5764_v30  ;;  %5205 = vmatpush3.msk.msra.mxu1 %vm2231_vm9, %v5764_v30  ;;  %vm7736_vm2 = vcmp.eq.s32.totalorder %v6811_v2, %v6678_v22 }
 0x3d5   : > { %5171 = vmatprep.subr.mxu0 %v5761_v9  ;;  %5206 = vmatprep.subr.mxu1 %v5761_v9 }
 0x3d6   : > { %5172 = vmatpush3.msk.msra.mxu0 %vm2283_vm14, %v5764_v30  ;;  %5207 = vmatpush3.msk.msra.mxu1 %vm2230_vm0, %v5764_v30  ;;  %vm2280_vm14 = vcmp.eq.s32.totalorder %v6825_v39, %v6675_v15 }
 0x3d7   : > { %5173 = vmatprep.subr.mxu0 %v5761_v9  ;;  %5208 = vmatprep.subr.mxu1 %v5761_v9 }
 0x3d8   : > { %5174 = vmatpush3.msk.msra.mxu0 %vm2282_vm5, %v5764_v30  ;;  %5209 = vmatpush3.msk.msra.mxu1 %vm7735_vm13, %v5764_v30  ;;  %vm2279_vm5 = vcmp.eq.s32.totalorder %v6839_v63, %v6675_v15  ;;  %vm2226_vm13 = vcmp.eq.s32.totalorder %v6839_v63, %v6678_v22 }
 0x3d9   : > { %5175 = vmatprep.subr.mxu0 %v5761_v9  ;;  %5210 = vmatprep.subr.mxu1 %v5761_v9 }
 0x3da   : > { %5176 = vmatpush3.msk.msra.mxu0 %vm2281_vm15, %v5764_v30  ;;  %5211 = vmatpush3.msk.msra.mxu1 %vm7736_vm2, %v5764_v30  ;;  %vm2278_vm15 = vcmp.eq.s32.totalorder %v6853_v10, %v6675_v15  ;;  %vm2225_vm2 = vcmp.eq.s32.totalorder %v6853_v10, %v6678_v22 }
 0x3db   : > { %5177 = vmatprep.subr.mxu0 %v5761_v9  ;;  %5212 = vmatprep.subr.mxu1 %v5761_v9 }
 0x3dc   : > { %5178 = vmatpush3.msk.msra.mxu0 %vm2280_vm14, %v5764_v30  ;;  %5213 = vmatpush3.msk.msra.mxu1 %vm7737_vm3, %v5764_v30  ;;  %vm2277_vm14 = vcmp.eq.s32.totalorder %v6667_v11, %v6675_v15  ;;  %vm2224_vm3 = vcmp.eq.s32.totalorder %v6667_v11, %v6678_v22 }
 0x3dd   : > { %5179 = vmatprep.subr.mxu0 %v5761_v9  ;;  %5214 = vmatprep.subr.mxu1 %v5761_v9 }
 0x3de   : > { %5180 = vmatpush3.msk.msra.mxu0 %vm2279_vm5, %v5764_v30  ;;  %5215 = vmatpush3.msk.msra.mxu1 %vm2226_vm13, %v5764_v30  ;;  %vm2345_vm5 = vcmp.eq.s32.totalorder %v6682_v6, %v6883_v38 }
 0x3df   : > { %5181 = vmatprep.subr.mxu0 %v5761_v9  ;;  %5216 = vmatprep.subr.mxu1 %v5761_v9 }
 0x3e0   : > { %5182 = vmatpush3.msk.msra.mxu0 %vm2278_vm15, %v5764_v30  ;;  %5217 = vmatpush3.msk.msra.mxu1 %vm2225_vm2, %v5764_v30  ;;  %vm2344_vm15 = vcmp.eq.s32.totalorder %v6685_v20, %v6883_v38 }
 0x3e1   : > { %5183 = vmatprep.subr.mxu0 %v5761_v9  ;;  %5218 = vmatprep.subr.mxu1 %v5761_v9 }
 0x3e2   : > { %5184 = vmatpush3.msk.msra.mxu0 %vm2277_vm14, %v5764_v30  ;;  %5219 = vmatpush3.msk.msra.mxu1 %vm2224_vm3, %v5764_v30  ;;  %vm2343_vm14 = vcmp.eq.s32.totalorder %v6688_v28, %v6883_v38 }
 0x3e3   : > { %5186 = vmatmul.mubr.f32.vlgmr.msra.gmra.mxu0 %v2379_v42  ;;  %5223 = vmatprep.subr.mxu0 %v5761_v9 }
 0x3e4   : > { %5221 = vmatmul.mubr.f32.vlgmr.msra.gmra.mxu1 %v2378_v49  ;;  %5224 = vmatpush3.msk.msra.mxu0 %vm2345_vm5, %v5764_v30  ;;  %vm2342_vm5 = vcmp.eq.s32.totalorder %v6691_v29, %v6883_v38 }
 0x3e5   : > { %5225 = vmatprep.subr.mxu0 %v5761_v9  ;;  %5258 = vmatprep.subr.mxu1 %v5761_v9 }
 0x3e6   : > { %5226 = vmatpush3.msk.msra.mxu0 %vm2344_vm15, %v5764_v30  ;;  %5259 = vmatpush3.msk.msra.mxu1 %vm2239_vm10, %v5764_v30  ;;  %vm2341_vm10 = vcmp.eq.s32.totalorder %v6713_v32, %v6883_v38  ;;  %vm7764_vm15 = vcmp.eq.s32.totalorder %v6797_v36, %v6678_v22 }
 0x3e7   : > { %5227 = vmatprep.subr.mxu0 %v5761_v9  ;;  %5260 = vmatprep.subr.mxu1 %v5761_v9 }
 0x3e8   : > { %5228 = vmatpush3.msk.msra.mxu0 %vm2343_vm14, %v5764_v30  ;;  %5261 = vmatpush3.msk.msra.mxu1 %vm2238_vm12, %v5764_v30  ;;  %vm2340_vm12 = vcmp.eq.s32.totalorder %v6727_v34, %v6883_v38  ;;  %vm7765_vm14 = vcmp.eq.s32.totalorder %v6811_v2, %v6678_v22 }
 0x3e9   : > { %5229 = vmatprep.subr.mxu0 %v5761_v9  ;;  %5262 = vmatprep.subr.mxu1 %v5761_v9 }
 0x3ea   : > { %5230 = vmatpush3.msk.msra.mxu0 %vm2342_vm5, %v5764_v30  ;;  %5263 = vmatpush3.msk.msra.mxu1 %vm2237_vm1, %v5764_v30  ;;  %vm2339_vm1 = vcmp.eq.s32.totalorder %v6741_v60, %v6883_v38  ;;  %vm2331_vm5 = vcmp.eq.s32.totalorder %v6853_v10, %v6883_v38 }
 0x3eb   : > { %5231 = vmatprep.subr.mxu0 %v5761_v9  ;;  %5264 = vmatprep.subr.mxu1 %v5761_v9 }
 0x3ec   : > { %5232 = vmatpush3.msk.msra.mxu0 %vm2341_vm10, %v5764_v30  ;;  %5265 = vmatpush3.msk.msra.mxu1 %vm2236_vm6, %v5764_v30  ;;  %vm2338_vm6 = vcmp.eq.s32.totalorder %v6755_v4, %v6883_v38  ;;  %vm7766_vm10 = vcmp.eq.s32.totalorder %v6825_v39, %v6678_v22 }
 0x3ed   : > { %5233 = vmatprep.subr.mxu0 %v5761_v9  ;;  %5266 = vmatprep.subr.mxu1 %v5761_v9 }
 0x3ee   : > { %5234 = vmatpush3.msk.msra.mxu0 %vm2340_vm12, %v5764_v30  ;;  %5267 = vmatpush3.msk.msra.mxu1 %vm2235_vm4, %v5764_v30  ;;  %vm2337_vm4 = vcmp.eq.s32.totalorder %v6769_v24, %v6883_v38  ;;  %vm2330_vm12 = vcmp.eq.s32.totalorder %v6667_v11, %v6883_v38 }
 0x3ef   : > { %5235 = vmatprep.subr.mxu0 %v5761_v9  ;;  %5268 = vmatprep.subr.mxu1 %v5761_v9 }
 0x3f0   : > { %5236 = vmatpush3.msk.msra.mxu0 %vm2339_vm1, %v5764_v30  ;;  %5269 = vmatpush3.msk.msra.mxu1 %vm2234_vm11, %v5764_v30  ;;  %vm2336_vm11 = vcmp.eq.s32.totalorder %v6783_v35, %v6883_v38  ;;  %vm7767_vm1 = vmmov 0  }
 0x3f1   : > { %5237 = vmatprep.subr.mxu0 %v5761_v9  ;;  %5270 = vmatprep.subr.mxu1 %v5761_v9 }
 0x3f2   : > { %5238 = vmatpush3.msk.msra.mxu0 %vm2338_vm6, %v5764_v30  ;;  %5271 = vmatpush3.msk.msra.mxu1 %vm2233_vm8, %v5764_v30  ;;  %vm2335_vm8 = vcmp.eq.s32.totalorder %v6797_v36, %v6883_v38 }
 0x3f3   : > { %5239 = vmatprep.subr.mxu0 %v5761_v9  ;;  %5272 = vmatprep.subr.mxu1 %v5761_v9 }
 0x3f4   : > { %5240 = vmatpush3.msk.msra.mxu0 %vm2337_vm4, %v5764_v30  ;;  %5273 = vmatpush3.msk.msra.mxu1 %vm2232_vm7, %v5764_v30  ;;  %vm2334_vm7 = vcmp.eq.s32.totalorder %v6811_v2, %v6883_v38 }
 0x3f5   : > { %5241 = vmatprep.subr.mxu0 %v5761_v9  ;;  %5274 = vmatprep.subr.mxu1 %v5761_v9 }
 0x3f6   : > { %5242 = vmatpush3.msk.msra.mxu0 %vm2336_vm11, %v5764_v30  ;;  %5275 = vmatpush3.msk.msra.mxu1 %vm2231_vm9, %v5764_v30  ;;  %vm2333_vm9 = vcmp.eq.s32.totalorder %v6825_v39, %v6883_v38 }
 0x3f7   : > { %5243 = vmatprep.subr.mxu0 %v5761_v9  ;;  %5276 = vmatprep.subr.mxu1 %v5761_v9 }
 0x3f8   : > { %5244 = vmatpush3.msk.msra.mxu0 %vm2335_vm8, %v5764_v30  ;;  %5277 = vmatpush3.msk.msra.mxu1 %vm2230_vm0, %v5764_v30  ;;  %vm2332_vm0 = vcmp.eq.s32.totalorder %v6839_v63, %v6883_v38 }
 0x3f9   : > { %5245 = vmatprep.subr.mxu0 %v5761_v9  ;;  %5278 = vmatprep.subr.mxu1 %v5761_v9 }
 0x3fa   : > { %5246 = vmatpush3.msk.msra.mxu0 %vm2334_vm7, %v5764_v30  ;;  %5279 = vmatpush3.msk.msra.mxu1 %vm7764_vm15, %v5764_v30 }
 0x3fb   : > { %5247 = vmatprep.subr.mxu0 %v5761_v9  ;;  %5280 = vmatprep.subr.mxu1 %v5761_v9 }
 0x3fc   : > { %5248 = vmatpush3.msk.msra.mxu0 %vm2333_vm9, %v5764_v30  ;;  %5281 = vmatpush3.msk.msra.mxu1 %vm7765_vm14, %v5764_v30 }
 0x3fd   : > { %5249 = vmatprep.subr.mxu0 %v5761_v9  ;;  %5282 = vmatprep.subr.mxu1 %v5761_v9 }
 0x3fe   : > { %5250 = vmatpush3.msk.msra.mxu0 %vm2332_vm0, %v5764_v30  ;;  %5283 = vmatpush3.msk.msra.mxu1 %vm7766_vm10, %v5764_v30 }
 0x3ff   : > { %5251 = vmatprep.subr.mxu0 %v5761_v9  ;;  %5284 = vmatprep.subr.mxu1 %v5761_v9 }
 0x400   : > { %5252 = vmatpush3.msk.msra.mxu0 %vm2331_vm5, %v5764_v30  ;;  %5285 = vmatpush3.msk.msra.mxu1 %vm2226_vm13, %v5764_v30 }
 0x401   : > { %5253 = vmatprep.subr.mxu0 %v5761_v9  ;;  %5255 = vmatprep.mubr.msk.f32.mxu0 %vm7767_vm1, %v5761_v9 }
 0x402   : > { %5254 = vmatpush3.msk.msra.mxu0 %vm2330_vm12, %v5764_v30  ;;  %5286 = vmatprep.subr.mxu1 %v5761_v9 }
 0x403   : > { %5256 = vmatmul.mubr.f32.vlgmr.msra.gmra.mxu0 %v2520_v52  ;;  %5287 = vmatpush3.msk.msra.mxu1 %vm2225_vm2, %v5764_v30 }
 0x404   : > { %5288 = vmatprep.subr.mxu1 %v5761_v9  ;;  %5290 = vmatprep.mubr.msk.f32.mxu1 %vm7767_vm1, %v5761_v9 }
 0x405   : > { %5289 = vmatpush3.msk.msra.mxu1 %vm2224_vm3, %v5764_v30  ;;  %2730 = vperm.xlu0 %5677, %v2685_v47  }
 0x406   : > { %5291 = vmatmul.mubr.f32.vlgmr.msra.gmra.mxu1 %v2595_v33  ;;  %2724 = vperm.xlu1 %5678, %v2683_v31  }
 0x407   : > { %5293 = vmatprep.subr.mxu0 %v5761_v9  ;;  %5325 = vmatprep.mubr.msk.f32.mxu0 %vm7767_vm1, %v5761_v9 }
 0x409   : > { %2721 = vperm.xlu0 %5677, %v2682_v44  }
 0x40a   : > { %2718 = vperm.xlu1 %5678, %v2681_v56  }
 0x40d   : > { %2715 = vperm.xlu0 %5677, %v2680_v59  }
 0x40e   : > { %2712 = vperm.xlu1 %5678, %v2679_v8  }
 0x411   : > { %2709 = vperm.xlu0 %5677, %v2678_v58  }
 0x412   : > { %2706 = vperm.xlu1 %5678, %v2677_v40  }
 0x415   : > { %2703 = vperm.xlu0 %5677, %v2676_v54  }
 0x416   : > { %2700 = vperm.xlu1 %5678, %v2675_v41  }
 0x419   : > { %2697 = vperm.xlu0 %5677, %v2674_v27  }
 0x41a   : > { %2694 = vperm.xlu1 %5678, %v2673_v12  }
 0x41d   : > { %2691 = vperm.xlu0 %5677, %v2672_v61  }
 0x41e   : > { %2688 = vperm.xlu1 %5678, %v2671_v14  }
 0x43c   : > { %v2734_v37 = vpop.permute.xlu0 %2733  ;;  %v2728_v16 = vpop.permute.xlu1 %2727 }
 0x43d   : > { %vm2750_vm3 = vcmp.eq.s32.totalorder %v2734_v37, %v7069_v5  ;;  %vm2748_vm2 = vcmp.eq.s32.totalorder %v2728_v16, %v7069_v5 }
 0x43e   : > { %5294 = vmatpush3.msk.msra.mxu0 %vm2750_vm3, %v5764_v30 }
 0x43f   : > { %5295 = vmatprep.subr.mxu0 %v5761_v9 }
 0x480   : > { %v2731_v43 = vpop.permute.xlu0 %2730 }
 0x481   : > { %vm2749_vm13 = vcmp.eq.s32.totalorder %v2731_v43, %v7069_v5  ;;  %v2725_v51 = vpop.permute.xlu1 %2724 }
 0x482   : > { %5296 = vmatpush3.msk.msra.mxu0 %vm2749_vm13, %v5764_v30  ;;  %vm2747_vm6 = vcmp.eq.s32.totalorder %v2725_v51, %v7069_v5 }
 0x483   : > { %5297 = vmatprep.subr.mxu0 %v5761_v9 }
 0x484   : > { %5298 = vmatpush3.msk.msra.mxu0 %vm2748_vm2, %v5764_v30  ;;  %v2722_v48 = vpop.permute.xlu0 %2721 }
 0x485   : > { %5299 = vmatprep.subr.mxu0 %v5761_v9  ;;  %vm2746_vm4 = vcmp.eq.s32.totalorder %v2722_v48, %v7069_v5  ;;  %v2719_v1 = vpop.permute.xlu1 %2718 }
 0x486   : > { %5300 = vmatpush3.msk.msra.mxu0 %vm2747_vm6, %v5764_v30  ;;  %vm2745_vm11 = vcmp.eq.s32.totalorder %v2719_v1, %v7069_v5 }
 0x487   : > { %5301 = vmatprep.subr.mxu0 %v5761_v9 }
 0x488   : > { %5302 = vmatpush3.msk.msra.mxu0 %vm2746_vm4, %v5764_v30  ;;  %v2716_v17 = vpop.permute.xlu0 %2715 }
 0x489   : > { %5303 = vmatprep.subr.mxu0 %v5761_v9  ;;  %vm2744_vm8 = vcmp.eq.s32.totalorder %v2716_v17, %v7069_v5  ;;  %v2713_v18 = vpop.permute.xlu1 %2712 }
 0x48a   : > { %5304 = vmatpush3.msk.msra.mxu0 %vm2745_vm11, %v5764_v30  ;;  %vm2743_vm7 = vcmp.eq.s32.totalorder %v2713_v18, %v7069_v5 }
 0x48b   : > { %5305 = vmatprep.subr.mxu0 %v5761_v9 }
 0x48c   : > { %5306 = vmatpush3.msk.msra.mxu0 %vm2744_vm8, %v5764_v30  ;;  %v2710_v45 = vpop.permute.xlu0 %2709 }
 0x48d   : > { %5307 = vmatprep.subr.mxu0 %v5761_v9  ;;  %vm2742_vm9 = vcmp.eq.s32.totalorder %v2710_v45, %v7069_v5  ;;  %v2707_v7 = vpop.permute.xlu1 %2706 }
 0x48e   : > { %5308 = vmatpush3.msk.msra.mxu0 %vm2743_vm7, %v5764_v30  ;;  %vm2741_vm15 = vcmp.eq.s32.totalorder %v2707_v7, %v7069_v5 }
 0x48f   : > { %5309 = vmatprep.subr.mxu0 %v5761_v9 }
 0x490   : > { %5310 = vmatpush3.msk.msra.mxu0 %vm2742_vm9, %v5764_v30  ;;  %v2704_v50 = vpop.permute.xlu0 %2703 }
 0x491   : > { %5311 = vmatprep.subr.mxu0 %v5761_v9  ;;  %vm2740_vm0 = vcmp.eq.s32.totalorder %v2704_v50, %v7069_v5  ;;  %v2701_v55 = vpop.permute.xlu1 %2700 }
 0x492   : > { %5312 = vmatpush3.msk.msra.mxu0 %vm2741_vm15, %v5764_v30  ;;  %vm2739_vm14 = vcmp.eq.s32.totalorder %v2701_v55, %v7069_v5 }
 0x493   : > { %5313 = vmatprep.subr.mxu0 %v5761_v9 }
 0x494   : > { %5314 = vmatpush3.msk.msra.mxu0 %vm2740_vm0, %v5764_v30  ;;  %v2698_v62 = vpop.permute.xlu0 %2697 }
 0x495   : > { %5315 = vmatprep.subr.mxu0 %v5761_v9  ;;  %vm2738_vm5 = vcmp.eq.s32.totalorder %v2698_v62, %v7069_v5  ;;  %v2695_v13 = vpop.permute.xlu1 %2694 }
 0x496   : > { %5316 = vmatpush3.msk.msra.mxu0 %vm2739_vm14, %v5764_v30  ;;  %vm2737_vm10 = vcmp.eq.s32.totalorder %v2695_v13, %v7069_v5 }
 0x497   : > { %5317 = vmatprep.subr.mxu0 %v5761_v9 }
 0x498   : > { %5318 = vmatpush3.msk.msra.mxu0 %vm2738_vm5, %v5764_v30  ;;  %v2692_v19 = vpop.permute.xlu0 %2691 }
 0x499   : > { %5319 = vmatprep.subr.mxu0 %v5761_v9  ;;  %vm2736_vm12 = vcmp.eq.s32.totalorder %v2692_v19, %v7069_v5  ;;  %v2689_v57 = vpop.permute.xlu1 %2688 }
 0x49a   : > { %5320 = vmatpush3.msk.msra.mxu0 %vm2737_vm10, %v5764_v30  ;;  %vm2735_vm1 = vcmp.eq.s32.totalorder %v2689_v57, %v7069_v5 }
 0x49b   : > { %5321 = vmatprep.subr.mxu0 %v5761_v9 }
 0x49c   : > { %5322 = vmatpush3.msk.msra.mxu0 %vm2736_vm12, %v5764_v30 }
 0x49d   : > { %5323 = vmatprep.subr.mxu0 %v5761_v9  ;;  %v2783_v9 = vld [vmem:[#allocation6 + $0x1] sm:$0x1] }
 0x49e   : > { %5324 = vmatpush3.msk.msra.mxu0 %vm2735_vm1, %v5764_v30 }
 0x4a3   : > { %v2446_v46 = vpop.f32.mrf.mxu0 }
 0x4a4   : > { %v2516_v53 = vpop.f32.mrf.mxu1 }
 0x4a5   : > { %v5187_v0 = vpop.f32.mrf.mxu0  ;;  %v2517_v25 = vadd.f32 %v2516_v53, %v2446_v46 }
 0x4a6   : > { %v5222_v21 = vpop.f32.mrf.mxu1 }
 0x4c3   : > { %v2587_v11 = vpop.f32.mrf.mxu0 }
 0x4c4   : > { %v2591_v3 = vadd.f32 %v2587_v11, %v2517_v25 }
 0x4c5   : > { %v5257_v15 = vpop.f32.mrf.mxu0 }
 0x4c6   : > { %v2593_v22 = vmul.f32 0.01, %v2591_v3  ;;  %vm2592_vm3 = vcmp.gt.f32.partialorder %v2591_v3, 0.0  ;;  %v2662_v23 = vpop.f32.mrf.mxu1 }
 0x4c8   : > { %v2594_v26 = vsel %vm2592_vm3, %v2591_v3, %v2593_v22  ;;  %v5292_v6 = vpop.f32.mrf.mxu1 }
 0x4c9   : > { %v2666_v20 = vsub.f32 %v2594_v26, %v2662_v23 }
 0x4cb   : > { %v2667_v28 = vmul.f32 1.442695, %v2666_v20 }
 0x4cd   : > { %5679 = vpow2.f32 %v2667_v28 }
 0x4da   : > { %v5680_v29 = vpop.eup %5679 }
 0x4db   : > { %5326 = vmatmul.mubr.f32.vlgmr.msra.gmra.mxu0 %v5680_v29 }
 0x59b   : > { %v2850_v30 = vpop.f32.mrf.mxu0 }
 0x59c   : > { %v2854_v32 = vadd.f32 %v2850_v30, %v2783_v9 }
 0x59d   : > { %v5327_v34 = vpop.f32.mrf.mxu0 }
 0x59e   : > { %2855 = vst [vmem:[#allocation6 + $0x1] sm:$0x1] %v2854_v32 }
 0x59f PF: > { %s7768_s17 = sld [smem:[#allocation10_spill]] }
 0x5a5   : > { %p2856_p12 = scmp.eq.s32.totalorder %s7768_s17, 2  ;;  %p4240_p13 = scmp.ne.s32.totalorder %s7768_s17, 2 }
 0x5a7   : > { %2859 = sbr.rel (%p4240_p13) target bundleno = 2062 (0x80e), region = 92 }
 0x5ac   : > { %v3337_v60 = vld [vmem:[%s5909_s24 + $0x10] sm:$0xff]  ;;  %v3335_v4 = vld [vmem:[%s5909_s24] sm:$0xff]  ;;  %v2860_v24 = vlaneseq  ;;  %v5765_v35 = vmov 0   ;;  %v3338_v2 = vld [vmem:[%s5909_s24 + $0x18] sm:$0xff]  ;;  %v5766_v63 = vmov 0.0   ;;  %vm7738_vm13 = vmmov 0  }
 0x5ad   : > { %5682 = vset.pattern.permute.xlu1 %v5765_v35  ;;  %5681 = vset.pattern.permute.xlu0 %v5765_v35  ;;  %v3336_v39 = vld [vmem:[%s5909_s24 + $0x8] sm:$0xff]  ;;  %v7129_v10 = vld [vmem:[%s5894_s28] ss:$0 sm:$0xff]  ;;  %v5768_v47 = vmov 1.0   ;;  %v3342_v59 = vld [vmem:[%s5909_s24 + $0x38] sm:$0xff] }
 0x5ae   : > { %3358 = vperm.xlu1 %5682, %v3337_v60   ;;  %3352 = vperm.xlu0 %5681, %v3335_v4   ;;  %v7123_v36 = vshrl.u32 %v2860_v24, 7  ;;  %v7139_v49 = vld [vmem:[%s5889_s25] ss:$0 sm:$0xff]  ;;  %v3340_v33 = vld [vmem:[%s5909_s24 + $0x28] sm:$0xff]  ;;  %v3341_v58 = vld [vmem:[%s5909_s24 + $0x30] sm:$0xff]  ;;  %v3334_v29 = vand.u32 127, %v2860_v24 }
 0x5af   : > { %5328 = vmatprep.subr.mxu0 %v5766_v63  ;;  %5363 = vmatprep.subr.mxu1 %v5766_v63  ;;  %v3339_v31 = vld [vmem:[%s5909_s24 + $0x20] sm:$0xff]  ;;  %v3344_v54 = vld [vmem:[%s5909_s24 + $0x48] sm:$0xff]  ;;  %v3346_v61 = vld [vmem:[%s5909_s24 + $0x58] sm:$0xff] }
 0x5b0   : > { %v7133_v38 = vadd.s32 120, %v7123_v36  ;;  %v7136_v42 = vadd.s32 112, %v7123_v36  ;;  %5360 = vmatprep.mubr.msk.f32.mxu0 %vm7738_vm13, %v5766_v63  ;;  %5395 = vmatprep.mubr.msk.f32.mxu1 %vm7738_vm13, %v5766_v63  ;;  %v7146_v52 = vadd.s32 104, %v7123_v36  ;;  %v7158_v44 = vadd.s32 96, %v7123_v36  ;;  %v3343_v27 = vld [vmem:[%s5909_s24 + $0x40] sm:$0xff]  ;;  %v3345_v14 = vld [vmem:[%s5909_s24 + $0x50] sm:$0xff] }
 0x5b1   : > { %v7172_v56 = vadd.s32 88, %v7123_v36  ;;  %v7185_v8 = vadd.s32 80, %v7123_v36  ;;  %v7198_v40 = vadd.s32 72, %v7123_v36  ;;  %v7208_v41 = vadd.s32 64, %v7123_v36  ;;  %v3348_v16 = vld [vmem:[%s5909_s24 + $0x68] sm:$0xff]  ;;  %v3347_v43 = vld [vmem:[%s5909_s24 + $0x60] sm:$0xff] }
 0x5b2   : > { %3361 = vperm.xlu1 %5682, %v3338_v2   ;;  %3355 = vperm.xlu0 %5681, %v3336_v39   ;;  %vm2950_vm2 = vcmp.eq.s32.totalorder %v7133_v38, %v7129_v10  ;;  %vm2949_vm6 = vcmp.eq.s32.totalorder %v7136_v42, %v7129_v10  ;;  %vm2897_vm4 = vcmp.eq.s32.totalorder %v7133_v38, %v7139_v49  ;;  %v7224_v12 = vadd.s32 56, %v7123_v36  ;;  %v3350_v1 = vld [vmem:[%s5909_s24 + $0x78] sm:$0xff]  ;;  %v3349_v17 = vld [vmem:[%s5909_s24 + $0x70] sm:$0xff]  ;;  %v7342_v7 = vld [vmem:[%s5899_s16] ss:$0 sm:$0xff] }
 0x5b3   : > { %5329 = vmatpush3.msk.msra.mxu0 %vm2950_vm2, %v5768_v47  ;;  %5364 = vmatpush3.msk.msra.mxu1 %vm2897_vm4, %v5768_v47  ;;  %vm7743_vm11 = vcmp.eq.s32.totalorder %v7136_v42, %v7139_v49  ;;  %vm2948_vm8 = vcmp.eq.s32.totalorder %v7146_v52, %v7129_v10  ;;  %vm7744_vm7 = vcmp.eq.s32.totalorder %v7146_v52, %v7139_v49  ;;  %v7234_v5 = vadd.s32 48, %v7123_v36  ;;  %v3037_v50 = vld [vmem:[#allocation3 + $0x1] sm:$0x1]  ;;  %v3036_v55 = vld [vmem:[#allocation3] sm:$0x1]  ;;  %v3462_v13 = vld [vmem:[%s7707_s0 + $0x78] sm:$0xff] }
 0x5b4   : > { %5330 = vmatprep.subr.mxu0 %v5766_v63  ;;  %5365 = vmatprep.subr.mxu1 %v5766_v63  ;;  %vm2947_vm9 = vcmp.eq.s32.totalorder %v7158_v44, %v7129_v10  ;;  %vm2946_vm15 = vcmp.eq.s32.totalorder %v7172_v56, %v7129_v10  ;;  %vm7745_vm0 = vcmp.eq.s32.totalorder %v7158_v44, %v7139_v49  ;;  %v7250_v37 = vadd.s32 40, %v7123_v36  ;;  %v3178_v62 = vld [vmem:[#allocation5] sm:$0x1]  ;;  %v3461_v19 = vld [vmem:[%s7707_s0 + $0x70] sm:$0xff]  ;;  %v3253_v57 = vld [vmem:[#allocation6] sm:$0x3] }
 0x5b5   : > { %5331 = vmatpush3.msk.msra.mxu0 %vm2949_vm6, %v5768_v47  ;;  %5366 = vmatpush3.msk.msra.mxu1 %vm7743_vm11, %v5768_v47  ;;  %vm2945_vm14 = vcmp.eq.s32.totalorder %v7185_v8, %v7129_v10  ;;  %vm2944_vm5 = vcmp.eq.s32.totalorder %v7198_v40, %v7129_v10  ;;  %vm7746_vm10 = vcmp.eq.s32.totalorder %v7172_v56, %v7139_v49  ;;  %v7264_v51 = vadd.s32 32, %v7123_v36  ;;  %v3460_v46 = vld [vmem:[%s7707_s0 + $0x68] sm:$0xff]  ;;  %v3459_v53 = vld [vmem:[%s7707_s0 + $0x60] sm:$0xff]  ;;  %v3458_v0 = vld [vmem:[%s7707_s0 + $0x58] sm:$0xff] }
 0x5b6   : > { %3367 = vperm.xlu1 %5682, %v3340_v33   ;;  %3364 = vperm.xlu0 %5681, %v3339_v31   ;;  %vm2943_vm12 = vcmp.eq.s32.totalorder %v7208_v41, %v7129_v10  ;;  %vm2892_vm1 = vcmp.eq.s32.totalorder %v7185_v8, %v7139_v49  ;;  %vm2942_vm3 = vcmp.eq.s32.totalorder %v7224_v12, %v7129_v10  ;;  %v7280_v48 = vadd.s32 24, %v7123_v36  ;;  %v3457_v21 = vld [vmem:[%s7707_s0 + $0x50] sm:$0xff]  ;;  %v3456_v25 = vld [vmem:[%s7707_s0 + $0x48] sm:$0xff]  ;;  %v3455_v11 = vld [vmem:[%s7707_s0 + $0x40] sm:$0xff] }
 0x5b7   : > { %5332 = vmatprep.subr.mxu0 %v5766_v63  ;;  %5367 = vmatprep.subr.mxu1 %v5766_v63  ;;  %vm2891_vm2 = vcmp.eq.s32.totalorder %v7198_v40, %v7139_v49  ;;  %vm2941_vm6 = vcmp.eq.s32.totalorder %v7234_v5, %v7129_v10  ;;  %v7294_v18 = vadd.s32 16, %v7123_v36  ;;  %v7308_v45 = vadd.s32 8, %v7123_v36  ;;  %v3454_v3 = vld [vmem:[%s7707_s0 + $0x38] sm:$0xff]  ;;  %v3453_v15 = vld [vmem:[%s7707_s0 + $0x30] sm:$0xff]  ;;  %v3452_v22 = vld [vmem:[%s7707_s0 + $0x28] sm:$0xff] }
 0x5b8   : > { %5333 = vmatpush3.msk.msra.mxu0 %vm2948_vm8, %v5768_v47  ;;  %5368 = vmatpush3.msk.msra.mxu1 %vm7744_vm7, %v5768_v47  ;;  %vm2890_vm8 = vcmp.eq.s32.totalorder %v7208_v41, %v7139_v49  ;;  %vm2935_vm13 = vcmp.eq.s32.totalorder %v7123_v36, %v7129_v10  ;;  %v3451_v23 = vld [vmem:[%s7707_s0 + $0x20] sm:$0xff]  ;;  %v3450_v26 = vld [vmem:[%s7707_s0 + $0x18] sm:$0xff]  ;;  %v3449_v6 = vld [vmem:[%s7707_s0 + $0x10] sm:$0xff] }
 0x5b9   : > { %5334 = vmatprep.subr.mxu0 %v5766_v63  ;;  %5369 = vmatprep.subr.mxu1 %v5766_v63  ;;  %v3448_v20 = vld [vmem:[%s7707_s0 + $0x8] sm:$0xff]  ;;  %v3447_v28 = vld [vmem:[%s7707_s0] sm:$0xff] }
 0x5ba   : > { %5335 = vmatpush3.msk.msra.mxu0 %vm2947_vm9, %v5768_v47  ;;  %3373 = vperm.xlu1 %5682, %v3342_v59   ;;  %vm2940_vm9 = vcmp.eq.s32.totalorder %v7250_v37, %v7129_v10 }
 0x5bb   : > { %3370 = vperm.xlu0 %5681, %v3341_v58   ;;  %5336 = vmatprep.subr.mxu0 %v5766_v63 }
 0x5bc   : > { %5337 = vmatpush3.msk.msra.mxu0 %vm2946_vm15, %v5768_v47  ;;  %5370 = vmatpush3.msk.msra.mxu1 %vm7745_vm0, %v5768_v47  ;;  %vm2889_vm15 = vcmp.eq.s32.totalorder %v7224_v12, %v7139_v49 }
 0x5bd   : > { %5338 = vmatprep.subr.mxu0 %v5766_v63  ;;  %5371 = vmatprep.subr.mxu1 %v5766_v63 }
 0x5be   : > { %5339 = vmatpush3.msk.msra.mxu0 %vm2945_vm14, %v5768_v47  ;;  %3379 = vperm.xlu1 %5682, %v3344_v54   ;;  %vm2939_vm14 = vcmp.eq.s32.totalorder %v7264_v51, %v7129_v10 }
 0x5bf   : > { %3376 = vperm.xlu0 %5681, %v3343_v27   ;;  %5340 = vmatprep.subr.mxu0 %v5766_v63 }
 0x5c0   : > { %5341 = vmatpush3.msk.msra.mxu0 %vm2944_vm5, %v5768_v47  ;;  %5372 = vmatpush3.msk.msra.mxu1 %vm7746_vm10, %v5768_v47  ;;  %vm2888_vm5 = vcmp.eq.s32.totalorder %v7234_v5, %v7139_v49 }
 0x5c1   : > { %5342 = vmatprep.subr.mxu0 %v5766_v63  ;;  %5373 = vmatprep.subr.mxu1 %v5766_v63 }
 0x5c2   : > { %5343 = vmatpush3.msk.msra.mxu0 %vm2943_vm12, %v5768_v47  ;;  %3385 = vperm.xlu1 %5682, %v3346_v61   ;;  %vm2938_vm12 = vcmp.eq.s32.totalorder %v7280_v48, %v7129_v10 }
 0x5c3   : > { %3382 = vperm.xlu0 %5681, %v3345_v14   ;;  %5344 = vmatprep.subr.mxu0 %v5766_v63 }
 0x5c4   : > { %5374 = vmatpush3.msk.msra.mxu1 %vm2892_vm1, %v5768_v47  ;;  %5345 = vmatpush3.msk.msra.mxu0 %vm2942_vm3, %v5768_v47  ;;  %vm2887_vm3 = vcmp.eq.s32.totalorder %v7250_v37, %v7139_v49 }
 0x5c5   : > { %5375 = vmatprep.subr.mxu1 %v5766_v63  ;;  %5346 = vmatprep.subr.mxu0 %v5766_v63 }
 0x5c6   : > { %5376 = vmatpush3.msk.msra.mxu1 %vm2891_vm2, %v5768_v47  ;;  %5347 = vmatpush3.msk.msra.mxu0 %vm2941_vm6, %v5768_v47  ;;  %vm2937_vm6 = vcmp.eq.s32.totalorder %v7294_v18, %v7129_v10 }
 0x5c7   : > { %5377 = vmatprep.subr.mxu1 %v5766_v63  ;;  %3391 = vperm.xlu1 %5682, %v3348_v16  }
 0x5c8   : > { %3388 = vperm.xlu0 %5681, %v3347_v43   ;;  %5348 = vmatprep.subr.mxu0 %v5766_v63 }
 0x5c9   : > { %5378 = vmatpush3.msk.msra.mxu1 %vm2890_vm8, %v5768_v47  ;;  %5349 = vmatpush3.msk.msra.mxu0 %vm2940_vm9, %v5768_v47  ;;  %vm7740_vm9 = vcmp.eq.s32.totalorder %v7264_v51, %v7139_v49 }
 0x5ca   : > { %5379 = vmatprep.subr.mxu1 %v5766_v63  ;;  %5350 = vmatprep.subr.mxu0 %v5766_v63 }
 0x5cb   : > { %5380 = vmatpush3.msk.msra.mxu1 %vm2889_vm15, %v5768_v47  ;;  %5351 = vmatpush3.msk.msra.mxu0 %vm2939_vm14, %v5768_v47  ;;  %vm2936_vm14 = vcmp.eq.s32.totalorder %v7308_v45, %v7129_v10 }
 0x5cc   : > { %5381 = vmatprep.subr.mxu1 %v5766_v63  ;;  %3397 = vperm.xlu1 %5682, %v3350_v1  }
 0x5cd   : > { %3394 = vperm.xlu0 %5681, %v3349_v17   ;;  %5352 = vmatprep.subr.mxu0 %v5766_v63 }
 0x5ce   : > { %5382 = vmatpush3.msk.msra.mxu1 %vm2888_vm5, %v5768_v47  ;;  %5353 = vmatpush3.msk.msra.mxu0 %vm2938_vm12, %v5768_v47  ;;  %vm7741_vm12 = vcmp.eq.s32.totalorder %v7280_v48, %v7139_v49 }
 0x5cf   : > { %5383 = vmatprep.subr.mxu1 %v5766_v63  ;;  %5354 = vmatprep.subr.mxu0 %v5766_v63 }
 0x5d0   : > { %5384 = vmatpush3.msk.msra.mxu1 %vm2887_vm3, %v5768_v47  ;;  %5355 = vmatpush3.msk.msra.mxu0 %vm2937_vm6, %v5768_v47  ;;  %vm7742_vm6 = vcmp.eq.s32.totalorder %v7294_v18, %v7139_v49 }
 0x5d1   : > { %5385 = vmatprep.subr.mxu1 %v5766_v63  ;;  %5356 = vmatprep.subr.mxu0 %v5766_v63 }
 0x5d2   : > { %5386 = vmatpush3.msk.msra.mxu1 %vm7740_vm9, %v5768_v47  ;;  %5357 = vmatpush3.msk.msra.mxu0 %vm2936_vm14, %v5768_v47  ;;  %vm3003_vm14 = vcmp.eq.s32.totalorder %v7133_v38, %v7342_v7  ;;  %vm2883_vm9 = vcmp.eq.s32.totalorder %v7308_v45, %v7139_v49 }
 0x5d3   : > { %5387 = vmatprep.subr.mxu1 %v5766_v63  ;;  %5358 = vmatprep.subr.mxu0 %v5766_v63 }
 0x5d4   : > { %5388 = vmatpush3.msk.msra.mxu1 %vm7741_vm12, %v5768_v47  ;;  %5359 = vmatpush3.msk.msra.mxu0 %vm2935_vm13, %v5768_v47  ;;  %vm3002_vm13 = vcmp.eq.s32.totalorder %v7136_v42, %v7342_v7  ;;  %vm2882_vm12 = vcmp.eq.s32.totalorder %v7123_v36, %v7139_v49 }
 0x5d5   : > { %5389 = vmatprep.subr.mxu1 %v5766_v63  ;;  %5398 = vmatprep.subr.mxu0 %v5766_v63 }
 0x5d6   : > { %5390 = vmatpush3.msk.msra.mxu1 %vm7742_vm6, %v5768_v47  ;;  %5361 = vmatmul.mubr.f32.vlgmr.msra.gmra.mxu0 %v3037_v50  ;;  %vm3001_vm6 = vcmp.eq.s32.totalorder %v7146_v52, %v7342_v7 }
 0x5d7   : > { %5391 = vmatprep.subr.mxu1 %v5766_v63  ;;  %5399 = vmatpush3.msk.msra.mxu0 %vm3003_vm14, %v5768_v47  ;;  %vm3000_vm14 = vcmp.eq.s32.totalorder %v7158_v44, %v7342_v7 }
 0x5d8   : > { %5392 = vmatpush3.msk.msra.mxu1 %vm2883_vm9, %v5768_v47  ;;  %5400 = vmatprep.subr.mxu0 %v5766_v63 }
 0x5d9   : > { %5393 = vmatprep.subr.mxu1 %v5766_v63  ;;  %5401 = vmatpush3.msk.msra.mxu0 %vm3002_vm13, %v5768_v47  ;;  %vm2999_vm13 = vcmp.eq.s32.totalorder %v7172_v56, %v7342_v7 }
 0x5da   : > { %5394 = vmatpush3.msk.msra.mxu1 %vm2882_vm12, %v5768_v47  ;;  %5402 = vmatprep.subr.mxu0 %v5766_v63 }
 0x5db   : > { %5433 = vmatprep.subr.mxu1 %v5766_v63  ;;  %5403 = vmatpush3.msk.msra.mxu0 %vm3001_vm6, %v5768_v47  ;;  %vm2998_vm6 = vcmp.eq.s32.totalorder %v7185_v8, %v7342_v7 }
 0x5dc   : > { %5396 = vmatmul.mubr.f32.vlgmr.msra.gmra.mxu1 %v3036_v55  ;;  %5404 = vmatprep.subr.mxu0 %v5766_v63 }
 0x5dd   : > { %5434 = vmatpush3.msk.msra.mxu1 %vm2897_vm4, %v5768_v47  ;;  %5405 = vmatpush3.msk.msra.mxu0 %vm3000_vm14, %v5768_v47  ;;  %vm2997_vm14 = vcmp.eq.s32.totalorder %v7198_v40, %v7342_v7 }
 0x5de   : > { %5435 = vmatprep.subr.mxu1 %v5766_v63  ;;  %5406 = vmatprep.subr.mxu0 %v5766_v63 }
 0x5df   : > { %5436 = vmatpush3.msk.msra.mxu1 %vm7743_vm11, %v5768_v47  ;;  %5407 = vmatpush3.msk.msra.mxu0 %vm2999_vm13, %v5768_v47  ;;  %vm2996_vm13 = vcmp.eq.s32.totalorder %v7208_v41, %v7342_v7  ;;  %vm2988_vm11 = vcmp.eq.s32.totalorder %v7123_v36, %v7342_v7 }
 0x5e0   : > { %5437 = vmatprep.subr.mxu1 %v5766_v63  ;;  %5408 = vmatprep.subr.mxu0 %v5766_v63 }
 0x5e1   : > { %5438 = vmatpush3.msk.msra.mxu1 %vm7744_vm7, %v5768_v47  ;;  %5409 = vmatpush3.msk.msra.mxu0 %vm2998_vm6, %v5768_v47  ;;  %vm2995_vm6 = vcmp.eq.s32.totalorder %v7224_v12, %v7342_v7  ;;  %vm7771_vm7 = vmmov 0   ;;  %v4252_v12 = vsel %vm2892_vm1, 1.0, %v5766_v63 }
 0x5e2   : > { %5439 = vmatprep.subr.mxu1 %v5766_v63  ;;  %5410 = vmatprep.subr.mxu0 %v5766_v63 }
 0x5e3   : > { %5440 = vmatpush3.msk.msra.mxu1 %vm7745_vm0, %v5768_v47  ;;  %5411 = vmatpush3.msk.msra.mxu0 %vm2997_vm14, %v5768_v47  ;;  %vm2994_vm14 = vcmp.eq.s32.totalorder %v7234_v5, %v7342_v7 }
 0x5e4   : > { %5441 = vmatprep.subr.mxu1 %v5766_v63  ;;  %5412 = vmatprep.subr.mxu0 %v5766_v63 }
 0x5e5   : > { %5442 = vmatpush3.msk.msra.mxu1 %vm7746_vm10, %v5768_v47  ;;  %5413 = vmatpush3.msk.msra.mxu0 %vm2996_vm13, %v5768_v47  ;;  %vm2993_vm13 = vcmp.eq.s32.totalorder %v7250_v37, %v7342_v7  ;;  %v4250_v37 = vsel %vm2890_vm8, 1.0, %v5766_v63 }
 0x5e6   : > { %5443 = vmatprep.subr.mxu1 %v5766_v63  ;;  %5414 = vmatprep.subr.mxu0 %v5766_v63 }
 0x5e7   : > { %5444 = vmatpush3.msk.msra.mxu1 %vm2892_vm1, %v5768_v47  ;;  %5415 = vmatpush3.msk.msra.mxu0 %vm2995_vm6, %v5768_v47  ;;  %vm2992_vm6 = vcmp.eq.s32.totalorder %v7264_v51, %v7342_v7  ;;  %vm7778_vm1 = vcmp.eq.s32.totalorder %v7146_v52, %v7139_v49 }
 0x5e8   : > { %5445 = vmatprep.subr.mxu1 %v5766_v63  ;;  %5416 = vmatprep.subr.mxu0 %v5766_v63 }
 0x5e9   : > { %5446 = vmatpush3.msk.msra.mxu1 %vm2891_vm2, %v5768_v47  ;;  %5417 = vmatpush3.msk.msra.mxu0 %vm2994_vm14, %v5768_v47  ;;  %vm2991_vm14 = vcmp.eq.s32.totalorder %v7280_v48, %v7342_v7 }
 0x5ea   : > { %5447 = vmatprep.subr.mxu1 %v5766_v63  ;;  %5418 = vmatprep.subr.mxu0 %v5766_v63 }
 0x5eb   : > { %5448 = vmatpush3.msk.msra.mxu1 %vm2890_vm8, %v5768_v47  ;;  %5419 = vmatpush3.msk.msra.mxu0 %vm2993_vm13, %v5768_v47  ;;  %vm2990_vm13 = vcmp.eq.s32.totalorder %v7294_v18, %v7342_v7  ;;  %vm7776_vm8 = vcmp.eq.s32.totalorder %v7172_v56, %v7139_v49 }
 0x5ec   : > { %5449 = vmatprep.subr.mxu1 %v5766_v63  ;;  %5420 = vmatprep.subr.mxu0 %v5766_v63 }
 0x5ed   : > { %5450 = vmatpush3.msk.msra.mxu1 %vm2889_vm15, %v5768_v47  ;;  %5421 = vmatpush3.msk.msra.mxu0 %vm2992_vm6, %v5768_v47  ;;  %vm2989_vm6 = vcmp.eq.s32.totalorder %v7308_v45, %v7342_v7 }
 0x5ee   : > { %5451 = vmatprep.subr.mxu1 %v5766_v63  ;;  %5422 = vmatprep.subr.mxu0 %v5766_v63 }
 0x5ef   : > { %5452 = vmatpush3.msk.msra.mxu1 %vm2888_vm5, %v5768_v47  ;;  %5423 = vmatpush3.msk.msra.mxu0 %vm2991_vm14, %v5768_v47  ;;  %vm7769_vm14 = vcmp.eq.s32.totalorder %v7264_v51, %v7139_v49 }
 0x5f0   : > { %5453 = vmatprep.subr.mxu1 %v5766_v63  ;;  %5424 = vmatprep.subr.mxu0 %v5766_v63 }
 0x5f1   : > { %5454 = vmatpush3.msk.msra.mxu1 %vm2887_vm3, %v5768_v47  ;;  %5425 = vmatpush3.msk.msra.mxu0 %vm2990_vm13, %v5768_v47  ;;  %vm7770_vm13 = vcmp.eq.s32.totalorder %v7280_v48, %v7139_v49 }
 0x5f2   : > { %5455 = vmatprep.subr.mxu1 %v5766_v63  ;;  %5426 = vmatprep.subr.mxu0 %v5766_v63 }
 0x5f3   : > { %5456 = vmatpush3.msk.msra.mxu1 %vm7769_vm14, %v5768_v47  ;;  %5427 = vmatpush3.msk.msra.mxu0 %vm2989_vm6, %v5768_v47  ;;  %vm7772_vm6 = vcmp.eq.s32.totalorder %v7294_v18, %v7139_v49 }
 0x5f4   : > { %5457 = vmatprep.subr.mxu1 %v5766_v63  ;;  %5428 = vmatprep.subr.mxu0 %v5766_v63 }
 0x5f5   : > { %5458 = vmatpush3.msk.msra.mxu1 %vm7770_vm13, %v5768_v47  ;;  %5429 = vmatpush3.msk.msra.mxu0 %vm2988_vm11, %v5768_v47 }
 0x5f6   : > { %5430 = vmatprep.mubr.msk.f32.mxu0 %vm7771_vm7, %v5766_v63  ;;  %5459 = vmatprep.subr.mxu1 %v5766_v63 }
 0x5f7   : > { %5431 = vmatmul.mubr.f32.vlgmr.msra.gmra.mxu0 %v3178_v62  ;;  %5460 = vmatpush3.msk.msra.mxu1 %vm7772_vm6, %v5768_v47 }
 0x5f8   : > { %5465 = vmatprep.mubr.msk.f32.mxu1 %vm7771_vm7, %v5766_v63  ;;  %5461 = vmatprep.subr.mxu1 %v5766_v63 }
 0x5f9   : > { %5468 = vmatprep.subr.mxu0 %v3462_v13  ;;  %5462 = vmatpush3.msk.msra.mxu1 %vm2883_vm9, %v5768_v47 }
 0x5fa   : > { %5469 = vmatpush3.msra.mxu0 %v3462_v13  ;;  %5463 = vmatprep.subr.mxu1 %v5766_v63 }
 0x5fb   : > { %5470 = vmatprep.subr.mxu0 %v3461_v19  ;;  %5464 = vmatpush3.msk.msra.mxu1 %vm2882_vm12, %v5768_v47 }
 0x5fc   : > { %5471 = vmatpush3.msra.mxu0 %v3461_v19  ;;  %5466 = vmatmul.mubr.f32.vlgmr.msra.gmra.mxu1 %v3253_v57 }
 0x5fd   : > { %5472 = vmatprep.subr.mxu0 %v3460_v46 }
 0x5fe   : > { %5473 = vmatpush3.msra.mxu0 %v3460_v46 }
 0x5ff   : > { %5474 = vmatprep.subr.mxu0 %v3459_v53 }
 0x600   : > { %5475 = vmatpush3.msra.mxu0 %v3459_v53 }
 0x601   : > { %5476 = vmatprep.subr.mxu0 %v3458_v0 }
 0x602   : > { %5477 = vmatpush3.msra.mxu0 %v3458_v0  ;;  %v3626_v0 = vsub.s32 0, %v7123_v36 }
 0x603   : > { %5478 = vmatprep.subr.mxu0 %v3457_v21 }
 0x604   : > { %5479 = vmatpush3.msra.mxu0 %v3457_v21 }
 0x605   : > { %5480 = vmatprep.subr.mxu0 %v3456_v25 }
 0x606   : > { %5481 = vmatpush3.msra.mxu0 %v3456_v25 }
 0x607   : > { %5482 = vmatprep.subr.mxu0 %v3455_v11 }
 0x608   : > { %5483 = vmatpush3.msra.mxu0 %v3455_v11  ;;  %v4243_v11 = vsel %vm2883_vm9, 1.0, %v5766_v63  ;;  %vm7774_vm9 = vcmp.eq.s32.totalorder %v7280_v48, %v7139_v49  ;;  %v4248_v48 = vsel %vm2888_vm5, 1.0, %v5766_v63 }
 0x609   : > { %5484 = vmatprep.subr.mxu0 %v3454_v3 }
 0x60a   : > { %5485 = vmatpush3.msra.mxu0 %v3454_v3  ;;  %v4242_v3 = vsel %vm2882_vm12, 1.0, %v5766_v63  ;;  %vm7775_vm12 = vcmp.eq.s32.totalorder %v7264_v51, %v7139_v49 }
 0x60b   : > { %5486 = vmatprep.subr.mxu0 %v3453_v15 }
 0x60c   : > { %5487 = vmatpush3.msra.mxu0 %v3453_v15 }
 0x60d   : > { %5488 = vmatprep.subr.mxu0 %v3452_v22 }
 0x60e   : > { %5489 = vmatpush3.msra.mxu0 %v3452_v22  ;;  %v4257_v22 = vsel %vm2897_vm4, 1.0, %v5766_v63  ;;  %vm7773_vm4 = vcmp.eq.s32.totalorder %v7294_v18, %v7139_v49 }
 0x60f   : > { %5490 = vmatprep.subr.mxu0 %v3451_v23 }
 0x610   : > { %5491 = vmatpush3.msra.mxu0 %v3451_v23 }
 0x611   : > { %5492 = vmatprep.subr.mxu0 %v3450_v26 }
 0x612   : > { %5493 = vmatpush3.msra.mxu0 %v3450_v26 }
 0x613   : > { %5494 = vmatprep.subr.mxu0 %v3449_v6 }
 0x614   : > { %5495 = vmatpush3.msra.mxu0 %v3449_v6 }
 0x615   : > { %5496 = vmatprep.subr.mxu0 %v3448_v20 }
 0x616   : > { %5497 = vmatpush3.msra.mxu0 %v3448_v20 }
 0x617   : > { %5498 = vmatprep.subr.mxu0 %v3447_v28 }
 0x618   : > { %5499 = vmatpush3.msra.mxu0 %v3447_v28 }
 0x629   : > { %v3359_v9 = vpop.permute.xlu1 %3358  ;;  %v3353_v30 = vpop.permute.xlu0 %3352 }
 0x62a   : > { %vm3399_vm11 = vcmp.eq.s32.totalorder %v3353_v30, %v3334_v29  ;;  %vm3401_vm7 = vcmp.eq.s32.totalorder %v3359_v9, %v3334_v29 }
 0x62b   : > { %5500 = vmatprep.mubr.msk.f32.mxu0 %vm3399_vm11, %v5768_v47 }
 0x62d   : > { %v3362_v32 = vpop.permute.xlu1 %3361  ;;  %v3356_v34 = vpop.permute.xlu0 %3355 }
 0x62e   : > { %vm3400_vm14 = vcmp.eq.s32.totalorder %v3356_v34, %v3334_v29  ;;  %vm3402_vm13 = vcmp.eq.s32.totalorder %v3362_v32, %v3334_v29 }
 0x62f   : > { %5501 = vmatmul.mubr.msk.f32.vlgmr.msra.gmra.mxu0 %vm3400_vm14, %v5768_v47 }
 0x630   : > { %5503 = vmatprep.mubr.msk.f32.mxu0 %vm3401_vm7, %v5768_v47 }
 0x631   : > { %v3368_v60 = vpop.permute.xlu1 %3367  ;;  %v3365_v4 = vpop.permute.xlu0 %3364 }
 0x632   : > { %vm3403_vm6 = vcmp.eq.s32.totalorder %v3365_v4, %v3334_v29  ;;  %vm3404_vm0 = vcmp.eq.s32.totalorder %v3368_v60, %v3334_v29 }
 0x633   : > { %5504 = vmatmul.mubr.msk.f32.gmra.mxu0 %vm3402_vm13, %v5768_v47 }
 0x634   : > { %5506 = vmatprep.mubr.msk.f32.mxu0 %vm3403_vm6, %v5768_v47 }
 0x635   : > { %v3374_v24 = vpop.permute.xlu1 %3373 }
 0x636   : > { %v3371_v35 = vpop.permute.xlu0 %3370  ;;  %vm3406_vm14 = vcmp.eq.s32.totalorder %v3374_v24, %v3334_v29 }
 0x637   : > { %vm3405_vm11 = vcmp.eq.s32.totalorder %v3371_v35, %v3334_v29  ;;  %5507 = vmatmul.mubr.msk.f32.gmra.mxu0 %vm3404_vm0, %v5768_v47 }
 0x638   : > { %5509 = vmatprep.mubr.msk.f32.mxu0 %vm3405_vm11, %v5768_v47 }
 0x639   : > { %v3380_v2 = vpop.permute.xlu1 %3379 }
 0x63a   : > { %v3377_v39 = vpop.permute.xlu0 %3376  ;;  %vm3408_vm10 = vcmp.eq.s32.totalorder %v3380_v2, %v3334_v29 }
 0x63b   : > { %vm3407_vm7 = vcmp.eq.s32.totalorder %v3377_v39, %v3334_v29  ;;  %5510 = vmatmul.mubr.msk.f32.gmra.mxu0 %vm3406_vm14, %v5768_v47 }
 0x63c   : > { %5512 = vmatprep.mubr.msk.f32.mxu0 %vm3407_vm7, %v5768_v47 }
 0x63d   : > { %v3386_v10 = vpop.permute.xlu1 %3385 }
 0x63e   : > { %v3383_v33 = vpop.permute.xlu0 %3382  ;;  %vm3410_vm6 = vcmp.eq.s32.totalorder %v3386_v10, %v3334_v29  ;;  %v4244_v10 = vsel %vm7773_vm4, 1.0, %v5766_v63 }
 0x63f   : > { %vm3409_vm13 = vcmp.eq.s32.totalorder %v3383_v33, %v3334_v29  ;;  %5513 = vmatmul.mubr.msk.f32.gmra.mxu0 %vm3408_vm10, %v5768_v47 }
 0x640   : > { %5515 = vmatprep.mubr.msk.f32.mxu0 %vm3409_vm13, %v5768_v47 }
 0x642   : > { %v3392_v31 = vpop.permute.xlu1 %3391 }
 0x643   : > { %v3389_v59 = vpop.permute.xlu0 %3388  ;;  %5516 = vmatmul.mubr.msk.f32.gmra.mxu0 %vm3410_vm6, %v5768_v47  ;;  %vm3412_vm11 = vcmp.eq.s32.totalorder %v3392_v31, %v3334_v29  ;;  %v4245_v31 = vsel %vm7774_vm9, 1.0, %v5766_v63 }
 0x644   : > { %vm3411_vm0 = vcmp.eq.s32.totalorder %v3389_v59, %v3334_v29  ;;  %v4246_v59 = vsel %vm7775_vm12, 1.0, %v5766_v63 }
 0x645   : > { %5518 = vmatprep.mubr.msk.f32.mxu0 %vm3411_vm0, %v5768_v47 }
 0x647   : > { %5519 = vmatmul.mubr.msk.f32.gmra.mxu0 %vm3412_vm11, %v5768_v47  ;;  %v3398_v58 = vpop.permute.xlu1 %3397 }
 0x648   : > { %v3395_v54 = vpop.permute.xlu0 %3394  ;;  %vm3414_vm7 = vcmp.eq.s32.totalorder %v3398_v58, %v3334_v29 }
 0x649   : > { %vm3413_vm14 = vcmp.eq.s32.totalorder %v3395_v54, %v3334_v29  ;;  %v4247_v54 = vsel %vm2887_vm3, 1.0, %v5766_v63 }
 0x64a   : > { %5521 = vmatprep.mubr.msk.f32.mxu0 %vm3413_vm14, %v5768_v47 }
 0x64b   : > { %5522 = vmatmul.mubr.msk.f32.gmra.mxu0 %vm3414_vm7, %v5768_v47 }
 0x696   : > { %v3104_v27 = vpop.f32.mrf.mxu0 }
 0x698   : > { %v5362_v61 = vpop.f32.mrf.mxu0 }
 0x699   : > { %v4249_v61 = vsel %vm2889_vm15, 1.0, %v5766_v63  ;;  %vm7779_vm15 = vcmp.eq.s32.totalorder %v7136_v42, %v7139_v49  ;;  %v3610_v42 = vld [vmem:[#allocation7 + $0x10] sm:$0xff] }
 0x69a   : > { %v4256_v56 = vsel %vm7779_vm15, 1.0, %v5766_v63 }
 0x69c   : > { %v3174_v14 = vpop.f32.mrf.mxu1 }
 0x69d   : > { %v3175_v43 = vadd.f32 %v3174_v14, %v3104_v27 }
 0x69e   : > { %v5397_v16 = vpop.f32.mrf.mxu1 }
 0x69f   : > { %v4251_v16 = vsel %vm2891_vm2, 1.0, %v5766_v63  ;;  %vm7777_vm2 = vcmp.eq.s32.totalorder %v7158_v44, %v7139_v49 }
 0x6a0   : > { %v4254_v40 = vsel %vm7777_vm2, 1.0, %v5766_v63 }
 0x6b7   : > { %v3245_v1 = vpop.f32.mrf.mxu0 }
 0x6b8   : > { %v3249_v17 = vadd.f32 %v3245_v1, %v3175_v43  ;;  %v4253_v1 = vsel %vm7776_vm8, 1.0, %v5766_v63 }
 0x6b9   : > { %v5432_v7 = vpop.f32.mrf.mxu0 }
 0x6ba   : > { %v3251_v50 = vmul.f32 0.01, %v3249_v17  ;;  %vm3250_vm10 = vcmp.gt.f32.partialorder %v3249_v17, 0.0  ;;  %v4255_v7 = vsel %vm7778_vm1, 1.0, %v5766_v63 }
 0x6bc   : > { %v3252_v55 = vsel %vm3250_vm10, %v3249_v17, %v3251_v50  ;;  %v3320_v62 = vpop.f32.mrf.mxu1 }
 0x6bd   : > { %v3324_v13 = vsub.f32 %v3252_v55, %v3320_v62  ;;  %v3327_v19 = vadd.f32 1e-16, %v3320_v62  ;;  %v3609_v55 = vld [vmem:[#allocation7 + $0x8] sm:$0xff] }
 0x6be   : > { %v5467_v57 = vpop.f32.mrf.mxu1 }
 0x6bf   : > { %v3325_v46 = vmul.f32 1.442695, %v3324_v13  ;;  %5683 = vrcp.f32 %v3327_v19  ;;  %v3608_v13 = vld [vmem:[#allocation7] sm:$0xff]  ;;  %v3611_v57 = vld [vmem:[#allocation7 + $0x18] sm:$0xff] }
 0x6c1   : > { %5685 = vpow2.f32 %v3325_v46 }
 0x6cc   : > { %v5684_v53 = vpop.eup %5683 }
 0x6cd   : > { %v3330_v47 = vrot.slane %v5684_v53, 1 }
 0x6ce   : > { %v5686_v21 = vpop.eup %5685 }
 0x6cf   : > { %v3332_v25 = vmul.f32 %v5686_v21, %v3330_v47  ;;  %v3613_v47 = vld [vmem:[#allocation7 + $0x28] sm:$0xff] }
 0x6d1   : > { %v7595_v15 = vrot.slane %v3332_v25, %v3626_v0  ;;  %v3612_v25 = vld [vmem:[#allocation7 + $0x20] sm:$0xff] }
 0x6d3   : > { %v3628_v23 = vmul.f32 %v4242_v3, %v7595_v15  ;;  %v3629_v26 = vmul.f32 %v4243_v11, %v7595_v15  ;;  %v7604_v45 = vmul.f32 %v4257_v22, %v7595_v15  ;;  %v3630_v33 = vmul.f32 %v4244_v10, %v7595_v15  ;;  %v3620_v10 = vld [vmem:[#allocation7 + $0x60] sm:$0xff] }
 0x6d4   : > { %v3631_v18 = vmul.f32 %v4245_v31, %v7595_v15  ;;  %v3632_v58 = vmul.f32 %v4246_v59, %v7595_v15  ;;  %v3633_v51 = vmul.f32 %v4247_v54, %v7595_v15  ;;  %v3634_v27 = vmul.f32 %v4248_v48, %v7595_v15  ;;  %v3623_v59 = vld [vmem:[#allocation7 + $0x78] sm:$0xff]  ;;  %v3622_v54 = vld [vmem:[#allocation7 + $0x70] sm:$0xff] }
 0x6d5   : > { %5556 = vmatprep.mubr.f32.mxu1 %v3628_v23  ;;  %v3635_v5 = vmul.f32 %v4249_v61, %v7595_v15  ;;  %v3636_v14 = vmul.f32 %v4250_v37, %v7595_v15  ;;  %v3637_v41 = vmul.f32 %v4251_v16, %v7595_v15  ;;  %v3638_v43 = vmul.f32 %v4252_v12, %v7595_v15 }
 0x6d6   : > { %v3639_v8 = vmul.f32 %v4253_v1, %v7595_v15  ;;  %v3640_v17 = vmul.f32 %v4254_v40, %v7595_v15  ;;  %v3641_v44 = vmul.f32 %v4255_v7, %v7595_v15  ;;  %v3642_v50 = vmul.f32 %v4256_v56, %v7595_v15  ;;  %v3615_v15 = vld [vmem:[#allocation7 + $0x38] sm:$0xff] }
 0x6ef   : > { %v5502_v6 = vpop.f32.mrf.mxu0 }
 0x6f1   : > { %v3529_v20 = vpop.f32.mrf.mxu0 }
 0x6f3   : > { %v5505_v28 = vpop.f32.mrf.mxu0 }
 0x6f5   : > { %v3539_v36 = vpop.f32.mrf.mxu0 }
 0x6f7   : > { %v5508_v29 = vpop.f32.mrf.mxu0 }
 0x6f9   : > { %v3549_v9 = vpop.f32.mrf.mxu0 }
 0x6fb   : > { %v5511_v30 = vpop.f32.mrf.mxu0 }
 0x6fd   : > { %v3559_v32 = vpop.f32.mrf.mxu0 }
 0x6ff   : > { %v5514_v34 = vpop.f32.mrf.mxu0 }
 0x701   : > { %v3569_v60 = vpop.f32.mrf.mxu0 }
 0x703   : > { %v5517_v38 = vpop.f32.mrf.mxu0 }
 0x705   : > { %v3579_v4 = vpop.f32.mrf.mxu0 }
 0x707   : > { %v5520_v24 = vpop.f32.mrf.mxu0 }
 0x709   : > { %v3589_v35 = vpop.f32.mrf.mxu0 }
 0x70b   : > { %v5523_v2 = vpop.f32.mrf.mxu0 }
 0x70c   : > { %5524 = vmatprep.subr.mxu1 %v5523_v2 }
 0x70d   : > { %v3599_v39 = vpop.f32.mrf.mxu0  ;;  %5525 = vmatpush3.msra.mxu1 %v5523_v2 }
 0x70e   : > { %5526 = vmatprep.subr.mxu1 %v3599_v39 }
 0x70f   : > { %5527 = vmatpush3.msra.mxu1 %v3599_v39 }
 0x710   : > { %5528 = vmatprep.subr.mxu1 %v5520_v24 }
 0x711   : > { %5529 = vmatpush3.msra.mxu1 %v5520_v24 }
 0x712   : > { %5530 = vmatprep.subr.mxu1 %v3589_v35 }
 0x713   : > { %5531 = vmatpush3.msra.mxu1 %v3589_v35  ;;  %v3621_v35 = vld [vmem:[#allocation7 + $0x68] sm:$0xff] }
 0x714   : > { %5532 = vmatprep.subr.mxu1 %v5517_v38 }
 0x715   : > { %5533 = vmatpush3.msra.mxu1 %v5517_v38  ;;  %v3618_v38 = vld [vmem:[#allocation7 + $0x50] sm:$0xff] }
 0x716   : > { %5534 = vmatprep.subr.mxu1 %v3579_v4 }
 0x717   : > { %5535 = vmatpush3.msra.mxu1 %v3579_v4 }
 0x718   : > { %5536 = vmatprep.subr.mxu1 %v5514_v34 }
 0x719   : > { %5537 = vmatpush3.msra.mxu1 %v5514_v34 }
 0x71a   : > { %5538 = vmatprep.subr.mxu1 %v3569_v60 }
 0x71b   : > { %5539 = vmatpush3.msra.mxu1 %v3569_v60 }
 0x71c   : > { %5540 = vmatprep.subr.mxu1 %v5511_v30 }
 0x71d   : > { %5541 = vmatpush3.msra.mxu1 %v5511_v30 }
 0x71e   : > { %5542 = vmatprep.subr.mxu1 %v3559_v32 }
 0x71f   : > { %5543 = vmatpush3.msra.mxu1 %v3559_v32  ;;  %v3619_v32 = vld [vmem:[#allocation7 + $0x58] sm:$0xff] }
 0x720   : > { %5544 = vmatprep.subr.mxu1 %v5508_v29 }
 0x721   : > { %5545 = vmatpush3.msra.mxu1 %v5508_v29  ;;  %v3616_v29 = vld [vmem:[#allocation7 + $0x40] sm:$0xff] }
 0x722   : > { %5546 = vmatprep.subr.mxu1 %v3549_v9 }
 0x723   : > { %5547 = vmatpush3.msra.mxu1 %v3549_v9 }
 0x724   : > { %5548 = vmatprep.subr.mxu1 %v5505_v28 }
 0x725   : > { %5549 = vmatpush3.msra.mxu1 %v5505_v28 }
 0x726   : > { %5550 = vmatprep.subr.mxu1 %v3539_v36 }
 0x727   : > { %5551 = vmatpush3.msra.mxu1 %v3539_v36 }
 0x728   : > { %5552 = vmatprep.subr.mxu1 %v5502_v6 }
 0x729   : > { %5553 = vmatpush3.msra.mxu1 %v5502_v6 }
 0x72a   : > { %5554 = vmatprep.subr.mxu1 %v3529_v20 }
 0x72b   : > { %5555 = vmatpush3.msra.mxu1 %v3529_v20  ;;  %v3617_v20 = vld [vmem:[#allocation7 + $0x48] sm:$0xff] }
 0x72c   : > { %5557 = vmatmul.mubr.f32.vlgmr.msra.gmra.mxu1 %v3629_v26  ;;  %v3614_v26 = vld [vmem:[#allocation7 + $0x30] sm:$0xff] }
 0x72d   : > { %5559 = vmatprep.mubr.f32.mxu1 %v3630_v33 }
 0x730   : > { %5560 = vmatmul.mubr.f32.gmra.mxu1 %v3631_v18 }
 0x731   : > { %5562 = vmatprep.mubr.f32.mxu1 %v3632_v58 }
 0x734   : > { %5563 = vmatmul.mubr.f32.gmra.mxu1 %v3633_v51 }
 0x735   : > { %5565 = vmatprep.mubr.f32.mxu1 %v3634_v27 }
 0x738   : > { %5566 = vmatmul.mubr.f32.gmra.mxu1 %v3635_v5 }
 0x739   : > { %5568 = vmatprep.mubr.f32.mxu1 %v3636_v14 }
 0x73c   : > { %5569 = vmatmul.mubr.f32.gmra.mxu1 %v3637_v41 }
 0x73d   : > { %5571 = vmatprep.mubr.f32.mxu1 %v3638_v43 }
 0x740   : > { %5572 = vmatmul.mubr.f32.gmra.mxu1 %v3639_v8 }
 0x741   : > { %5574 = vmatprep.mubr.f32.mxu1 %v3640_v17 }
 0x744   : > { %5575 = vmatmul.mubr.f32.gmra.mxu1 %v3641_v44 }
 0x745   : > { %5577 = vmatprep.mubr.f32.mxu1 %v3642_v50 }
 0x748   : > { %5578 = vmatmul.mubr.f32.gmra.mxu1 %v7604_v45 }
 0x7ec   : > { %v5558_v62 = vpop.f32.mrf.mxu1 }
 0x7ed   : > { %v3790_v52 = vadd.f32 %v5558_v62, %v3609_v55 }
 0x7ee   : > { %v3710_v19 = vpop.f32.mrf.mxu1 }
 0x7ef   : > { %3806 = vst [vmem:[#allocation7 + $0x8] sm:$0xff] %v3790_v52  ;;  %v3789_v46 = vadd.f32 %v3710_v19, %v3608_v13 }
 0x7f0   : > { %v5561_v53 = vpop.f32.mrf.mxu1 }
 0x7f1   : > { %3805 = vst [vmem:[#allocation7] sm:$0xff] %v3789_v46  ;;  %v3792_v63 = vadd.f32 %v5561_v53, %v3611_v57 }
 0x7f2   : > { %v3720_v49 = vpop.f32.mrf.mxu1 }
 0x7f3   : > { %3808 = vst [vmem:[#allocation7 + $0x18] sm:$0xff] %v3792_v63  ;;  %v3791_v0 = vadd.f32 %v3720_v49, %v3610_v42 }
 0x7f4   : > { %v5564_v21 = vpop.f32.mrf.mxu1 }
 0x7f5   : > { %3807 = vst [vmem:[#allocation7 + $0x10] sm:$0xff] %v3791_v0  ;;  %v3794_v11 = vadd.f32 %v5564_v21, %v3613_v47 }
 0x7f6   : > { %v3730_v3 = vpop.f32.mrf.mxu1 }
 0x7f7   : > { %3810 = vst [vmem:[#allocation7 + $0x28] sm:$0xff] %v3794_v11  ;;  %v3793_v22 = vadd.f32 %v3730_v3, %v3612_v25 }
 0x7f8   : > { %v5567_v23 = vpop.f32.mrf.mxu1 }
 0x7f9   : > { %3809 = vst [vmem:[#allocation7 + $0x20] sm:$0xff] %v3793_v22  ;;  %v3796_v45 = vadd.f32 %v5567_v23, %v3615_v15 }
 0x7fa   : > { %v3740_v6 = vpop.f32.mrf.mxu1 }
 0x7fb   : > { %3812 = vst [vmem:[#allocation7 + $0x38] sm:$0xff] %v3796_v45  ;;  %v3795_v28 = vadd.f32 %v3740_v6, %v3614_v26 }
 0x7fc   : > { %v5570_v36 = vpop.f32.mrf.mxu1 }
 0x7fd   : > { %3811 = vst [vmem:[#allocation7 + $0x30] sm:$0xff] %v3795_v28  ;;  %v3798_v9 = vadd.f32 %v5570_v36, %v3617_v20 }
 0x7fe   : > { %v3750_v30 = vpop.f32.mrf.mxu1 }
 0x7ff   : > { %3814 = vst [vmem:[#allocation7 + $0x48] sm:$0xff] %v3798_v9  ;;  %v3797_v34 = vadd.f32 %v3750_v30, %v3616_v29 }
 0x800   : > { %v5573_v60 = vpop.f32.mrf.mxu1 }
 0x801   : > { %3813 = vst [vmem:[#allocation7 + $0x40] sm:$0xff] %v3797_v34  ;;  %v3800_v4 = vadd.f32 %v5573_v60, %v3619_v32 }
 0x802   : > { %v3760_v24 = vpop.f32.mrf.mxu1 }
 0x803   : > { %3816 = vst [vmem:[#allocation7 + $0x58] sm:$0xff] %v3800_v4  ;;  %v3799_v2 = vadd.f32 %v3760_v24, %v3618_v38 }
 0x804   : > { %v5576_v39 = vpop.f32.mrf.mxu1 }
 0x805   : > { %3815 = vst [vmem:[#allocation7 + $0x50] sm:$0xff] %v3799_v2  ;;  %v3802_v33 = vadd.f32 %v5576_v39, %v3621_v35 }
 0x806   : > { %v3770_v31 = vpop.f32.mrf.mxu1 }
 0x807   : > { %3818 = vst [vmem:[#allocation7 + $0x68] sm:$0xff] %v3802_v33  ;;  %v3801_v18 = vadd.f32 %v3770_v31, %v3620_v10 }
 0x808   : > { %v5579_v58 = vpop.f32.mrf.mxu1 }
 0x809   : > { %3817 = vst [vmem:[#allocation7 + $0x60] sm:$0xff] %v3801_v18  ;;  %v3804_v48 = vadd.f32 %v5579_v58, %v3623_v59 }
 0x80a   : > { %v3780_v51 = vpop.f32.mrf.mxu1 }
 0x80b   : > { %3820 = vst [vmem:[#allocation7 + $0x78] sm:$0xff] %v3804_v48  ;;  %v3803_v27 = vadd.f32 %v3780_v51, %v3622_v54 }
 0x80d   : > { %3819 = vst [vmem:[#allocation7 + $0x70] sm:$0xff] %v3803_v27 }
 0x80e PF: > { %p3821_p0 = scmp.eq.s32.totalorder %s5737_s29, 2 }
 0x810   : > { %p3822_p1 = pnand %p3821_p0, %p2856_p12 }
 0x812   : > { %3825 = sbr.rel (%p3822_p1) target bundleno = 2082 (0x822), region = 96 }
 0x817   : > { %v3826_v61 = vld [vmem:[#allocation7] sm:$0xff]  ;;  %v3827_v37 = vld [vmem:[#allocation7 + $0x8] sm:$0xff]  ;;  %v3828_v5 = vld [vmem:[#allocation7 + $0x10] sm:$0xff] }
 0x818   : > { %v3842_v14 = vmax.f32 %v3826_v61, 0.0  ;;  %v3843_v16 = vmax.f32 %v3827_v37, 0.0  ;;  %v3844_v12 = vmax.f32 %v3828_v5, 0.0  ;;  %v3829_v41 = vld [vmem:[#allocation7 + $0x18] sm:$0xff]  ;;  %v3830_v43 = vld [vmem:[#allocation7 + $0x20] sm:$0xff]  ;;  %v3831_v1 = vld [vmem:[#allocation7 + $0x28] sm:$0xff] }
 0x819   : > { %v3845_v40 = vmax.f32 %v3829_v41, 0.0  ;;  %v3846_v8 = vmax.f32 %v3830_v43, 0.0  ;;  %v3847_v17 = vmax.f32 %v3831_v1, 0.0  ;;  %v3832_v7 = vld [vmem:[#allocation7 + $0x30] sm:$0xff]  ;;  %v3833_v56 = vld [vmem:[#allocation7 + $0x38] sm:$0xff]  ;;  %v3834_v44 = vld [vmem:[#allocation7 + $0x40] sm:$0xff] }
 0x81a   : > { %3858 = vst [vmem:[#allocation7] sm:$0xff] %v3842_v14  ;;  %3859 = vst [vmem:[#allocation7 + $0x8] sm:$0xff] %v3843_v16  ;;  %v3848_v50 = vmax.f32 %v3832_v7, 0.0  ;;  %v3849_v55 = vmax.f32 %v3833_v56, 0.0  ;;  %v3850_v62 = vmax.f32 %v3834_v44, 0.0  ;;  %v3835_v13 = vld [vmem:[#allocation7 + $0x48] sm:$0xff] }
 0x81b   : > { %3860 = vst [vmem:[#allocation7 + $0x10] sm:$0xff] %v3844_v12  ;;  %v3836_v52 = vld [vmem:[#allocation7 + $0x50] sm:$0xff]  ;;  %v3837_v19 = vld [vmem:[#allocation7 + $0x58] sm:$0xff]  ;;  %3861 = vst [vmem:[#allocation7 + $0x18] sm:$0xff] %v3845_v40  ;;  %v3851_v57 = vmax.f32 %v3835_v13, 0.0 }
 0x81c   : > { %3862 = vst [vmem:[#allocation7 + $0x20] sm:$0xff] %v3846_v8  ;;  %3863 = vst [vmem:[#allocation7 + $0x28] sm:$0xff] %v3847_v17  ;;  %v3852_v46 = vmax.f32 %v3836_v52, 0.0  ;;  %v3853_v53 = vmax.f32 %v3837_v19, 0.0  ;;  %v3838_v42 = vld [vmem:[#allocation7 + $0x60] sm:$0xff]  ;;  %v3839_v63 = vld [vmem:[#allocation7 + $0x68] sm:$0xff] }
 0x81d   : > { %v3840_v49 = vld [vmem:[#allocation7 + $0x70] sm:$0xff]  ;;  %3864 = vst [vmem:[#allocation7 + $0x30] sm:$0xff] %v3848_v50  ;;  %3865 = vst [vmem:[#allocation7 + $0x38] sm:$0xff] %v3849_v55  ;;  %v3854_v47 = vmax.f32 %v3838_v42, 0.0  ;;  %v3855_v0 = vmax.f32 %v3839_v63, 0.0  ;;  %v3841_v25 = vld [vmem:[#allocation7 + $0x78] sm:$0xff] }
 0x81e   : > { %3866 = vst [vmem:[#allocation7 + $0x40] sm:$0xff] %v3850_v62  ;;  %v3856_v21 = vmax.f32 %v3840_v49, 0.0  ;;  %3867 = vst [vmem:[#allocation7 + $0x48] sm:$0xff] %v3851_v57  ;;  %v3857_v11 = vmax.f32 %v3841_v25, 0.0 }
 0x81f   : > { %3868 = vst [vmem:[#allocation7 + $0x50] sm:$0xff] %v3852_v46  ;;  %3869 = vst [vmem:[#allocation7 + $0x58] sm:$0xff] %v3853_v53 }
 0x820   : > { %3870 = vst [vmem:[#allocation7 + $0x60] sm:$0xff] %v3854_v47  ;;  %3871 = vst [vmem:[#allocation7 + $0x68] sm:$0xff] %v3855_v0 }
 0x821   : > { %3872 = vst [vmem:[#allocation7 + $0x70] sm:$0xff] %v3856_v21  ;;  %3873 = vst [vmem:[#allocation7 + $0x78] sm:$0xff] %v3857_v11 }
 0x822 PF: > { %s7781_s29 = sld [smem:[#allocation13_spill]]  ;;  %s5769_s25 = smov [#allocation7]  }
 0x823   : > { %s3880_s28 = sshll.u32 %s5769_s25, 4  ;;  %s3881_s28 = int_to_ptr.vmem [resolvable:$true] %s3880_s28 }
 0x824   : > { %s5687_s24 = scalar_lea.vmem %s3881_s28, 2048  ;;  %p5694_p6 = scmp.lt.s32.totalorder %s3881_s28, %s3881_s28 }
 0x825   : > { %p5688_p3 = scmp.ne.s32.totalorder %s3881_s28, %s5687_s24  ;;  %p5695_p7 = scmp.lt.s32.totalorder %s5687_s24, %s5687_s24 }
 0x827   : > { %p5696_p8 = por %p5695_p7, %p5694_p6 }
 0x828   : > { %s7782_s17 = sadd.s32 4294967295, %s7781_s29  }
 0x829   : > { %p7677_p2 = scmp.eq.s32.totalorder %s7782_s17, 8 }
 0x82b   : > { %p5689_p4 = pnand %p5688_p3, %p7677_p2 }
 0x82d   : > { %p5690_p5 = pneg %p5689_p4 }
 0x82f   : > { %p5697_p9 = pnand %p5696_p8, %p5690_p5 }
 0x831   : > { %5700 = shalt.err (!%p5697_p9)
}
 0x832   : > { %s5770_s19 = smov 128   ;;  %s5771_s20 = smov 8  }
 0x833   : > { %s7784_s11 = sld [smem:[#allocation17_spill]] }
 0x839   : > { %5613 = dma.vmem_to_hbm [thread:$0]  (%p7677_p2), %s3881_s28, 2048, %s7784_s11, [#allocation8], %s5770_s19, %s5770_s19, %s5771_s20  }
 0x83a   : > { %5732 = dma.done.wait (%p7677_p2), [#allocation8], 2048  }
 0x83b   : > { %5734 = vsyncadd (%p7677_p2), [#allocation8], 4294965248 }
 0x83c PF: > { %s7785_s30 = sld [smem:[#allocation13_spill]] }
 0x83d   : > { %s7786_s29 = sld [smem:[#allocation11_spill]] }
 0x83e   : > { %s7788_s15 = sld [smem:[#allocation14_spill]] }
 0x83f   : > { %s7789_s16 = sld [smem:[#allocation15_spill]] }
 0x842   : > { %s25_s17 = sadd.s32 1, %s7785_s30   ;;  %s7787_s30 = sld [smem:[#allocation12_spill]] }
 0x843   : > { %p22_p10 = scmp.ge.s32.totalorder %s25_s17, 11  }
 0x845   :  { %24 = sbr.rel (!%p22_p10) target bundleno = 6 (0x6), region = 138 }
 0x84a   :  { %3896 = vsyncpa [#allocation8], 1 }
 0x84b   :  { %3898 = vsyncpa [#allocation8 + $0x1], 1 }

</bundles_post_ra>
